<compile_context>
chip_gen: v6e
topology: v6e:2x2x1
jax: 0.10.0
libtpu: 0.0.40
codegen_flags: <defaults>
</compile_context>

<pallas_src>
import functools
import math

import jax
import jax.numpy as jnp
from jax.experimental import pallas as pl
from jax.experimental.pallas import tpu as pltpu

D_MODEL = 32
N_HEADS = 4
D_HEAD = D_MODEL // N_HEADS
RM_NUM_SLOTS = 3
RM_D_MODEL = D_MODEL               # the module requires rm_d_model == d_model
RM_DIM = RM_NUM_SLOTS * RM_D_MODEL
EPS = 1e-6
NEG_INF = -1e9

# Row offsets inside the single packed (SLAB_ROWS, 128) parameter slab.
R_W1 = 0                            # [W1_gamma | W1_beta]          (RM_DIM, 2D)
R_W2 = R_W1 + RM_DIM                # blockdiag(W2_gamma, W2_beta)  (2D, 2D)
R_QK = R_W2 + 2 * D_MODEL           # [Wq/sqrt(dk) | Wk]            (D, 2D)
R_V = R_QK + D_MODEL                # [Wv_h @ Wo_h]_h concatenated  (D, H*D)
R_VEC = R_V + D_MODEL               # packed small vectors          (8, 128)
SLAB_ROWS = R_VEC + 8


def _pick_block_b(B, S):
    bb = min(B, max(1, 128 // S))      # ~128 tokens (MXU M dim) per block
    while B % bb:
        bb -= 1
    # keep >= 2 grid blocks so dimension_semantics=("parallel",) can use both
    # TensorCores on v7x; the extra grid step is negligible on 1-TC v5e/v6e.
    if B // bb < 2 and bb % 2 == 0:
        bb //= 2
    return bb


def pack_params(p):
    """One-time host-side packing into a single 128-lane parameter slab.

    Folds 1/sqrt(dk) into Wq/bq, Wo into Wv (per head), bv@Wo+bo into one output
    bias, fuses Q/K and the two MCLN MLPs, and lays everything out at
    sublane-aligned, lane-0-based offsets so the kernel only takes static slices.
    """
    D, H, DK = D_MODEL, N_HEADS, D_HEAD
    scale = 1.0 / math.sqrt(DK)
    w_qk = jnp.concatenate([p['wq'] * scale, p['wk']], axis=1)                # (D, 2D)
    w_v = jnp.concatenate(
        [p['wv'][:, h * DK:(h + 1) * DK] @ p['wo'][h * DK:(h + 1) * DK, :]
         for h in range(H)], axis=1)                                          # (D, H*D)
    b_out = p['bv'] @ p['wo'] + p['bo']                                       # (D,)
    w1_gb = jnp.concatenate([p['w1g'], p['w1b']], axis=1)                     # (NM, 2D)
    w2_gb = (jnp.zeros((2 * D, 2 * D), jnp.float32)
             .at[:D, :D].set(p['w2g']).at[D:, D:].set(p['w2b']))              # block-diag

    vecs = jnp.zeros((8, 128), jnp.float32)
    vecs = vecs.at[0, :2 * D].set(jnp.concatenate([p['bq'] * scale, p['bk']]))
    vecs = vecs.at[1, :D].set(b_out)
    vecs = vecs.at[1, D:2 * D].set(p['gamma'])
    vecs = vecs.at[1, 2 * D:3 * D].set(p['beta'])
    vecs = vecs.at[2, :2 * D].set(jnp.concatenate([p['b1g'], p['b1b']]))
    vecs = vecs.at[3, :2 * D].set(jnp.concatenate([p['b2g'], p['b2b']]))

    slab = jnp.zeros((SLAB_ROWS, 128), jnp.float32)
    slab = slab.at[R_W1:R_W2, :2 * D].set(w1_gb)
    slab = slab.at[R_W2:R_QK, :2 * D].set(w2_gb)
    slab = slab.at[R_QK:R_V, :2 * D].set(w_qk)
    slab = slab.at[R_V:R_VEC, :H * D].set(w_v)
    slab = slab.at[R_VEC:, :].set(vecs)
    return slab


@functools.lru_cache(maxsize=None)
def _build_call(B, S, block_b, matmul_dtype_name):
    D, NM, DK, H = D_MODEL, RM_DIM, D_HEAD, N_HEADS
    G = B // block_b
    M = block_b * S
    mm_dtype = jnp.dtype(matmul_dtype_name)

    def cst(a):   # matmul-operand cast (bf16 option for v6e/v7x); accumulation stays f32
        return a if mm_dtype == jnp.float32 else a.astype(mm_dtype)

    def kernel(x_ref, mem_ref, kb_ref, p_ref, out_ref):
        x = x_ref[...]               # (M, D)   flattened tokens of this block
        mem = mem_ref[...]           # (M, NM)
        kb = kb_ref[...]             # (block_b, 1, S) additive key-padding bias

        # static slices of the packed parameter slab (lane-0 based, sublane-aligned)
        w1_gb = p_ref[R_W1:R_W2, 0:2 * D]        # (NM, 2D)
        w2_gb = p_ref[R_W2:R_QK, 0:2 * D]        # (2D, 2D) block-diagonal
        w_qk = p_ref[R_QK:R_V, 0:2 * D]          # (D, 2D)  [Wq/sqrt(dk) | Wk]
        w_v = p_ref[R_V:R_VEC, :]                # (D, H*D) Wo folded per head
        vecs = p_ref[R_VEC:SLAB_ROWS, :]         # (8, 128) packed small vectors

        b_qk = vecs[0:1, 0:2 * D]
        b_out = vecs[1:2, 0:D]                   # bv@Wo + bo
        gamma = vecs[1:2, D:2 * D]
        beta = vecs[1:2, 2 * D:3 * D]
        b1_gb = vecs[2:3, 0:2 * D]
        b2_gb = vecs[3:4, 0:2 * D]

        # ---- memory-driven conditional LayerNorm (MCLN) ----
        hid = jnp.dot(cst(mem), cst(w1_gb), preferred_element_type=jnp.float32) + b1_gb
        hid = jnp.maximum(hid, 0.0)
        dgb = jnp.dot(cst(hid), cst(w2_gb), preferred_element_type=jnp.float32) + b2_gb
        gamma_hat = gamma + dgb[:, 0:D]
        beta_hat = beta + dgb[:, D:2 * D]

        mean = jnp.mean(x, axis=-1, keepdims=True)
        # torch std(): unbiased (ddof=1); module divides by (std+eps), not sqrt(var+eps)
        var = jnp.sum((x - mean) ** 2, axis=-1, keepdims=True) * (1.0 / (D - 1))
        inv_std = pl.reciprocal(jnp.sqrt(var) + EPS, approx=True)   # EUP, ~2^-12 rel err
        xn = gamma_hat * (x - mean) * inv_std + beta_hat

        # ---- sublayer: multi-head self-attn, per-batch block-diagonal softmax ----
        qk = jnp.dot(cst(xn), cst(w_qk), preferred_element_type=jnp.float32) + b_qk
        v = jnp.dot(cst(xn), cst(w_v), preferred_element_type=jnp.float32)   # Wo folded
        q3 = qk[:, 0:D].reshape(block_b, S, D)      # leading-dim split: free reshape
        k3 = qk[:, D:2 * D].reshape(block_b, S, D)
        v3 = v.reshape(block_b, S, H * D)

        attn = None
        for h in range(H):
            qh = q3[:, :, h * DK:(h + 1) * DK]      # (bb, S, dk); 1/sqrt(dk) folded
            kh = k3[:, :, h * DK:(h + 1) * DK]
            vh = v3[:, :, h * D:(h + 1) * D]        # (bb, S, D); already @ Wo_h
            s = jnp.einsum('bqd,bkd->bqk', cst(qh), cst(kh),
                           preferred_element_type=jnp.float32) + kb          # (bb, S, S)
            s = s - jnp.max(s, axis=-1, keepdims=True)
            e = jnp.exp(s)
            denom = jnp.sum(e, axis=-1, keepdims=True)                       # (bb, S, 1)
            pv = jnp.einsum('bqk,bkd->bqd', cst(e), cst(vh),
                            preferred_element_type=jnp.float32)              # (bb, S, D)
            term = pv * pl.reciprocal(denom, approx=True)   # normalise after PV matmul
            attn = term if attn is None else attn + term

        # residual; dropout == identity (eval); b_out = bv@Wo + bo folded on host
        out_ref[...] = x + attn.reshape(M, D) + b_out

    in_specs = [
        pl.BlockSpec((M, D), lambda g: (g, 0)),                 # x       (B*S, D)
        pl.BlockSpec((M, NM), lambda g: (g, 0)),                # memory  (B*S, NM)
        pl.BlockSpec((block_b, 1, S), lambda g: (g, 0, 0)),     # key-padding bias
        pl.BlockSpec((SLAB_ROWS, 128), lambda g: (0, 0)),       # packed parameter slab
    ]
    out_spec = pl.BlockSpec((M, D), lambda g: (g, 0))
    out_shape = jax.ShapeDtypeStruct((B * S, D), jnp.float32)

    flops_block = (2 * M * NM * 2 * D            # MCLN MLP layer 1
                   + 2 * M * 2 * D * 2 * D       # MCLN MLP layer 2
                   + 2 * M * D * 2 * D           # Q, K projection
                   + 2 * M * D * H * D           # V projection (Wo folded)
                   + H * (2 * block_b * S * S * DK + 2 * block_b * S * S * D)
                   + 16 * M * D)                 # elementwise
    cost = pl.CostEstimate(
        flops=G * flops_block,
        transcendentals=G * (H * block_b * S * S + 2 * M),
        bytes_accessed=4 * (B * S * (2 * D + NM) + B * S + SLAB_ROWS * 128),
    )

    return pl.pallas_call(
        kernel,
        out_shape=out_shape,
        grid_spec=pltpu.PrefetchScalarGridSpec(
            num_scalar_prefetch=0,
            grid=(G,),
            in_specs=in_specs,
            out_specs=out_spec,
        ),
        compiler_params=pltpu.CompilerParams(dimension_semantics=("parallel",)),
        cost_estimate=cost,
    )


def _conditional_sublayer_connection(x, mask, memory, slab, *, block_b=None,
                                     matmul_dtype="float32"):
    B, S, D = x.shape
    assert D == D_MODEL and memory.shape[-1] == RM_DIM
    bb = block_b or _pick_block_b(B, S)
    assert B % bb == 0
    # tiny additive key-padding bias (0 = may attend, -1e9 = padded key); replaces
    # the old dense (M, M) bias DMA
    key_bias = jnp.where(mask.reshape(B, 1, S) > 0.5, 0.0, NEG_INF).astype(jnp.float32)
    call = _build_call(B, S, bb, matmul_dtype)
    out = call(x.reshape(B * S, D), memory.reshape(B * S, RM_DIM), key_bias, slab)
    return out.reshape(B, S, D)


conditional_sublayer_connection = jax.jit(
    _conditional_sublayer_connection, static_argnames=("block_b", "matmul_dtype"))


# ---------------- pure-JAX reference (same math as the PyTorch module) ----------------
def ref_conditional_sublayer_connection(x, mask, memory, p):
    B, S, D = x.shape
    dk = D // N_HEADS
    dg = jnp.maximum(memory @ p['w1g'] + p['b1g'], 0.0) @ p['w2g'] + p['b2g']
    db = jnp.maximum(memory @ p['w1b'] + p['b1b'], 0.0) @ p['w2b'] + p['b2b']
    gamma_hat = p['gamma'] + dg
    beta_hat = p['beta'] + db
    mean = jnp.mean(x, axis=-1, keepdims=True)
    var = jnp.sum((x - mean) ** 2, axis=-1, keepdims=True) / (D - 1)
    xn = gamma_hat * (x - mean) / (jnp.sqrt(var) + EPS) + beta_hat

    q = (xn @ p['wq'] + p['bq']).reshape(B, S, N_HEADS, dk).transpose(0, 2, 1, 3)
    k = (xn @ p['wk'] + p['bk']).reshape(B, S, N_HEADS, dk).transpose(0, 2, 1, 3)
    v = (xn @ p['wv'] + p['bv']).reshape(B, S, N_HEADS, dk).transpose(0, 2, 1, 3)
    scores = jnp.einsum('bhqd,bhkd->bhqk', q, k) / math.sqrt(dk)
    scores = jnp.where(mask[:, None, :, :] == 0, NEG_INF, scores)
    attn = jnp.einsum('bhqk,bhkd->bhqd', jax.nn.softmax(scores, axis=-1), v)
    attn = attn.transpose(0, 2, 1, 3).reshape(B, S, D)
    return x + (attn @ p['wo'] + p['bo'])


if __name__ == "__main__":
    B, S, D = 32, 8, D_MODEL           # one grid block = 16*8 = 128 tokens, grid = 2
    key = jax.random.PRNGKey(0)
    ks = jax.random.split(key, 16)

    def init(k, shape, scale=0.05):
        return (scale * jax.random.normal(k, shape)).astype(jnp.float32)

    params = {
        'gamma': jnp.ones((D,), jnp.float32), 'beta': jnp.zeros((D,), jnp.float32),
        'w1g': init(ks[0], (RM_DIM, D)), 'b1g': jnp.full((D,), 0.1, jnp.float32),
        'w2g': init(ks[1], (D, D)),      'b2g': jnp.full((D,), 0.1, jnp.float32),
        'w1b': init(ks[2], (RM_DIM, D)), 'b1b': jnp.full((D,), 0.1, jnp.float32),
        'w2b': init(ks[3], (D, D)),      'b2b': jnp.full((D,), 0.1, jnp.float32),
        'wq': init(ks[4], (D, D)), 'bq': init(ks[5], (D,)),
        'wk': init(ks[6], (D, D)), 'bk': init(ks[7], (D,)),
        'wv': init(ks[8], (D, D)), 'bv': init(ks[9], (D,)),
        'wo': init(ks[10], (D, D)), 'bo': init(ks[11], (D,)),
    }

    x = jax.random.normal(ks[12], (B, S, D), dtype=jnp.float32)
    memory = 0.5 * jax.random.normal(ks[13], (B, S, RM_DIM), dtype=jnp.float32)
    mask = jnp.ones((B, 1, S), jnp.float32)            # 1 = attend, 0 = padded key
    mask = mask.at[1, 0, -2:].set(0.0)
    mask = mask.at[7, 0, -3:].set(0.0)
    mask = mask.at[19, 0, -1:].set(0.0)

    slab = pack_params(params)
    out = conditional_sublayer_connection(x, mask, memory, slab)
    out = jax.block_until_ready(out)

    with jax.default_matmul_precision("highest"):
        ref = ref_conditional_sublayer_connection(x, mask, memory, params)
    assert out.shape == (B, S, D)
    err = float(jnp.max(jnp.abs(out - ref)))
    assert err < 5e-3, f"max abs err = {err}"
    print("KERNEL_OK")
</pallas_src>

<mosaic_0001>
module attributes {stable_mosaic.version = 11 : i64} {
  func.func @kernel(%arg0: i32, %arg1: memref<128x32xf32, #tpu.memory_space<vmem>>, %arg2: memref<128x96xf32, #tpu.memory_space<vmem>>, %arg3: memref<16x1x8xf32, #tpu.memory_space<vmem>>, %arg4: memref<232x128xf32, #tpu.memory_space<vmem>>, %arg5: memref<128x32xf32, #tpu.memory_space<vmem>>) attributes {dimension_semantics = [#tpu.dimension_semantics<parallel>], iteration_bounds = array<i64: 2>, scalar_prefetch = 0 : i64, scratch_operands = 0 : i64, tpu.core_type = #tpu.core_type<tc>, window_params = [{transform_indices = @transform_0, window_bounds = array<i64: 128, 32>}, {transform_indices = @transform_1, window_bounds = array<i64: 128, 96>}, {transform_indices = @transform_2, window_bounds = array<i64: 16, 1, 8>}, {pipeline_mode = #tpu.pipeline_mode<synchronous>, transform_indices = @transform_3, window_bounds = array<i64: 232, 128>}, {transform_indices = @transform_4, window_bounds = array<i64: 128, 32>}]} {
    %c0 = arith.constant 0 : index
    %c0_0 = arith.constant 0 : index
    %0 = vector.load %arg1[%c0, %c0_0] : memref<128x32xf32, #tpu.memory_space<vmem>>, vector<128x32xf32>
    %c0_1 = arith.constant 0 : index
    %c0_2 = arith.constant 0 : index
    %1 = vector.load %arg2[%c0_1, %c0_2] : memref<128x96xf32, #tpu.memory_space<vmem>>, vector<128x96xf32>
    %c0_3 = arith.constant 0 : index
    %c0_4 = arith.constant 0 : index
    %c0_5 = arith.constant 0 : index
    %2 = vector.load %arg3[%c0_3, %c0_4, %c0_5] : memref<16x1x8xf32, #tpu.memory_space<vmem>>, vector<16x1x8xf32>
    %c0_6 = arith.constant 0 : index
    %c0_7 = arith.constant 0 : index
    %3 = vector.load %arg4[%c0_6, %c0_7] : memref<232x128xf32, #tpu.memory_space<vmem>>, vector<96x64xf32>
    %c96 = arith.constant 96 : index
    %c0_8 = arith.constant 0 : index
    %4 = vector.load %arg4[%c96, %c0_8] : memref<232x128xf32, #tpu.memory_space<vmem>>, vector<64x64xf32>
    %c160 = arith.constant 160 : index
    %c0_9 = arith.constant 0 : index
    %5 = vector.load %arg4[%c160, %c0_9] : memref<232x128xf32, #tpu.memory_space<vmem>>, vector<32x64xf32>
    %c192 = arith.constant 192 : index
    %c0_10 = arith.constant 0 : index
    %6 = vector.load %arg4[%c192, %c0_10] : memref<232x128xf32, #tpu.memory_space<vmem>>, vector<32x128xf32>
    %c224 = arith.constant 224 : index
    %c0_11 = arith.constant 0 : index
    %7 = vector.load %arg4[%c224, %c0_11] : memref<232x128xf32, #tpu.memory_space<vmem>>, vector<8x128xf32>
    %8 = vector.extract_strided_slice %7 {offsets = [0, 0], sizes = [1, 64], strides = [1, 1]} : vector<8x128xf32> to vector<1x64xf32>
    %9 = vector.extract_strided_slice %7 {offsets = [1, 0], sizes = [1, 32], strides = [1, 1]} : vector<8x128xf32> to vector<1x32xf32>
    %10 = vector.extract_strided_slice %7 {offsets = [1, 32], sizes = [1, 32], strides = [1, 1]} : vector<8x128xf32> to vector<1x32xf32>
    %11 = vector.extract_strided_slice %7 {offsets = [1, 64], sizes = [1, 32], strides = [1, 1]} : vector<8x128xf32> to vector<1x32xf32>
    %12 = vector.extract_strided_slice %7 {offsets = [2, 0], sizes = [1, 64], strides = [1, 1]} : vector<8x128xf32> to vector<1x64xf32>
    %13 = vector.extract_strided_slice %7 {offsets = [3, 0], sizes = [1, 64], strides = [1, 1]} : vector<8x128xf32> to vector<1x64xf32>
    %cst = arith.constant dense<0.000000e+00> : vector<128x64xf32>
    %14 = tpu.matmul %1, %3, %cst {dimension_numbers = #tpu.dot_dimension_numbers<[1], [0], [0], [1], [0, 0, 1, 1], [], []>} : vector<128x96xf32>, vector<96x64xf32>, vector<128x64xf32> -> vector<128x64xf32>
    %15 = vector.broadcast %12 : vector<1x64xf32> to vector<128x64xf32>
    %16 = arith.addf %14, %15 : vector<128x64xf32>
    %cst_12 = arith.constant 0.000000e+00 : f32
    %17 = vector.broadcast %cst_12 : f32 to vector<128x64xf32>
    %18 = arith.maximumf %16, %17 : vector<128x64xf32>
    %cst_13 = arith.constant dense<0.000000e+00> : vector<128x64xf32>
    %19 = tpu.matmul %18, %4, %cst_13 {dimension_numbers = #tpu.dot_dimension_numbers<[1], [0], [0], [1], [0, 0, 1, 1], [], []>} : vector<128x64xf32>, vector<64x64xf32>, vector<128x64xf32> -> vector<128x64xf32>
    %20 = vector.broadcast %13 : vector<1x64xf32> to vector<128x64xf32>
    %21 = arith.addf %19, %20 : vector<128x64xf32>
    %22 = vector.extract_strided_slice %21 {offsets = [0, 0], sizes = [128, 32], strides = [1, 1]} : vector<128x64xf32> to vector<128x32xf32>
    %23 = vector.broadcast %10 : vector<1x32xf32> to vector<128x32xf32>
    %24 = arith.addf %23, %22 : vector<128x32xf32>
    %25 = vector.extract_strided_slice %21 {offsets = [0, 32], sizes = [128, 32], strides = [1, 1]} : vector<128x64xf32> to vector<128x32xf32>
    %26 = vector.broadcast %11 : vector<1x32xf32> to vector<128x32xf32>
    %27 = arith.addf %26, %25 : vector<128x32xf32>
    %cst_14 = arith.constant dense<0.000000e+00> : vector<128xf32>
    %28 = vector.multi_reduction <add>, %0, %cst_14 [1] : vector<128x32xf32> to vector<128xf32>
    %29 = vector.shape_cast %28 : vector<128xf32> to vector<128x1xf32>
    %cst_15 = arith.constant 3.200000e+01 : f32
    %30 = vector.broadcast %cst_15 : f32 to vector<128x1xf32>
    %31 = arith.divf %29, %30 : vector<128x1xf32>
    %32 = vector.broadcast %31 : vector<128x1xf32> to vector<128x32xf32>
    %33 = arith.subf %0, %32 : vector<128x32xf32>
    %34 = arith.mulf %33, %33 : vector<128x32xf32>
    %cst_16 = arith.constant dense<0.000000e+00> : vector<128xf32>
    %35 = vector.multi_reduction <add>, %34, %cst_16 [1] : vector<128x32xf32> to vector<128xf32>
    %36 = vector.shape_cast %35 : vector<128xf32> to vector<128x1xf32>
    %cst_17 = arith.constant 0.0322580636 : f32
    %37 = vector.broadcast %cst_17 : f32 to vector<128x1xf32>
    %38 = arith.mulf %36, %37 : vector<128x1xf32>
    %39 = math.sqrt %38 : vector<128x1xf32>
    %cst_18 = arith.constant 9.99999997E-7 : f32
    %40 = vector.broadcast %cst_18 : f32 to vector<128x1xf32>
    %41 = arith.addf %39, %40 : vector<128x1xf32>
    %42 = tpu.reciprocal %41 {approx = true} : vector<128x1xf32> -> vector<128x1xf32>
    %43 = vector.broadcast %31 : vector<128x1xf32> to vector<128x32xf32>
    %44 = arith.subf %0, %43 : vector<128x32xf32>
    %45 = arith.mulf %24, %44 : vector<128x32xf32>
    %46 = vector.broadcast %42 : vector<128x1xf32> to vector<128x32xf32>
    %47 = arith.mulf %45, %46 : vector<128x32xf32>
    %48 = arith.addf %47, %27 : vector<128x32xf32>
    %cst_19 = arith.constant dense<0.000000e+00> : vector<128x64xf32>
    %49 = tpu.matmul %48, %5, %cst_19 {dimension_numbers = #tpu.dot_dimension_numbers<[1], [0], [0], [1], [0, 0, 1, 1], [], []>} : vector<128x32xf32>, vector<32x64xf32>, vector<128x64xf32> -> vector<128x64xf32>
    %50 = vector.broadcast %8 : vector<1x64xf32> to vector<128x64xf32>
    %51 = arith.addf %49, %50 : vector<128x64xf32>
    %cst_20 = arith.constant dense<0.000000e+00> : vector<128x128xf32>
    %52 = tpu.matmul %48, %6, %cst_20 {dimension_numbers = #tpu.dot_dimension_numbers<[1], [0], [0], [1], [0, 0, 1, 1], [], []>} : vector<128x32xf32>, vector<32x128xf32>, vector<128x128xf32> -> vector<128x128xf32>
    %53 = vector.extract_strided_slice %51 {offsets = [0, 0], sizes = [128, 32], strides = [1, 1]} : vector<128x64xf32> to vector<128x32xf32>
    %54 = vector.shape_cast %53 : vector<128x32xf32> to vector<16x8x32xf32>
    %55 = vector.extract_strided_slice %51 {offsets = [0, 32], sizes = [128, 32], strides = [1, 1]} : vector<128x64xf32> to vector<128x32xf32>
    %56 = vector.shape_cast %55 : vector<128x32xf32> to vector<16x8x32xf32>
    %57 = vector.shape_cast %52 : vector<128x128xf32> to vector<16x8x128xf32>
    %58 = vector.extract_strided_slice %54 {offsets = [0, 0, 0], sizes = [16, 8, 8], strides = [1, 1, 1]} : vector<16x8x32xf32> to vector<16x8x8xf32>
    %59 = vector.extract_strided_slice %56 {offsets = [0, 0, 0], sizes = [16, 8, 8], strides = [1, 1, 1]} : vector<16x8x32xf32> to vector<16x8x8xf32>
    %60 = vector.extract_strided_slice %57 {offsets = [0, 0, 0], sizes = [16, 8, 32], strides = [1, 1, 1]} : vector<16x8x128xf32> to vector<16x8x32xf32>
    "tpu.trace_start"() <{level = 10 : i32, message = "bqd,bkd->bqk"}> : () -> ()
    %cst_21 = arith.constant dense<0.000000e+00> : vector<16x8x8xf32>
    %61 = tpu.matmul %58, %59, %cst_21 {dimension_numbers = #tpu.dot_dimension_numbers<[2], [2], [1], [1], [0, 0, 0, 1, 1, 1], [0], [0]>} : vector<16x8x8xf32>, vector<16x8x8xf32>, vector<16x8x8xf32> -> vector<16x8x8xf32>
    "tpu.trace_stop"() : () -> ()
    %62 = vector.broadcast %2 : vector<16x1x8xf32> to vector<16x8x8xf32>
    %63 = arith.addf %61, %62 : vector<16x8x8xf32>
    %cst_22 = arith.constant dense<0xFF800000> : vector<16x8xf32>
    %64 = vector.multi_reduction <maximumf>, %63, %cst_22 [2] : vector<16x8x8xf32> to vector<16x8xf32>
    %65 = vector.shape_cast %64 : vector<16x8xf32> to vector<16x8x1xf32>
    %66 = vector.broadcast %65 : vector<16x8x1xf32> to vector<16x8x8xf32>
    %67 = arith.subf %63, %66 : vector<16x8x8xf32>
    %68 = math.exp %67 : vector<16x8x8xf32>
    %cst_23 = arith.constant dense<0.000000e+00> : vector<16x8xf32>
    %69 = vector.multi_reduction <add>, %68, %cst_23 [2] : vector<16x8x8xf32> to vector<16x8xf32>
    %70 = vector.shape_cast %69 : vector<16x8xf32> to vector<16x8x1xf32>
    "tpu.trace_start"() <{level = 10 : i32, message = "bqk,bkd->bqd"}> : () -> ()
    %cst_24 = arith.constant dense<0.000000e+00> : vector<16x8x32xf32>
    %71 = tpu.matmul %68, %60, %cst_24 {dimension_numbers = #tpu.dot_dimension_numbers<[2], [1], [1], [2], [0, 0, 0, 1, 1, 2], [0], [0]>} : vector<16x8x8xf32>, vector<16x8x32xf32>, vector<16x8x32xf32> -> vector<16x8x32xf32>
    "tpu.trace_stop"() : () -> ()
    %72 = tpu.reciprocal %70 {approx = true} : vector<16x8x1xf32> -> vector<16x8x1xf32>
    %73 = vector.broadcast %72 : vector<16x8x1xf32> to vector<16x8x32xf32>
    %74 = arith.mulf %71, %73 : vector<16x8x32xf32>
    %75 = vector.extract_strided_slice %54 {offsets = [0, 0, 8], sizes = [16, 8, 8], strides = [1, 1, 1]} : vector<16x8x32xf32> to vector<16x8x8xf32>
    %76 = vector.extract_strided_slice %56 {offsets = [0, 0, 8], sizes = [16, 8, 8], strides = [1, 1, 1]} : vector<16x8x32xf32> to vector<16x8x8xf32>
    %77 = vector.extract_strided_slice %57 {offsets = [0, 0, 32], sizes = [16, 8, 32], strides = [1, 1, 1]} : vector<16x8x128xf32> to vector<16x8x32xf32>
    "tpu.trace_start"() <{level = 10 : i32, message = "bqd,bkd->bqk"}> : () -> ()
    %cst_25 = arith.constant dense<0.000000e+00> : vector<16x8x8xf32>
    %78 = tpu.matmul %75, %76, %cst_25 {dimension_numbers = #tpu.dot_dimension_numbers<[2], [2], [1], [1], [0, 0, 0, 1, 1, 1], [0], [0]>} : vector<16x8x8xf32>, vector<16x8x8xf32>, vector<16x8x8xf32> -> vector<16x8x8xf32>
    "tpu.trace_stop"() : () -> ()
    %79 = vector.broadcast %2 : vector<16x1x8xf32> to vector<16x8x8xf32>
    %80 = arith.addf %78, %79 : vector<16x8x8xf32>
    %cst_26 = arith.constant dense<0xFF800000> : vector<16x8xf32>
    %81 = vector.multi_reduction <maximumf>, %80, %cst_26 [2] : vector<16x8x8xf32> to vector<16x8xf32>
    %82 = vector.shape_cast %81 : vector<16x8xf32> to vector<16x8x1xf32>
    %83 = vector.broadcast %82 : vector<16x8x1xf32> to vector<16x8x8xf32>
    %84 = arith.subf %80, %83 : vector<16x8x8xf32>
    %85 = math.exp %84 : vector<16x8x8xf32>
    %cst_27 = arith.constant dense<0.000000e+00> : vector<16x8xf32>
    %86 = vector.multi_reduction <add>, %85, %cst_27 [2] : vector<16x8x8xf32> to vector<16x8xf32>
    %87 = vector.shape_cast %86 : vector<16x8xf32> to vector<16x8x1xf32>
    "tpu.trace_start"() <{level = 10 : i32, message = "bqk,bkd->bqd"}> : () -> ()
    %cst_28 = arith.constant dense<0.000000e+00> : vector<16x8x32xf32>
    %88 = tpu.matmul %85, %77, %cst_28 {dimension_numbers = #tpu.dot_dimension_numbers<[2], [1], [1], [2], [0, 0, 0, 1, 1, 2], [0], [0]>} : vector<16x8x8xf32>, vector<16x8x32xf32>, vector<16x8x32xf32> -> vector<16x8x32xf32>
    "tpu.trace_stop"() : () -> ()
    %89 = tpu.reciprocal %87 {approx = true} : vector<16x8x1xf32> -> vector<16x8x1xf32>
    %90 = vector.broadcast %89 : vector<16x8x1xf32> to vector<16x8x32xf32>
    %91 = arith.mulf %88, %90 : vector<16x8x32xf32>
    %92 = arith.addf %74, %91 : vector<16x8x32xf32>
    %93 = vector.extract_strided_slice %54 {offsets = [0, 0, 16], sizes = [16, 8, 8], strides = [1, 1, 1]} : vector<16x8x32xf32> to vector<16x8x8xf32>
    %94 = vector.extract_strided_slice %56 {offsets = [0, 0, 16], sizes = [16, 8, 8], strides = [1, 1, 1]} : vector<16x8x32xf32> to vector<16x8x8xf32>
    %95 = vector.extract_strided_slice %57 {offsets = [0, 0, 64], sizes = [16, 8, 32], strides = [1, 1, 1]} : vector<16x8x128xf32> to vector<16x8x32xf32>
    "tpu.trace_start"() <{level = 10 : i32, message = "bqd,bkd->bqk"}> : () -> ()
    %cst_29 = arith.constant dense<0.000000e+00> : vector<16x8x8xf32>
    %96 = tpu.matmul %93, %94, %cst_29 {dimension_numbers = #tpu.dot_dimension_numbers<[2], [2], [1], [1], [0, 0, 0, 1, 1, 1], [0], [0]>} : vector<16x8x8xf32>, vector<16x8x8xf32>, vector<16x8x8xf32> -> vector<16x8x8xf32>
    "tpu.trace_stop"() : () -> ()
    %97 = vector.broadcast %2 : vector<16x1x8xf32> to vector<16x8x8xf32>
    %98 = arith.addf %96, %97 : vector<16x8x8xf32>
    %cst_30 = arith.constant dense<0xFF800000> : vector<16x8xf32>
    %99 = vector.multi_reduction <maximumf>, %98, %cst_30 [2] : vector<16x8x8xf32> to vector<16x8xf32>
    %100 = vector.shape_cast %99 : vector<16x8xf32> to vector<16x8x1xf32>
    %101 = vector.broadcast %100 : vector<16x8x1xf32> to vector<16x8x8xf32>
    %102 = arith.subf %98, %101 : vector<16x8x8xf32>
    %103 = math.exp %102 : vector<16x8x8xf32>
    %cst_31 = arith.constant dense<0.000000e+00> : vector<16x8xf32>
    %104 = vector.multi_reduction <add>, %103, %cst_31 [2] : vector<16x8x8xf32> to vector<16x8xf32>
    %105 = vector.shape_cast %104 : vector<16x8xf32> to vector<16x8x1xf32>
    "tpu.trace_start"() <{level = 10 : i32, message = "bqk,bkd->bqd"}> : () -> ()
    %cst_32 = arith.constant dense<0.000000e+00> : vector<16x8x32xf32>
    %106 = tpu.matmul %103, %95, %cst_32 {dimension_numbers = #tpu.dot_dimension_numbers<[2], [1], [1], [2], [0, 0, 0, 1, 1, 2], [0], [0]>} : vector<16x8x8xf32>, vector<16x8x32xf32>, vector<16x8x32xf32> -> vector<16x8x32xf32>
    "tpu.trace_stop"() : () -> ()
    %107 = tpu.reciprocal %105 {approx = true} : vector<16x8x1xf32> -> vector<16x8x1xf32>
    %108 = vector.broadcast %107 : vector<16x8x1xf32> to vector<16x8x32xf32>
    %109 = arith.mulf %106, %108 : vector<16x8x32xf32>
    %110 = arith.addf %92, %109 : vector<16x8x32xf32>
    %111 = vector.extract_strided_slice %54 {offsets = [0, 0, 24], sizes = [16, 8, 8], strides = [1, 1, 1]} : vector<16x8x32xf32> to vector<16x8x8xf32>
    %112 = vector.extract_strided_slice %56 {offsets = [0, 0, 24], sizes = [16, 8, 8], strides = [1, 1, 1]} : vector<16x8x32xf32> to vector<16x8x8xf32>
    %113 = vector.extract_strided_slice %57 {offsets = [0, 0, 96], sizes = [16, 8, 32], strides = [1, 1, 1]} : vector<16x8x128xf32> to vector<16x8x32xf32>
    "tpu.trace_start"() <{level = 10 : i32, message = "bqd,bkd->bqk"}> : () -> ()
    %cst_33 = arith.constant dense<0.000000e+00> : vector<16x8x8xf32>
    %114 = tpu.matmul %111, %112, %cst_33 {dimension_numbers = #tpu.dot_dimension_numbers<[2], [2], [1], [1], [0, 0, 0, 1, 1, 1], [0], [0]>} : vector<16x8x8xf32>, vector<16x8x8xf32>, vector<16x8x8xf32> -> vector<16x8x8xf32>
    "tpu.trace_stop"() : () -> ()
    %115 = vector.broadcast %2 : vector<16x1x8xf32> to vector<16x8x8xf32>
    %116 = arith.addf %114, %115 : vector<16x8x8xf32>
    %cst_34 = arith.constant dense<0xFF800000> : vector<16x8xf32>
    %117 = vector.multi_reduction <maximumf>, %116, %cst_34 [2] : vector<16x8x8xf32> to vector<16x8xf32>
    %118 = vector.shape_cast %117 : vector<16x8xf32> to vector<16x8x1xf32>
    %119 = vector.broadcast %118 : vector<16x8x1xf32> to vector<16x8x8xf32>
    %120 = arith.subf %116, %119 : vector<16x8x8xf32>
    %121 = math.exp %120 : vector<16x8x8xf32>
    %cst_35 = arith.constant dense<0.000000e+00> : vector<16x8xf32>
    %122 = vector.multi_reduction <add>, %121, %cst_35 [2] : vector<16x8x8xf32> to vector<16x8xf32>
    %123 = vector.shape_cast %122 : vector<16x8xf32> to vector<16x8x1xf32>
    "tpu.trace_start"() <{level = 10 : i32, message = "bqk,bkd->bqd"}> : () -> ()
    %cst_36 = arith.constant dense<0.000000e+00> : vector<16x8x32xf32>
    %124 = tpu.matmul %121, %113, %cst_36 {dimension_numbers = #tpu.dot_dimension_numbers<[2], [1], [1], [2], [0, 0, 0, 1, 1, 2], [0], [0]>} : vector<16x8x8xf32>, vector<16x8x32xf32>, vector<16x8x32xf32> -> vector<16x8x32xf32>
    "tpu.trace_stop"() : () -> ()
    %125 = tpu.reciprocal %123 {approx = true} : vector<16x8x1xf32> -> vector<16x8x1xf32>
    %126 = vector.broadcast %125 : vector<16x8x1xf32> to vector<16x8x32xf32>
    %127 = arith.mulf %124, %126 : vector<16x8x32xf32>
    %128 = arith.addf %110, %127 : vector<16x8x32xf32>
    %129 = vector.shape_cast %128 : vector<16x8x32xf32> to vector<128x32xf32>
    %130 = arith.addf %0, %129 : vector<128x32xf32>
    %131 = vector.broadcast %9 : vector<1x32xf32> to vector<128x32xf32>
    %132 = arith.addf %130, %131 : vector<128x32xf32>
    %c0_37 = arith.constant 0 : index
    %c0_38 = arith.constant 0 : index
    %133 = vector.load %arg5[%c0_37, %c0_38] : memref<128x32xf32, #tpu.memory_space<vmem>>, vector<128x32xf32>
    tpu.vector_store %arg5[%c0_37, %c0_38], %132 {strides = array<i32>} : memref<128x32xf32, #tpu.memory_space<vmem>>, vector<128x32xf32>,
    return
  }
  func.func @transform_0(%arg0: i32) -> (i32, i32) {
    %c0_i32 = arith.constant 0 : i32
    %c0_i32_0 = arith.constant 0 : i32
    return %arg0, %c0_i32 : i32, i32
  }
  func.func @transform_1(%arg0: i32) -> (i32, i32) {
    %c0_i32 = arith.constant 0 : i32
    %c0_i32_0 = arith.constant 0 : i32
    return %arg0, %c0_i32 : i32, i32
  }
  func.func @transform_2(%arg0: i32) -> (i32, i32, i32) {
    %c0_i32 = arith.constant 0 : i32
    %c0_i32_0 = arith.constant 0 : i32
    %c0_i32_1 = arith.constant 0 : i32
    return %arg0, %c0_i32, %c0_i32_0 : i32, i32, i32
  }
  func.func @transform_3(%arg0: i32) -> (i32, i32) {
    %c0_i32 = arith.constant 0 : i32
    %c0_i32_0 = arith.constant 0 : i32
    %c0_i32_1 = arith.constant 0 : i32
    return %c0_i32, %c0_i32_0 : i32, i32
  }
  func.func @transform_4(%arg0: i32) -> (i32, i32) {
    %c0_i32 = arith.constant 0 : i32
    %c0_i32_0 = arith.constant 0 : i32
    return %arg0, %c0_i32 : i32, i32
  }
}

</mosaic_0001>

<bundles_post_ra>
// kernel: _conditional_sublayer_connection.1
= control target key start
LH: loop header
LB: loop body
LE: loop exit
PB: predicated region body
PF: predicated region fallthrough
CT: control target
= control target key end

     0   :  { %s17813_s0 = inlined_call_operand.hbm [shape: f32[256,32], index: 0, kind: input, shape index: {}]   ;;  %s17814_s1 = inlined_call_operand.hbm [shape: f32[256,96], index: 1, kind: input, shape index: {}]   ;;  %s17815_s2 = inlined_call_operand.vmem [shape: f32[32,1,8], index: 2, kind: input, shape index: {}]   ;;  %s17816_s3 = inlined_call_operand.hbm [shape: f32[232,128], index: 3, kind: input, shape index: {}]   ;;  %s17817_s4 = inlined_call_operand.hbm [shape: f32[256,32], index: 4, kind: output, shape index: {}]  }
   0x1   :  { %17905 = sst [smem:[#allocation100_spill]] %s17813_s0 }
   0x2   :  { %17906 = sst [smem:[#allocation101_spill]] %s17816_s3 }
   0x3   :  { %9 = vsyncpa [#allocation3], 0 }
   0x4   :  { %11 = vsyncpa [#allocation3 + $0x1], 0 }
   0x5   :  { %12 = vsyncpa [#allocation6], 0 }
   0x6   :  { %14 = vsyncpa [#allocation6 + $0x1], 0 }
   0x7   :  { %15 = vsyncpa [#allocation4], 0 }
   0x8   :  { %17 = vsyncpa [#allocation4 + $0x1], 0  ;;  %s14620_s15 = smov 0   ;;  %s14622_s16 = smov 0  }
   0x9   :  { %s14624_s17 = smov 0   ;;  %s14626_s18 = smov 0  }
   0xa LB: > { %s14641_s19 = sadd.s32 4294967295, %s14574_s18   ;;  %s12554_s20 = sadd.s32 4294967294, %s14574_s18   ;;  %s14574_s18 = sphi %s14626_s18, %s18173_s18   ;;  %s14570_s17 = sphi %s14624_s17, %s18172_s17   ;;  %s14566_s16 = sphi %s14622_s16, %s18171_s16   ;;  %s14562_s15 = sphi %s14620_s15, %s18170_s15  }
   0xb   : > { %p43_p0 = scmp.ne.s32.totalorder %s14566_s16, %s14562_s15  ;;  %p17822_p1 = scmp.eq.s32.totalorder %s14641_s19, 0 }
   0xc   : > { %p146_p3 = scmp.eq.s32.totalorder %s12554_s20, 1  ;;  %p12555_p5 = scmp.ge.s32.totalorder %s14574_s18, 1 }
   0xd   : > { %p14650_p4 = por %p17822_p1, %p43_p0  ;;  %p153_p7 = scmp.lt.s32.totalorder %s14574_s18, 3 }
   0xe   : > { %p14655_p6 = por %p146_p3, %p43_p0  ;;  %s14576_s24 = smov [#allocation7]  }
   0xf   : > { %s17907_s21 = scalar_select %p14650_p4, 1, 0 }
  0x10   : > { %s17908_s22 = scalar_select %p14655_p6, 1, 0 }
  0x11   : > { %p14660_p8 = pnand %p12555_p5, %p153_p7  ;;  %s165_s25 = sshll.u32 %s14576_s24, 4  ;;  %s166_s25 = int_to_ptr.vmem [resolvable:$true] %s165_s25 }
  0x12   : > { %s14674_s27 = sadd.s32 1, %s14574_s18   ;;  %s30_s28 = sadd.s32 1, %s14570_s17 }
  0x13   : > { %p14000_p9 = pneg %p14660_p8  ;;  %s27_s29 = ssub.s32 %s14574_s18, %s14674_s27 }
  0x14   : > { %s14431_s30 = scalar_lea.vmem %s166_s25, 3712  ;;  %p14439_p5 = scmp.lt.s32.totalorder %s166_s25, %s166_s25 }
  0x15   : > { %p14669_p11 = pnand %p14000_p9, %p17822_p1  ;;  %p14432_p13 = scmp.ne.s32.totalorder %s166_s25, %s14431_s30 }
  0x16   : > { %p14440_p7 = scmp.lt.s32.totalorder %s14431_s30, %s14431_s30 }
  0x17   : > { %p14422_p12 = pneg %p14669_p11 }
  0x18   : > { %p14441_p10 = por %p14440_p7, %p14439_p5 }
  0x19   : > { %p14434_p0 = pnand %p14432_p13, %p14422_p12 }
  0x1b   : > { %p14435_p3 = pneg %p14434_p0 }
  0x1d   : > { %p14442_p2 = pnand %p14441_p10, %p14435_p3 }
  0x1f   : > { %14445 = shalt.err (!%p14442_p2)
}
  0x20   : > { %s17818_s5 = smov 128   ;;  %s17820_s6 = smov 8  }
  0x21   : > { %s17911_s3 = sld [smem:[#allocation101_spill]]  ;;  %p28_p2 = scmp.eq.s32.totalorder %s27_s29, 0 }
  0x22   : > { %p37_p9 = scmp.ne.s32.totalorder %s14570_s17, %s14566_s16  ;;  %p38_p10 = scmp.eq.s32.totalorder %s14574_s18, 0 }
  0x23   : > { %p14016_p12 = scmp.lt.s32.totalorder %s14574_s18, 2  ;;  %p17913_p0 = scmp.eq.s32.totalorder %s14641_s19, 1 }
  0x24   : > { %s14694_s9 = scalar_select %p28_p2, %s14570_s17, %s30_s28  }
  0x25   : > { %p39_p13 = por %p38_p10, %p37_p9  ;;  %p14698_p3 = por %p17913_p0, %p37_p9 }
  0x26   : > { %17912 = sst [smem:[#allocation13_spill]] %s14694_s9  ;;  %s179_s11 = sand.u32 1, %s14570_s17  }
  0x27   : > { %14003 = dma.hbm_to_vmem [thread:$0]  (!%p14669_p11), %s17911_s3, 3712, %s166_s25, [#allocation6], %s17818_s5, %s17818_s5, %s17820_s6  }
  0x28   : > { %s17914_s10 = scalar_select %p14698_p3, 1, 0 }
  0x29   : > { %s12847_s12 = sshll.u32 %s14574_s18, 11  ;;  %s14704_s13 = sshll.u32 %s179_s11, 7 }
  0x2a   : > { %s17915_s0 = sld [smem:[#allocation100_spill]]  ;;  %s183_s25 = scalar_lea.vmem [#allocation2], %s14704_s13 }
  0x2b   : > { %s190_s26 = sshll.u32 %s183_s25, 4  ;;  %p14712_p11 = pnand %p14016_p12, %p39_p13  ;;  %s14716_s26 = int_to_ptr.vmem [resolvable:$true] %s190_s26 }
  0x2c   : > { %s14721_s7 = scalar_lea.hbm %s17814_s1, %s12847_s12  ;;  %s14723_s8 = scalar_lea.sflag [#allocation3], %s179_s11 }
  0x2d   : > { %p14448_p7 = pneg %p14712_p11 }
  0x30   : > { %s14709_s24 = scalar_lea.hbm %s17915_s0, %s12847_s12  ;;  %s14451_s5 = scalar_lea.hbm %s17915_s0, 4096 }
  0x31   : > { %s14446_s14 = scalar_lea.hbm %s14709_s24, 2048  ;;  %p14452_p10 = scmp.lt.s32.totalorder %s14709_s24, %s17915_s0 }
  0x32   : > { %p14447_p5 = scmp.ne.s32.totalorder %s14709_s24, %s14446_s14  ;;  %p14453_p12 = scmp.lt.s32.totalorder %s14451_s5, %s14446_s14 }
  0x34   : > { %p14449_p2 = pnand %p14448_p7, %p14447_p5  ;;  %p14454_p13 = por %p14453_p12, %p14452_p10 }
  0x36   : > { %p14450_p9 = pneg %p14449_p2 }
  0x38   : > { %p14455_p0 = pnand %p14454_p13, %p14450_p9 }
  0x3a   : > { %14458 = shalt.err (!%p14455_p0)
}
  0x3b   : > { %s14459_s11 = scalar_lea.vmem %s14716_s26, 2048  ;;  %s14579_s12 = smov [#allocation2]  }
  0x3c   : > { %p14460_p1 = scmp.ne.s32.totalorder %s14716_s26, %s14459_s11  ;;  %s14464_s29 = sshll.u32 %s14579_s12, 4  ;;  %s14465_s29 = int_to_ptr.vmem [resolvable:$false] %s14464_s29 }
  0x3d   : > { %s14466_s30 = scalar_lea.vmem %s14465_s29, 4096  ;;  %p14467_p6 = scmp.lt.s32.totalorder %s14716_s26, %s14465_s29 }
  0x3e   : > { %p14462_p5 = pnand %p14460_p1, %p14448_p7  ;;  %p14468_p3 = scmp.lt.s32.totalorder %s14466_s30, %s14459_s11 }
  0x40   : > { %p14463_p2 = pneg %p14462_p5  ;;  %p14469_p4 = por %p14468_p3, %p14467_p6 }
  0x42   : > { %p14470_p10 = pnand %p14469_p4, %p14463_p2 }
  0x44   : > { %14473 = shalt.err (!%p14470_p10)
}
  0x45   : > { %s17917_s3 = smov 8   ;;  %s17918_s5 = smov 128  }
  0x46   : > { %14007 = dma.hbm_to_vmem [thread:$0]  (!%p14712_p11), %s14709_s24, 2048, %s14716_s26, %s14723_s8, %s17918_s5, %s17918_s5, %s17917_s3  }
  0x47   : > { %s204_s6 = scalar_lea.vmem [#allocation5], %s14704_s13  ;;  %s200_s20 = sand.u32 1, %s14574_s18  }
  0x48   : > { %s211_s14 = sshll.u32 %s204_s6, 4  ;;  %s201_s25 = scalar_lea.sflag [#allocation6], %s200_s20  ;;  %s14755_s14 = int_to_ptr.vmem [resolvable:$true] %s211_s14 }
  0x49   : > { %s14474_s11 = scalar_lea.hbm %s14721_s7, 2048  ;;  %s14479_s30 = scalar_lea.hbm %s17814_s1, 4096 }
  0x4a   : > { %p14475_p1 = scmp.ne.s32.totalorder %s14721_s7, %s14474_s11  ;;  %p14480_p3 = scmp.lt.s32.totalorder %s14721_s7, %s17814_s1 }
  0x4b   : > { %p14481_p9 = scmp.lt.s32.totalorder %s14479_s30, %s14474_s11 }
  0x4c   : > { %p14477_p4 = pnand %p14475_p1, %p14448_p7 }
  0x4d   : > { %p14482_p12 = por %p14481_p9, %p14480_p3 }
  0x4e   : > { %p14478_p6 = pneg %p14477_p4 }
  0x50   : > { %p14483_p13 = pnand %p14482_p12, %p14478_p6 }
  0x52   : > { %14486 = shalt.err (!%p14483_p13)
}
  0x53   : > { %s14487_s13 = scalar_lea.vmem %s14755_s14, 2048  ;;  %s14580_s24 = smov [#allocation5]  }
  0x54   : > { %p14488_p0 = scmp.ne.s32.totalorder %s14755_s14, %s14487_s13  ;;  %s14492_s26 = sshll.u32 %s14580_s24, 4  ;;  %s14493_s26 = int_to_ptr.vmem [resolvable:$false] %s14492_s26 }
  0x55   : > { %s14494_s8 = scalar_lea.vmem %s14493_s26, 4096  ;;  %p14495_p10 = scmp.lt.s32.totalorder %s14755_s14, %s14493_s26 }
  0x56   : > { %p14490_p5 = pnand %p14488_p0, %p14448_p7  ;;  %p14496_p1 = scmp.lt.s32.totalorder %s14494_s8, %s14487_s13 }
  0x58   : > { %p14491_p2 = pneg %p14490_p5  ;;  %p14497_p4 = por %p14496_p1, %p14495_p10 }
  0x5a   : > { %p14498_p3 = pnand %p14497_p4, %p14491_p2 }
  0x5c   : > { %14501 = shalt.err (!%p14498_p3)
}
  0x5d   : > { %14010 = dma.hbm_to_vmem [thread:$0]  (!%p14712_p11), %s14721_s7, 2048, %s14755_s14, %s201_s25, %s17918_s5, %s17918_s5, %s17917_s3  }
  0x5e   : > { %231 = sbr.rel (%p14660_p8) target bundleno = 3173 (0xc65), region = 36 }
  0x63   : > { %s14785_s0 = sand.u32 1, %s14566_s16   ;;  %p17919_p7 = scmp.ne.s32.totalorder %s17907_s21, 0 }
  0x64   : > { %s14788_s9 = sshll.u32 %s14785_s0, 7  ;;  %s234_s6 = scalar_lea.sflag [#allocation3], %s14785_s0 }
  0x65   : > { %s14792_s28 = scalar_lea.vmem [#allocation2], %s14788_s9 }
  0x66   : > { %14545 = dma.done.wait (%p17919_p7), %s234_s6, 2048  }
  0x67   : > { %14547 = vsyncadd (%p17919_p7), %s234_s6, 4294965248  ;;  %s242_s23 = sand.u32 1, %s14641_s19   ;;  %s14800_s3 = scalar_lea.vmem [#allocation5], %s14788_s9 }
  0x68   : > { %s243_s7 = scalar_lea.sflag [#allocation6], %s242_s23 }
  0x69   : > { %14549 = dma.done.wait (%p17919_p7), %s243_s7, 2048  }
  0x6a   : > { %14551 = vsyncadd (%p17919_p7), %s243_s7, 4294965248  ;;  %p17920_p8 = scmp.eq.s32.totalorder %s14641_s19, 0 }
  0x6c   : > { %14553 = dma.done.wait (%p17920_p8), [#allocation6], 3712   ;;  %p17921_p11 = pmov %p17920_p8 }
  0x6d   : > { %v351_v0 = vld [vmem:[#allocation7 + $0x58] sm:$0xff]  ;;  %v350_v1 = vld [vmem:[#allocation7 + $0x50] sm:$0xff]  ;;  %v349_v2 = vld [vmem:[#allocation7 + $0x48] sm:$0xff]  ;;  %vm373_vm0 = vcmask 785408   ;;  %vm865_vm1 = vcmask 261120   ;;  %vm587_vm2 = vcmask 523264  }
  0x6e   : > { %14555 = vsyncadd (%p17921_p11), [#allocation6], 4294963584  ;;  %13198 = vmatprep.subr.mxu0 %v351_v0  ;;  %v348_v3 = vld [vmem:[#allocation7 + $0x40] sm:$0xff]  ;;  %v347_v5 = vld [vmem:[#allocation7 + $0x38] sm:$0xff]  ;;  %s14581_s21 = smov 32   ;;  %s14582_s5 = smov 96  }
  0x6f   : > { %13199 = vmatpush3.msra.mxu0 %v351_v0  ;;  %v308_v4 = vld [vmem:[%s14800_s3] sm:$0xff]  ;;  %v346_v6 = vld [vmem:[#allocation7 + $0x30] sm:$0xff]  ;;  %v359_v7 = vld [vmem:[#allocation7 + $0x98] sm:$0xff]  ;;  %s14585_s14 = smov 88   ;;  %s14586_s20 = smov 120  }
  0x70   : > { %13200 = vmatprep.subr.mxu0 %v350_v1  ;;  %13222 = vmatprep.mubr.msk.f32.mxu0 %vm373_vm0, %v308_v4  ;;  %v358_v8 = vld [vmem:[#allocation7 + $0x90] sm:$0xff]  ;;  %v345_v9 = vld [vmem:[#allocation7 + $0x28] sm:$0xff]  ;;  %v344_v11 = vld [vmem:[#allocation7 + $0x20] sm:$0xff]  ;;  %v369_v4 = vlaneseq  ;;  %s12569_s25 = sshll.u32 %s14641_s19, 4  ;;  %s14587_s30 = smov 80  }
  0x71   : > { %13201 = vmatpush3.msra.mxu0 %v350_v1  ;;  %13246 = vmatprep.subr.mxu1 %v359_v7  ;;  %v357_v10 = vld [vmem:[#allocation7 + $0x88] sm:$0xff]  ;;  %v356_v12 = vld [vmem:[#allocation7 + $0x80] sm:$0xff]  ;;  %v343_v13 = vld [vmem:[#allocation7 + $0x18] sm:$0xff]  ;;  %p287_p6 = scmp.lt.s32.totalorder %s12569_s25, 31  ;;  %s14588_s13 = smov 112  }
  0x72   : > { %13202 = vmatprep.subr.mxu0 %v349_v2  ;;  %13247 = vmatpush3.msra.mxu1 %v359_v7  ;;  %v342_v14 = vld [vmem:[#allocation7 + $0x10] sm:$0xff]  ;;  %v341_v15 = vld [vmem:[#allocation7 + $0x8] sm:$0xff]  ;;  %v340_v16 = vld [vmem:[#allocation7] sm:$0xff]  ;;  %s14589_s24 = smov 64   ;;  %s14590_s26 = smov 72  }
  0x73   : > { %13203 = vmatpush3.msra.mxu0 %v349_v2  ;;  %13248 = vmatprep.subr.mxu1 %v358_v8  ;;  %v309_v17 = vld [vmem:[%s14800_s3 + $0x8] sm:$0xff]  ;;  %v310_v18 = vld [vmem:[%s14800_s3 + $0x10] sm:$0xff]  ;;  %v311_v19 = vld [vmem:[%s14800_s3 + $0x18] sm:$0xff]  ;;  %s18175_s25 = smov (!%p287_p6, %s12569_s25), 31  ;;  %s14591_s8 = smov 104  }
  0x74   : > { %13204 = vmatprep.subr.mxu0 %v348_v3  ;;  %13249 = vmatpush3.msra.mxu1 %v358_v8  ;;  %v312_v20 = vld [vmem:[%s14800_s3 + $0x20] sm:$0xff]  ;;  %v313_v21 = vld [vmem:[%s14800_s3 + $0x28] sm:$0xff]  ;;  %v314_v22 = vld [vmem:[%s14800_s3 + $0x30] sm:$0xff]  ;;  %s15634_s29 = scalar_lea.vmem %s17815_s2, %s18175_s25  ;;  %s17661_s6 = scalar_lea.vmem [#allocation8], %s14788_s9 }
  0x75   : > { %13205 = vmatpush3.msra.mxu0 %v348_v3  ;;  %13250 = vmatprep.subr.mxu1 %v357_v10  ;;  %v315_v23 = vld [vmem:[%s14800_s3 + $0x38] sm:$0xff]  ;;  %v316_v24 = vld [vmem:[%s14800_s3 + $0x40] sm:$0xff]  ;;  %v317_v25 = vld [vmem:[%s14800_s3 + $0x48] sm:$0xff]  ;;  %s12849_s9 = sshll.u32 %s14641_s19, 11  ;;  %s12440_s23 = sshll.u32 %s17661_s6, 4  ;;  %s17765_s23 = int_to_ptr.vmem [resolvable:$true] %s12440_s23 }
  0x76   : > { %13206 = vmatprep.subr.mxu0 %v347_v5  ;;  %13251 = vmatpush3.msra.mxu1 %v357_v10  ;;  %v318_v26 = vld [vmem:[%s14800_s3 + $0x50] sm:$0xff]  ;;  %v319_v27 = vld [vmem:[%s14800_s3 + $0x58] sm:$0xff]  ;;  %v320_v28 = vld [vmem:[%s14800_s3 + $0x60] sm:$0xff]  ;;  %s12427_s19 = scalar_lea.sflag [#allocation4], %s14785_s0  ;;  %p18166_p12 = scmp.ne.s32.totalorder %s17914_s10, 0 }
  0x77   : > { %13207 = vmatpush3.msra.mxu0 %v347_v5  ;;  %13252 = vmatprep.subr.mxu1 %v356_v12  ;;  %v321_v29 = vld [vmem:[%s14800_s3 + $0x68] sm:$0xff]  ;;  %v322_v30 = vld [vmem:[%s14800_s3 + $0x70] sm:$0xff]  ;;  %v323_v31 = vld [vmem:[%s14800_s3 + $0x78] sm:$0xff]  ;;  %v14922_v5 = vshrl.u32 %v369_v4, 7 }
  0x78   : > { %13208 = vmatprep.subr.mxu0 %v346_v6  ;;  %13253 = vmatpush3.msra.mxu1 %v356_v12  ;;  %v355_v32 = vld [vmem:[#allocation7 + $0x78] sm:$0xff]  ;;  %v14843_v33 = vld [vmem:[%s14792_s28] sm:$0xff]  ;;  %v354_v35 = vld [vmem:[#allocation7 + $0x70] sm:$0xff] }
  0x79   : > { %13209 = vmatpush3.msra.mxu0 %v346_v6  ;;  %13254 = vmatprep.subr.mxu1 %v355_v32  ;;  %v866_v34 = vsel %vm865_vm1, %v14843_v33, 0.0  ;;  %v353_v36 = vld [vmem:[#allocation7 + $0x68] sm:$0xff]  ;;  %v14848_v37 = vld [vmem:[%s14792_s28 + $0x10] sm:$0xff]  ;;  %v352_v41 = vld [vmem:[#allocation7 + $0x60] sm:$0xff]  ;;  %v371_v6 = vsub.s32 2, %v14922_v5 }
  0x7a   : > { %13210 = vmatprep.subr.mxu0 %v345_v9  ;;  %13255 = vmatpush3.msra.mxu1 %v355_v32  ;;  %v14851_v38 = vld [vmem:[%s14792_s28 + $0x8] sm:$0xff]  ;;  %v872_v39 = vsel %vm865_vm1, %v14848_v37, 0.0  ;;  %v14858_v42 = vld [vmem:[%s14792_s28 + $0x18] sm:$0xff]  ;;  %v14866_v45 = vld [vmem:[%s14792_s28 + $0x20] sm:$0xff] }
  0x7b   : > { %13211 = vmatpush3.msra.mxu0 %v345_v9  ;;  %867 = vadd.xlane.f32.xlu0 %v866_v34  ;;  %v869_v40 = vsel %vm865_vm1, %v14851_v38, 0.0  ;;  %v875_v43 = vsel %vm865_vm1, %v14858_v42, 0.0  ;;  %v14863_v44 = vld [vmem:[%s14792_s28 + $0x28] sm:$0xff]  ;;  %v878_v46 = vsel %vm865_vm1, %v14866_v45, 0.0  ;;  %v14871_v47 = vld [vmem:[%s14792_s28 + $0x30] sm:$0xff]  ;;  %v14876_v49 = vld [vmem:[%s14792_s28 + $0x38] sm:$0xff] }
  0x7c   : > { %13212 = vmatprep.subr.mxu0 %v344_v11  ;;  %13256 = vmatprep.subr.mxu1 %v354_v35  ;;  %v881_v48 = vsel %vm865_vm1, %v14863_v44, 0.0  ;;  %v884_v50 = vsel %vm865_vm1, %v14871_v47, 0.0  ;;  %v14881_v51 = vld [vmem:[%s14792_s28 + $0x40] sm:$0xff]  ;;  %v887_v52 = vsel %vm865_vm1, %v14876_v49, 0.0  ;;  %v14886_v53 = vld [vmem:[%s14792_s28 + $0x48] sm:$0xff]  ;;  %v14891_v55 = vld [vmem:[%s14792_s28 + $0x50] sm:$0xff] }
  0x7d   : > { %13213 = vmatpush3.msra.mxu0 %v344_v11  ;;  %13257 = vmatpush3.msra.mxu1 %v354_v35  ;;  %v890_v54 = vsel %vm865_vm1, %v14881_v51, 0.0  ;;  %v893_v56 = vsel %vm865_vm1, %v14886_v53, 0.0  ;;  %v14896_v57 = vld [vmem:[%s14792_s28 + $0x58] sm:$0xff]  ;;  %v896_v58 = vsel %vm865_vm1, %v14891_v55, 0.0  ;;  %v14901_v59 = vld [vmem:[%s14792_s28 + $0x60] sm:$0xff]  ;;  %v14908_v62 = vld [vmem:[%s14792_s28 + $0x68] sm:$0xff] }
  0x7e   : > { %13214 = vmatprep.subr.mxu0 %v343_v13  ;;  %13258 = vmatprep.subr.mxu1 %v353_v36  ;;  %v899_v60 = vsel %vm865_vm1, %v14896_v57, 0.0  ;;  %v902_v61 = vsel %vm865_vm1, %v14901_v59, 0.0  ;;  %v905_v63 = vsel %vm865_vm1, %v14908_v62, 0.0  ;;  %v14913_v0 = vld [vmem:[%s14792_s28 + $0x70] sm:$0xff]  ;;  %v14916_v1 = vld [vmem:[%s14792_s28 + $0x78] sm:$0xff]  ;;  %v14925_v7 = vld [vmem:[#allocation7 + $0xe0] sm:$0xff] }
  0x7f   : > { %13215 = vmatpush3.msra.mxu0 %v343_v13  ;;  %13259 = vmatpush3.msra.mxu1 %v353_v36  ;;  %v908_v2 = vsel %vm865_vm1, %v14913_v0, 0.0  ;;  %v911_v3 = vsel %vm865_vm1, %v14916_v1, 0.0  ;;  %v14928_v8 = vrot.slane %v14925_v7, %v371_v6 }
  0x80   : > { %13216 = vmatprep.subr.mxu0 %v342_v14  ;;  %873 = vadd.xlane.f32.xlu1 %v872_v39 }
  0x81   : > { %13217 = vmatpush3.msra.mxu0 %v342_v14  ;;  %870 = vadd.xlane.f32.xlu0 %v869_v40 }
  0x82   : > { %13218 = vmatprep.subr.mxu0 %v341_v15  ;;  %13260 = vmatprep.subr.mxu1 %v352_v41 }
  0x83   : > { %13219 = vmatpush3.msra.mxu0 %v341_v15  ;;  %13261 = vmatpush3.msra.mxu1 %v352_v41 }
  0x84   : > { %13220 = vmatprep.subr.mxu0 %v340_v16  ;;  %876 = vadd.xlane.f32.xlu1 %v875_v43 }
  0x85   : > { %13221 = vmatpush3.msra.mxu0 %v340_v16  ;;  %879 = vadd.xlane.f32.xlu0 %v878_v46 }
  0x86   : > { %13223 = vmatmul.mubr.msk.f32.vlgmr.msra.gmra.mxu0 %vm373_vm0, %v309_v17 }
  0x87   : > { %13225 = vmatprep.mubr.msk.f32.mxu0 %vm373_vm0, %v310_v18 }
  0x88   : > { %882 = vadd.xlane.f32.xlu1 %v881_v48 }
  0x89   : > { %885 = vadd.xlane.f32.xlu0 %v884_v50 }
  0x8a   : > { %13226 = vmatmul.mubr.msk.f32.gmra.mxu0 %vm373_vm0, %v311_v19 }
  0x8b   : > { %13228 = vmatprep.mubr.msk.f32.mxu0 %vm373_vm0, %v312_v20 }
  0x8c   : > { %888 = vadd.xlane.f32.xlu1 %v887_v52 }
  0x8d   : > { %891 = vadd.xlane.f32.xlu0 %v890_v54 }
  0x8e   : > { %13229 = vmatmul.mubr.msk.f32.gmra.mxu0 %vm373_vm0, %v313_v21 }
  0x8f   : > { %13231 = vmatprep.mubr.msk.f32.mxu0 %vm373_vm0, %v314_v22 }
  0x90   : > { %894 = vadd.xlane.f32.xlu1 %v893_v56 }
  0x91   : > { %897 = vadd.xlane.f32.xlu0 %v896_v58 }
  0x92   : > { %13232 = vmatmul.mubr.msk.f32.gmra.mxu0 %vm373_vm0, %v315_v23 }
  0x93   : > { %13234 = vmatprep.mubr.msk.f32.mxu0 %vm373_vm0, %v316_v24 }
  0x94   : > { %900 = vadd.xlane.f32.xlu1 %v899_v60 }
  0x95   : > { %903 = vadd.xlane.f32.xlu0 %v902_v61 }
  0x96   : > { %13235 = vmatmul.mubr.msk.f32.gmra.mxu0 %vm373_vm0, %v317_v25 }
  0x97   : > { %13237 = vmatprep.mubr.msk.f32.mxu0 %vm373_vm0, %v318_v26 }
  0x98   : > { %906 = vadd.xlane.f32.xlu1 %v905_v63 }
  0x99   : > { %909 = vadd.xlane.f32.xlu0 %v908_v2 }
  0x9a   : > { %13238 = vmatmul.mubr.msk.f32.gmra.mxu0 %vm373_vm0, %v319_v27 }
  0x9b   : > { %13240 = vmatprep.mubr.msk.f32.mxu0 %vm373_vm0, %v320_v28 }
  0x9c   : > { %912 = vadd.xlane.f32.xlu1 %v911_v3 }
  0x9e   : > { %13241 = vmatmul.mubr.msk.f32.gmra.mxu0 %vm373_vm0, %v321_v29 }
  0x9f   : > { %13243 = vmatprep.mubr.msk.f32.mxu0 %vm373_vm0, %v322_v30 }
  0xa2   : > { %13244 = vmatmul.mubr.msk.f32.gmra.mxu0 %vm373_vm0, %v323_v31 }
 0x104   : > { %v868_v24 = vpop.xlane.xlu0 %867 }
 0x105   : > { %v915_v26 = vmul.f32 0.03125, %v868_v24 }
 0x107   : > { %v14942_v31 = vsub.f32 %v14843_v33, %v915_v26 }
 0x109   : > { %v874_v34 = vpop.xlane.xlu1 %873  ;;  %v947_v40 = vmul.f32 %v14942_v31, %v14942_v31 }
 0x10a   : > { %v917_v36 = vmul.f32 0.03125, %v874_v34  ;;  %v871_v39 = vpop.xlane.xlu0 %870 }
 0x10b   : > { %v916_v46 = vmul.f32 0.03125, %v871_v39  ;;  %v963_v52 = vsel %vm865_vm1, %v947_v40, 0.0 }
 0x10c   : > { %v14951_v50 = vsub.f32 %v14848_v37, %v917_v36  ;;  %964 = vadd.xlane.f32.xlu0 %v963_v52 }
 0x10d   : > { %v14955_v56 = vsub.f32 %v14851_v38, %v916_v46  ;;  %v877_v58 = vpop.xlane.xlu1 %876 }
 0x10e   : > { %v918_v61 = vmul.f32 0.03125, %v877_v58  ;;  %v949_v63 = vmul.f32 %v14951_v50, %v14951_v50  ;;  %v880_v2 = vpop.xlane.xlu0 %879 }
 0x10f   : > { %v948_v4 = vmul.f32 %v14955_v56, %v14955_v56  ;;  %v919_v38 = vmul.f32 0.03125, %v880_v2 }
 0x146   : > { %v13224_v9 = vpop.f32.mrf.mxu0 }
 0x147   : > { %v494_v10 = vadd.f32 %v13224_v9, %v14928_v8 }
 0x148   : > { %v488_v11 = vpop.f32.mrf.mxu0 }
 0x149   : > { %v489_v12 = vadd.f32 %v488_v11, %v14928_v8  ;;  %v568_v16 = vmax.f32 %v494_v10, 0.0  ;;  %v14966_v10 = vsub.f32 %v14858_v42, %v918_v61  ;;  %v969_v11 = vsel %vm865_vm1, %v949_v63, 0.0 }
 0x14a   : > { %v13227_v13 = vpop.f32.mrf.mxu0  ;;  %970 = vadd.xlane.f32.xlu0 %v969_v11 }
 0x14b   : > { %v567_v14 = vmax.f32 %v489_v12, 0.0  ;;  %v504_v15 = vadd.f32 %v13227_v13, %v14928_v8  ;;  %v883_v13 = vpop.xlane.xlu1 %882  ;;  %v950_v42 = vmul.f32 %v14966_v10, %v14966_v10 }
 0x14c   : > { %v498_v17 = vpop.f32.mrf.mxu0 }
 0x14d   : > { %13262 = vmatprep.mubr.msk.f32.mxu1 %vm587_vm2, %v567_v14  ;;  %v499_v18 = vadd.f32 %v498_v17, %v14928_v8  ;;  %v570_v19 = vmax.f32 %v504_v15, 0.0  ;;  %v966_v14 = vsel %vm865_vm1, %v948_v4, 0.0  ;;  %v14971_v15 = vsub.f32 %v14866_v45, %v919_v38 }
 0x14e   : > { %13263 = vmatmul.mubr.msk.f32.vlgmr.msra.gmra.mxu1 %vm587_vm2, %v568_v16  ;;  %v13230_v20 = vpop.f32.mrf.mxu0  ;;  %v920_v17 = vmul.f32 0.03125, %v883_v13  ;;  %967 = vadd.xlane.f32.xlu1 %v966_v14 }
 0x14f   : > { %v569_v21 = vmax.f32 %v499_v18, 0.0  ;;  %v514_v22 = vadd.f32 %v13230_v20, %v14928_v8  ;;  %v886_v18 = vpop.xlane.xlu0 %885 }
 0x150   : > { %v508_v23 = vpop.f32.mrf.mxu0  ;;  %v14982_v24 = vsub.f32 %v14863_v44, %v920_v17 }
 0x151   : > { %v509_v25 = vadd.f32 %v508_v23, %v14928_v8  ;;  %13265 = vmatprep.mubr.msk.f32.mxu1 %vm587_vm2, %v569_v21  ;;  %v572_v27 = vmax.f32 %v514_v22, 0.0  ;;  %v921_v21 = vmul.f32 0.03125, %v886_v18  ;;  %v951_v22 = vmul.f32 %v14971_v15, %v14971_v15 }
 0x152   : > { %v13233_v28 = vpop.f32.mrf.mxu0  ;;  %13266 = vmatmul.mubr.msk.f32.gmra.mxu1 %vm587_vm2, %v570_v19  ;;  %v952_v34 = vmul.f32 %v14982_v24, %v14982_v24 }
 0x153   : > { %v571_v29 = vmax.f32 %v509_v25, 0.0  ;;  %v524_v30 = vadd.f32 %v13233_v28, %v14928_v8  ;;  %v972_v25 = vsel %vm865_vm1, %v950_v42, 0.0  ;;  %v14986_v28 = vsub.f32 %v14871_v47, %v921_v21  ;;  %v892_v44 = vpop.xlane.xlu0 %891 }
 0x154   : > { %v518_v32 = vpop.f32.mrf.mxu0  ;;  %973 = vadd.xlane.f32.xlu1 %v972_v25  ;;  %v923_v39 = vmul.f32 0.03125, %v892_v44  ;;  %v978_v46 = vsel %vm865_vm1, %v952_v34, 0.0 }
 0x155   : > { %v519_v35 = vadd.f32 %v518_v32, %v14928_v8  ;;  %13268 = vmatprep.mubr.msk.f32.mxu1 %vm587_vm2, %v571_v29  ;;  %v574_v41 = vmax.f32 %v524_v30, 0.0  ;;  %v975_v29 = vsel %vm865_vm1, %v951_v22, 0.0  ;;  %v953_v47 = vmul.f32 %v14986_v28, %v14986_v28 }
 0x156   : > { %v13236_v43 = vpop.f32.mrf.mxu0  ;;  %13269 = vmatmul.mubr.msk.f32.gmra.mxu1 %vm587_vm2, %v572_v27  ;;  %v889_v27 = vpop.xlane.xlu1 %888  ;;  %976 = vadd.xlane.f32.xlu0 %v975_v29  ;;  %v15002_v52 = vsub.f32 %v14881_v51, %v923_v39 }
 0x157   : > { %v573_v48 = vmax.f32 %v519_v35, 0.0  ;;  %v534_v33 = vadd.f32 %v13236_v43, %v14928_v8  ;;  %v922_v32 = vmul.f32 0.03125, %v889_v27 }
 0x158   : > { %v528_v54 = vpop.f32.mrf.mxu0  ;;  %979 = vadd.xlane.f32.xlu1 %v978_v46  ;;  %v955_v51 = vmul.f32 %v15002_v52, %v15002_v52 }
 0x159   : > { %v529_v60 = vadd.f32 %v528_v54, %v14928_v8  ;;  %13271 = vmatprep.mubr.msk.f32.mxu1 %vm587_vm2, %v573_v48  ;;  %v576_v3 = vmax.f32 %v534_v33, 0.0  ;;  %v14998_v43 = vsub.f32 %v14876_v49, %v922_v32  ;;  %v981_v54 = vsel %vm865_vm1, %v953_v47, 0.0  ;;  %v898_v49 = vpop.xlane.xlu0 %897 }
 0x15a   : > { %v13239_v37 = vpop.f32.mrf.mxu0  ;;  %13272 = vmatmul.mubr.msk.f32.gmra.mxu1 %vm587_vm2, %v574_v41  ;;  %v895_v33 = vpop.xlane.xlu1 %894  ;;  %982 = vadd.xlane.f32.xlu0 %v981_v54  ;;  %v925_v2 = vmul.f32 0.03125, %v898_v49 }
 0x15b   : > { %v575_v6 = vmax.f32 %v529_v60, 0.0  ;;  %v544_v9 = vadd.f32 %v13239_v37, %v14928_v8  ;;  %v924_v60 = vmul.f32 0.03125, %v895_v33  ;;  %v954_v61 = vmul.f32 %v14998_v43, %v14998_v43 }
 0x15c   : > { %v538_v12 = vpop.f32.mrf.mxu0  ;;  %v15017_v38 = vsub.f32 %v14891_v55, %v925_v2 }
 0x15d   : > { %v539_v16 = vadd.f32 %v538_v12, %v14928_v8  ;;  %13274 = vmatprep.mubr.msk.f32.mxu1 %vm587_vm2, %v575_v6  ;;  %v578_v19 = vmax.f32 %v544_v9, 0.0  ;;  %v15013_v37 = vsub.f32 %v14886_v53, %v924_v60  ;;  %v987_v6 = vsel %vm865_vm1, %v955_v51, 0.0  ;;  %v904_v12 = vpop.xlane.xlu0 %903 }
 0x15e   : > { %v13242_v20 = vpop.f32.mrf.mxu0  ;;  %13275 = vmatmul.mubr.msk.f32.gmra.mxu1 %vm587_vm2, %v576_v3  ;;  %v901_v4 = vpop.xlane.xlu1 %900  ;;  %988 = vadd.xlane.f32.xlu0 %v987_v6  ;;  %v927_v53 = vmul.f32 0.03125, %v904_v12  ;;  %v957_v13 = vmul.f32 %v15017_v38, %v15017_v38 }
 0x15f   : > { %v577_v45 = vmax.f32 %v539_v16, 0.0  ;;  %v554_v23 = vadd.f32 %v13242_v20, %v14928_v8  ;;  %v926_v9 = vmul.f32 0.03125, %v901_v4  ;;  %v956_v11 = vmul.f32 %v15013_v37, %v15013_v37 }
 0x160   : > { %v548_v26 = vpop.f32.mrf.mxu0  ;;  %v15031_v16 = vsub.f32 %v14901_v59, %v927_v53  ;;  %v993_v42 = vsel %vm865_vm1, %v957_v13, 0.0 }
 0x161   : > { %v549_v30 = vadd.f32 %v548_v26, %v14928_v8  ;;  %13277 = vmatprep.mubr.msk.f32.mxu1 %vm587_vm2, %v577_v45  ;;  %v580_v35 = vmax.f32 %v554_v23, 0.0  ;;  %v15027_v55 = vsub.f32 %v14896_v57, %v926_v9  ;;  %v990_v14 = vsel %vm865_vm1, %v956_v11, 0.0 }
 0x162   : > { %v13245_v36 = vpop.f32.mrf.mxu0  ;;  %13278 = vmatmul.mubr.msk.f32.gmra.mxu1 %vm587_vm2, %v578_v19  ;;  %v907_v17 = vpop.xlane.xlu1 %906  ;;  %994 = vadd.xlane.f32.xlu0 %v993_v42  ;;  %v959_v20 = vmul.f32 %v15031_v16, %v15031_v16  ;;  %v585_v23 = vsub.s32 3, %v14922_v5 }
 0x163   : > { %v579_v40 = vmax.f32 %v549_v30, 0.0  ;;  %v564_v41 = vadd.f32 %v13245_v36, %v14928_v8  ;;  %v928_v18 = vmul.f32 0.03125, %v907_v17  ;;  %v958_v19 = vmul.f32 %v15027_v55, %v15027_v55  ;;  %v910_v30 = vpop.xlane.xlu0 %909 }
 0x164   : > { %v558_v48 = vpop.f32.mrf.mxu0  ;;  %v999_v59 = vsel %vm865_vm1, %v959_v20, 0.0  ;;  %v586_v25 = vrot.slane %v14925_v7, %v585_v23  ;;  %v929_v34 = vmul.f32 0.03125, %v910_v30 }
 0x165   : > { %v559_v58 = vadd.f32 %v558_v48, %v14928_v8  ;;  %13280 = vmatprep.mubr.msk.f32.mxu1 %vm587_vm2, %v579_v40  ;;  %v582_v63 = vmax.f32 %v564_v41, 0.0  ;;  %v984_v8 = vsel %vm865_vm1, %v954_v61, 0.0  ;;  %v15039_v57 = vsub.f32 %v14908_v62, %v928_v18 }
 0x166   : > { %13281 = vmatmul.mubr.msk.f32.gmra.mxu1 %vm587_vm2, %v580_v35  ;;  %985 = vadd.xlane.f32.xlu1 %v984_v8  ;;  %v996_v21 = vsel %vm865_vm1, %v958_v19, 0.0  ;;  %v913_v44 = vpop.xlane.xlu1 %912  ;;  %v15051_v39 = vsub.f32 %v14913_v0, %v929_v34 }
 0x167   : > { %v581_v3 = vmax.f32 %v559_v58, 0.0  ;;  %v960_v22 = vmul.f32 %v15039_v57, %v15039_v57  ;;  %1000 = vadd.xlane.f32.xlu0 %v999_v59  ;;  %v930_v36 = vmul.f32 0.03125, %v913_v44 }
 0x168   : > { %v961_v41 = vmul.f32 %v15051_v39, %v15051_v39 }
 0x169   : > { %13283 = vmatprep.mubr.msk.f32.mxu1 %vm587_vm2, %v581_v3  ;;  %v1002_v45 = vsel %vm865_vm1, %v960_v22, 0.0  ;;  %v15054_v40 = vsub.f32 %v14916_v1, %v930_v36 }
 0x16a   : > { %13284 = vmatmul.mubr.msk.f32.gmra.mxu1 %vm587_vm2, %v582_v63  ;;  %991 = vadd.xlane.f32.xlu1 %v990_v14  ;;  %v1005_v33 = vsel %vm865_vm1, %v961_v41, 0.0 }
 0x16b   : > { %1003 = vadd.xlane.f32.xlu0 %v1002_v45  ;;  %v962_v48 = vmul.f32 %v15054_v40, %v15054_v40 }
 0x16d   : > { %v1008_v58 = vsel %vm865_vm1, %v962_v48, 0.0 }
 0x16e   : > { %997 = vadd.xlane.f32.xlu1 %v996_v21 }
 0x195   : > { %v965_v18 = vpop.xlane.xlu0 %964 }
 0x1d3   : > { %v15074_v21 = vpop.xlane.xlu0 %970 }
 0x1d7   : > { %v968_v22 = vpop.xlane.xlu1 %967 }
 0x1d8   : > { %v1012_v34 = vmul.f32 0.032258064, %v968_v22 }
 0x1da   : > { %14067 = vrsqrt.f32 %v1012_v34  ;;  %vm1036_vm3 = vcmp.eq.f32.partialorder %v1012_v34, inf  ;;  %vm1038_vm4 = vcmp.eq.f32.partialorder %v1012_v34, 0.0 }
 0x1dd   : > { %v15086_v23 = vpop.xlane.xlu1 %973 }
 0x1df   : > { %v15079_v45 = vpop.xlane.xlu0 %976 }
 0x20e   : > { %v13264_v26 = vpop.f32.mrf.mxu1 }
 0x20f   : > { %v708_v27 = vadd.f32 %v13264_v26, %v586_v25  ;;  %v15088_v26 = vpop.xlane.xlu0 %982 }
 0x210   : > { %v702_v62 = vpop.f32.mrf.mxu1 }
 0x211   : > { %v703_v29 = vadd.f32 %v702_v62, %v586_v25  ;;  %803 = vrot.lane.b32.xlu1 %v708_v27, %s14581_s21 }
 0x212   : > { %v13267_v32 = vpop.f32.mrf.mxu1 }
 0x213   : > { %801 = vrot.lane.b32.xlu0 %v703_v29, %s14581_s21  ;;  %v718_v1 = vadd.f32 %v13267_v32, %v586_v25 }
 0x214   : > { %v712_v35 = vpop.f32.mrf.mxu1 }
 0x215   : > { %v713_v51 = vadd.f32 %v712_v35, %v586_v25 }
 0x216   : > { %v13270_v47 = vpop.f32.mrf.mxu1 }
 0x217   : > { %v728_v4 = vadd.f32 %v13270_v47, %v586_v25 }
 0x218   : > { %v722_v46 = vpop.f32.mrf.mxu1 }
 0x219   : > { %v723_v63 = vadd.f32 %v722_v46, %v586_v25 }
 0x21a   : > { %v13273_v54 = vpop.f32.mrf.mxu1 }
 0x21b   : > { %v738_v11 = vadd.f32 %v13273_v54, %v586_v25 }
 0x21c   : > { %v732_v0 = vpop.f32.mrf.mxu1 }
 0x21d   : > { %v733_v3 = vadd.f32 %v732_v0, %v586_v25 }
 0x21e   : > { %v13276_v60 = vpop.f32.mrf.mxu1 }
 0x21f   : > { %v748_v13 = vadd.f32 %v13276_v60, %v586_v25 }
 0x220   : > { %v742_v61 = vpop.f32.mrf.mxu1 }
 0x221   : > { %v743_v6 = vadd.f32 %v742_v61, %v586_v25  ;;  %v14068_v61 = vpop.eup %14067 }
 0x222   : > { %v13279_v49 = vpop.f32.mrf.mxu1 }
 0x223   : > { %v758_v42 = vadd.f32 %v13279_v49, %v586_v25  ;;  %v1035_v49 = vmul.f32 %v14068_v61, %v1012_v34 }
 0x224   : > { %v752_v2 = vpop.f32.mrf.mxu1 }
 0x225   : > { %v753_v12 = vadd.f32 %v752_v2, %v586_v25 }
 0x226   : > { %v13282_v8 = vpop.f32.mrf.mxu1 }
 0x227   : > { %v768_v20 = vadd.f32 %v13282_v8, %v586_v25  ;;  %v1037_v8 = vsel %vm1036_vm3, %v1012_v34, %v1035_v49 }
 0x228   : > { %v762_v9 = vpop.f32.mrf.mxu1 }
 0x229   : > { %v763_v14 = vadd.f32 %v762_v9, %v586_v25 }
 0x22a   : > { %v13285_v53 = vpop.f32.mrf.mxu1 }
 0x22b   : > { %v778_v59 = vadd.f32 %v13285_v53, %v586_v25 }
 0x22c   : > { %v772_v17 = vpop.f32.mrf.mxu1 }
 0x22d   : > { %v773_v19 = vadd.f32 %v772_v17, %v586_v25  ;;  %v15098_v25 = vpop.xlane.xlu0 %988 }
 0x232   : > { %1006 = vadd.xlane.f32.xlu0 %v1005_v33 }
 0x235   : > { %1009 = vadd.xlane.f32.xlu1 %v1008_v58 }
 0x246   : > { %807 = vrot.lane.b32.xlu1 %v718_v1, %s14581_s21 }
 0x248   : > { %809 = vrot.lane.b32.xlu0 %v723_v63, %s14581_s21 }
 0x24a   : > { %805 = vrot.lane.b32.xlu1 %v713_v51, %s14581_s21  ;;  %v1039_v51 = vand.u32 2147483648, %v1012_v34 }
 0x24c   : > { %813 = vrot.lane.b32.xlu0 %v733_v3, %s14581_s21 }
 0x24e   : > { %811 = vrot.lane.b32.xlu1 %v728_v4, %s14581_s21 }
 0x250   : > { %817 = vrot.lane.b32.xlu0 %v743_v6, %s14581_s21 }
 0x252   : > { %815 = vrot.lane.b32.xlu1 %v738_v11, %s14581_s21  ;;  %v1040_v11 = vsel %vm1038_vm4, %v1039_v51, %v1037_v8  ;;  %v1013_v51 = vmul.f32 0.032258064, %v15074_v21 }
 0x254   : > { %821 = vrot.lane.b32.xlu0 %v753_v12, %s14581_s21  ;;  %vm1043_vm9 = vcmp.eq.f32.partialorder %v1013_v51, inf  ;;  %vm1045_vm10 = vcmp.eq.f32.partialorder %v1013_v51, 0.0 }
 0x256   : > { %819 = vrot.lane.b32.xlu1 %v748_v13, %s14581_s21  ;;  %v1140_v13 = vadd.f32 1e-06, %v1040_v11 }
 0x258   : > { %825 = vrot.lane.b32.xlu0 %v763_v14, %s14581_s21 }
 0x25a   : > { %823 = vrot.lane.b32.xlu1 %v758_v42, %s14581_s21 }
 0x25c   : > { %829 = vrot.lane.b32.xlu0 %v773_v19, %s14581_s21  ;;  %v363_v19 = vld [vmem:[#allocation7 + $0xb8] sm:$0xff] }
 0x25d   : > { %13286 = vmatprep.subr.mxu1 %v363_v19 }
 0x25e   : > { %827 = vrot.lane.b32.xlu1 %v768_v20, %s14581_s21  ;;  %v367_v20 = vld [vmem:[#allocation7 + $0xd8] sm:$0xff]  ;;  %13287 = vmatpush3.msra.mxu1 %v363_v19 }
 0x25f   : > { %13318 = vmatprep.subr.mxu0 %v367_v20 }
 0x260   : > { %1187 = vrot.lane.b32.xlu0 %v14942_v31, %s14581_s21  ;;  %v15096_v31 = vpop.xlane.xlu1 %979  ;;  %13319 = vmatpush3.msra.mxu0 %v367_v20 }
 0x262   : > { %831 = vrot.lane.b32.xlu1 %v778_v59, %s14581_s21  ;;  %v362_v59 = vld [vmem:[#allocation7 + $0xb0] sm:$0xff] }
 0x263   : > { %13288 = vmatprep.subr.mxu1 %v362_v59 }
 0x264   : > { %1191 = vrot.lane.b32.xlu0 %v14951_v50, %s14581_s21  ;;  %v15102_v50 = vpop.xlane.xlu1 %985  ;;  %13289 = vmatpush3.msra.mxu1 %v362_v59 }
 0x266   : > { %1189 = vrot.lane.b32.xlu1 %v14955_v56, %s14581_s21  ;;  %v15104_v56 = vpop.xlane.xlu0 %994 }
 0x268   : > { %1195 = vrot.lane.b32.xlu0 %v14971_v15, %s14581_s21 }
 0x26a   : > { %1193 = vrot.lane.b32.xlu1 %v14966_v10, %s14581_s21  ;;  %v15110_v10 = vpop.xlane.xlu1 %991  ;;  %v15112_v15 = vpop.xlane.xlu0 %1000 }
 0x26c   : > { %1197 = vrot.lane.b32.xlu0 %v14982_v24, %s14581_s21  ;;  %v783_v24 = vsub.s32 1, %v14922_v5 }
 0x26e   : > { %v15119_v27 = vpop.xlane.xlu0 %1003  ;;  %v15122_v62 = vrot.slane %v14925_v7, %v783_v24  ;;  %v366_v24 = vld [vmem:[#allocation7 + $0xd0] sm:$0xff] }
 0x26f   : > { %13320 = vmatprep.subr.mxu0 %v366_v24 }
 0x270   : > { %1199 = vrot.lane.b32.xlu0 %v14986_v28, %s14581_s21  ;;  %v15117_v28 = vpop.xlane.xlu1 %997  ;;  %17922 = vst [vmem:[#allocation14_spill] sm:$0xff] %v15122_v62  ;;  %13321 = vmatpush3.msra.mxu0 %v366_v24 }
 0x274   : > { %1201 = vrot.lane.b32.xlu0 %v14998_v43, %s14581_s21 }
 0x278   : > { %1203 = vrot.lane.b32.xlu0 %v15002_v52, %s14581_s21 }
 0x27c   : > { %1205 = vrot.lane.b32.xlu0 %v15013_v37, %s14581_s21 }
 0x280   : > { %1207 = vrot.lane.b32.xlu0 %v15017_v38, %s14581_s21 }
 0x283   : > { %v804_v43 = vpop.permute.xlu1 %803 }
 0x284   : > { %v15127_v52 = vadd.f32 %v804_v43, %v15122_v62  ;;  %1209 = vrot.lane.b32.xlu0 %v15027_v55, %s14581_s21  ;;  %v361_v43 = vld [vmem:[#allocation7 + $0xa8] sm:$0xff] }
 0x285   : > { %v802_v29 = vpop.permute.xlu0 %801  ;;  %13290 = vmatprep.subr.mxu1 %v361_v43 }
 0x286   : > { %1285 = vrot.lane.b32.xlu1 %v15127_v52, %s14582_s5  ;;  %v15134_v37 = vadd.f32 %v802_v29, %v15122_v62  ;;  %v365_v29 = vld [vmem:[#allocation7 + $0xc8] sm:$0xff]  ;;  %13291 = vmatpush3.msra.mxu1 %v361_v43 }
 0x287   : > { %13322 = vmatprep.subr.mxu0 %v365_v29 }
 0x288   : > { %1211 = vrot.lane.b32.xlu0 %v15031_v16, %s14581_s21  ;;  %13323 = vmatpush3.msra.mxu0 %v365_v29 }
 0x28a   : > { %1283 = vrot.lane.b32.xlu1 %v15134_v37, %s14582_s5 }
 0x28c   : > { %1213 = vrot.lane.b32.xlu0 %v15039_v57, %s14581_s21 }
 0x290   : > { %1215 = vrot.lane.b32.xlu0 %v15051_v39, %s14581_s21  ;;  %v1011_v39 = vmul.f32 0.032258064, %v965_v18 }
 0x292   : > { %14069 = vrsqrt.f32 %v1011_v39  ;;  %vm1029_vm5 = vcmp.eq.f32.partialorder %v1011_v39, inf  ;;  %v1032_v6 = vand.u32 2147483648, %v1011_v39  ;;  %vm1031_vm6 = vcmp.eq.f32.partialorder %v1011_v39, 0.0 }
 0x293   : > { %14071 = vrcp.f32 %v1140_v13 }
 0x294   : > { %1217 = vrot.lane.b32.xlu0 %v15054_v40, %s14581_s21 }
 0x29f   : > { %v14070_v63 = vpop.eup %14069 }
 0x2a0   : > { %v1028_v3 = vmul.f32 %v14070_v63, %v1011_v39 }
 0x2a2   : > { %v1030_v12 = vsel %vm1029_vm5, %v1011_v39, %v1028_v3  ;;  %v1016_v3 = vmul.f32 0.032258064, %v15096_v31 }
 0x2a3   : > { %v1033_v14 = vsel %vm1031_vm6, %v1032_v6, %v1030_v12  ;;  %v15233_v6 = vmul.f32 0.032258064, %v15102_v50 }
 0x2a4   : > { %v1139_v18 = vadd.f32 1e-06, %v1033_v14  ;;  %vm1064_vm11 = vcmp.eq.f32.partialorder %v1016_v3, inf  ;;  %v1067_v43 = vand.u32 2147483648, %v1016_v3  ;;  %vm1066_vm12 = vcmp.eq.f32.partialorder %v1016_v3, 0.0 }
 0x2a5   : > { %vm1078_vm15 = vcmp.eq.f32.partialorder %v15233_v6, inf  ;;  %vm1080_vm0 = vcmp.eq.f32.partialorder %v15233_v6, 0.0 }
 0x2a6   : > { %14073 = vrcp.f32 %v1139_v18 }
 0x2bb   : > { %v15146_v7 = vpop.xlane.xlu0 %1006 }
 0x2be   : > { %v15148_v38 = vpop.xlane.xlu1 %1009 }
 0x2bf   : > { %v810_v55 = vpop.permute.xlu0 %809 }
 0x2c0   : > { %v15166_v41 = vadd.f32 %v810_v55, %v15122_v62 }
 0x2c2   : > { %v808_v30 = vpop.permute.xlu1 %807 }
 0x2c3   : > { %v15151_v16 = vadd.f32 %v808_v30, %v15122_v62  ;;  %v814_v32 = vpop.permute.xlu0 %813 }
 0x2c4   : > { %v15181_v60 = vadd.f32 %v814_v32, %v15122_v62  ;;  %v360_v32 = vld [vmem:[#allocation7 + $0xa0] sm:$0xff] }
 0x2c5   : > { %1289 = vrot.lane.b32.xlu1 %v15151_v16, %s14582_s5  ;;  %13292 = vmatprep.subr.mxu1 %v360_v32 }
 0x2c6   : > { %v806_v57 = vpop.permute.xlu1 %805  ;;  %13293 = vmatpush3.msra.mxu1 %v360_v32 }
 0x2c7   : > { %v15156_v44 = vadd.f32 %v806_v57, %v15122_v62  ;;  %v818_v35 = vpop.permute.xlu0 %817  ;;  %v364_v57 = vld [vmem:[#allocation7 + $0xc0] sm:$0xff] }
 0x2c8   : > { %v15191_v4 = vadd.f32 %v818_v35, %v15122_v62  ;;  %13324 = vmatprep.subr.mxu0 %v364_v57 }
 0x2c9   : > { %1287 = vrot.lane.b32.xlu1 %v15156_v44, %s14582_s5  ;;  %13325 = vmatpush3.msra.mxu0 %v364_v57  ;;  %v15253_v57 = vmul.f32 0.032258064, %v15117_v28 }
 0x2ca   : > { %v812_v36 = vpop.permute.xlu1 %811 }
 0x2cb   : > { %v15161_v47 = vadd.f32 %v812_v36, %v15122_v62  ;;  %v822_v40 = vpop.permute.xlu0 %821 }
 0x2cc   : > { %v15201_v17 = vadd.f32 %v822_v40, %v15122_v62  ;;  %v14072_v40 = vpop.eup %14071 }
 0x2cd   : > { %1293 = vrot.lane.b32.xlu1 %v15161_v47, %s14582_s5  ;;  %v14074_v61 = vpop.eup %14073 }
 0x2ce   : > { %v816_v48 = vpop.permute.xlu1 %815 }
 0x2cf   : > { %v826_v46 = vpop.permute.xlu0 %825  ;;  %v15171_v33 = vadd.f32 %v816_v48, %v15122_v62 }
 0x2d0   : > { %v15206_v22 = vadd.f32 %v826_v46, %v15122_v62 }
 0x2d1   : > { %1291 = vrot.lane.b32.xlu1 %v15166_v41, %s14582_s5 }
 0x2d2   : > { %v820_v0 = vpop.permute.xlu1 %819 }
 0x2d3   : > { %v830_v54 = vpop.permute.xlu0 %829  ;;  %v15186_v1 = vadd.f32 %v820_v0, %v15122_v62 }
 0x2d4   : > { %v15174_v58 = vadd.f32 %v830_v54, %v15122_v62 }
 0x2d5   : > { %1297 = vrot.lane.b32.xlu1 %v15171_v33, %s14582_s5 }
 0x2d6   : > { %1311 = vrot.lane.b32.xlu0 %v15174_v58, %s14582_s5  ;;  %v824_v2 = vpop.permute.xlu1 %823 }
 0x2d7   : > { %v15196_v53 = vadd.f32 %v824_v2, %v15122_v62  ;;  %v1188_v36 = vpop.permute.xlu0 %1187  ;;  %v1014_v2 = vmul.f32 0.032258064, %v15086_v23  ;;  %v15237_v23 = vmul.f32 0.032258064, %v15088_v26  ;;  %v15247_v26 = vmul.f32 0.032258064, %v15098_v25 }
 0x2d8   : > { %v1235_v46 = vmul.f32 %v1188_v36, %v15134_v37  ;;  %v1015_v37 = vmul.f32 0.032258064, %v15079_v45  ;;  %v15242_v45 = vmul.f32 0.032258064, %v15110_v10 }
 0x2d9   : > { %1295 = vrot.lane.b32.xlu1 %v15181_v60, %s14582_s5  ;;  %14075 = vrsqrt.f32 %v1014_v2  ;;  %vm1050_vm7 = vcmp.eq.f32.partialorder %v1014_v2, inf  ;;  %v1053_v31 = vand.u32 2147483648, %v1014_v2  ;;  %vm1052_vm8 = vcmp.eq.f32.partialorder %v1014_v2, 0.0 }
 0x2da   : > { %v828_v9 = vpop.permute.xlu1 %827  ;;  %v1251_v49 = vmul.f32 %v14074_v61, %v1235_v46  ;;  %14077 = vrsqrt.f32 %v1013_v51  ;;  %vm1057_vm13 = vcmp.eq.f32.partialorder %v1015_v37, inf  ;;  %vm1059_vm14 = vcmp.eq.f32.partialorder %v1015_v37, 0.0 }
 0x2db   : > { %v15211_v30 = vadd.f32 %v828_v9, %v15122_v62  ;;  %14079 = vrsqrt.f32 %v1016_v3  ;;  %v15230_v8 = vpop.permute.xlu0 %1191  ;;  %vm1071_vm2 = vcmp.eq.f32.partialorder %v15237_v23, inf  ;;  %vm1073_vm3 = vcmp.eq.f32.partialorder %v15237_v23, 0.0 }
 0x2dc   : > { %14081 = vrsqrt.f32 %v1015_v37  ;;  %vm1092_vm4 = vcmp.eq.f32.partialorder %v15242_v45, inf  ;;  %vm1085_vm5 = vcmp.eq.f32.partialorder %v15247_v26, inf  ;;  %vm1094_vm6 = vcmp.eq.f32.partialorder %v15242_v45, 0.0 }
 0x2dd   : > { %1301 = vrot.lane.b32.xlu1 %v15186_v1, %s14582_s5  ;;  %14083 = vrsqrt.f32 %v15233_v6 }
 0x2de   : > { %v832_v42 = vpop.permute.xlu1 %831  ;;  %14085 = vrsqrt.f32 %v15237_v23 }
 0x2df   : > { %v15214_v34 = vadd.f32 %v832_v42, %v15122_v62  ;;  %v15239_v12 = vpop.permute.xlu0 %1195  ;;  %v1046_v42 = vand.u32 2147483648, %v1013_v51  ;;  %14087 = vrsqrt.f32 %v15242_v45 }
 0x2e0   : > { %14089 = vrsqrt.f32 %v15247_v26 }
 0x2e1   : > { %1299 = vrot.lane.b32.xlu1 %v15191_v4, %s14582_s5 }
 0x2e2   : > { %v1190_v55 = vpop.permute.xlu1 %1189 }
 0x2e3   : > { %v1236_v35 = vmul.f32 %v1190_v55, %v15127_v52  ;;  %v15249_v18 = vpop.permute.xlu0 %1197 }
 0x2e5   : > { %1305 = vrot.lane.b32.xlu1 %v15196_v53, %s14582_s5  ;;  %v1252_v48 = vmul.f32 %v14072_v40, %v1236_v35  ;;  %v1060_v40 = vand.u32 2147483648, %v1015_v37 }
 0x2e6   : > { %v15219_v39 = vpop.permute.xlu1 %1193  ;;  %v14076_v9 = vpop.eup %14075 }
 0x2e7   : > { %v1049_v11 = vmul.f32 %v14076_v9, %v1014_v2  ;;  %v14078_v21 = vpop.eup %14077  ;;  %v15255_v35 = vpop.permute.xlu0 %1199 }
 0x2e8   : > { %v1042_v13 = vmul.f32 %v14078_v21, %v1013_v51  ;;  %v14080_v50 = vpop.eup %14079  ;;  %v15279_v21 = vmul.f32 0.032258064, %v15119_v27  ;;  %v1095_v27 = vand.u32 2147483648, %v15242_v45 }
 0x2e9   : > { %1303 = vrot.lane.b32.xlu1 %v15201_v17, %s14582_s5  ;;  %v1051_v14 = vsel %vm1050_vm7, %v1014_v2, %v1049_v11  ;;  %v1063_v10 = vmul.f32 %v14080_v50, %v1016_v3  ;;  %v14082_v59 = vpop.eup %14081  ;;  %v1238_v50 = vmul.f32 %v15219_v39, %v15151_v16  ;;  %v15302_v16 = vmul.f32 0.032258064, %v15148_v38 }
 0x2ea   : > { %v1054_v19 = vsel %vm1052_vm8, %v1053_v31, %v1051_v14  ;;  %v1044_v20 = vsel %vm1043_vm9, %v1013_v51, %v1042_v13  ;;  %v1056_v32 = vmul.f32 %v14082_v59, %v1015_v37  ;;  %v14084_v25 = vpop.eup %14083  ;;  %v15286_v14 = vmul.f32 0.032258064, %v15146_v7 }
 0x2eb   : > { %v1142_v24 = vadd.f32 1e-06, %v1054_v19  ;;  %v1047_v29 = vsel %vm1045_vm10, %v1046_v42, %v1044_v20  ;;  %v1065_v55 = vsel %vm1064_vm11, %v1016_v3, %v1063_v10  ;;  %v14086_v61 = vpop.eup %14085  ;;  %v1237_v39 = vmul.f32 %v15230_v8, %v15156_v44 }
 0x2ec   : > { %v1141_v36 = vadd.f32 1e-06, %v1047_v29  ;;  %v1068_v46 = vsel %vm1066_vm12, %v1067_v43, %v1065_v55  ;;  %v14088_v2 = vpop.eup %14087  ;;  %v1070_v3 = vmul.f32 %v14086_v61, %v15237_v23  ;;  %vm1087_vm7 = vcmp.eq.f32.partialorder %v15247_v26, 0.0 }
 0x2ed   : > { %1307 = vrot.lane.b32.xlu1 %v15206_v22, %s14582_s5  ;;  %14091 = vrcp.f32 %v1142_v24  ;;  %v1144_v28 = vadd.f32 1e-06, %v1068_v46  ;;  %v1091_v11 = vmul.f32 %v14088_v2, %v15242_v45  ;;  %vm1106_vm8 = vcmp.eq.f32.partialorder %v15253_v57, inf }
 0x2ee   : > { %14093 = vrsqrt.f32 %v15253_v57  ;;  %v1072_v13 = vsel %vm1071_vm2, %v15237_v23, %v1070_v3  ;;  %vm1108_vm9 = vcmp.eq.f32.partialorder %v15253_v57, 0.0  ;;  %vm1129_vm2 = vcmp.eq.f32.partialorder %v15286_v14, 0.0 }
 0x2ef   : > { %14095 = vrcp.f32 %v1141_v36  ;;  %v1093_v20 = vsel %vm1092_vm4, %v15242_v45, %v1091_v11  ;;  %v1240_v36 = vmul.f32 %v15249_v18, %v15161_v47  ;;  %v1109_v45 = vand.u32 2147483648, %v15253_v57 }
 0x2f0   : > { %v1096_v44 = vsel %vm1094_vm6, %v1095_v27, %v1093_v20  ;;  %vm1136_vm4 = vcmp.eq.f32.partialorder %v15302_v16, 0.0  ;;  %vm1820_vm6 = vcmask 64512  }
 0x2f1   : > { %1309 = vrot.lane.b32.xlu1 %v15211_v30, %s14582_s5  ;;  %v1148_v61 = vadd.f32 1e-06, %v1096_v44 }
 0x2f5   : > { %1313 = vrot.lane.b32.xlu1 %v15214_v34, %s14582_s5 }
 0x2f8   : > { %v1286_v54 = vpop.permute.xlu1 %1285 }
 0x2f9   : > { %v1332_v0 = vadd.f32 %v1286_v54, %v1252_v48  ;;  %v1058_v48 = vsel %vm1057_vm13, %v1015_v37, %v1056_v32  ;;  %v1077_v54 = vmul.f32 %v14084_v25, %v15233_v6  ;;  %v1074_v37 = vand.u32 2147483648, %v15237_v23 }
 0x2fa   : > { %v1088_v25 = vand.u32 2147483648, %v15247_v26 }
 0x2fb   : > { %1369 = vrot.lane.b32.xlu1 %v1332_v0, %s14582_s5  ;;  %v15260_v0 = vmul.f32 0.032258064, %v15104_v56  ;;  %v1079_v51 = vsel %vm1078_vm15, %v15233_v6, %v1077_v54  ;;  %v15271_v56 = vmul.f32 0.032258064, %v15112_v15  ;;  %v14090_v15 = vpop.eup %14089  ;;  %v1075_v7 = vsel %vm1073_vm3, %v1074_v37, %v1072_v13 }
 0x2fc   : > { %v1284_v63 = vpop.permute.xlu1 %1283  ;;  %v14092_v19 = vpop.eup %14091  ;;  %v1084_v10 = vmul.f32 %v14090_v15, %v15247_v26  ;;  %v1145_v55 = vadd.f32 1e-06, %v1075_v7  ;;  %vm1122_vm15 = vcmp.eq.f32.partialorder %v15279_v21, 0.0  ;;  %vm1134_vm3 = vcmp.eq.f32.partialorder %v15302_v16, inf }
 0x2fd   : > { %v1331_v52 = vadd.f32 %v1284_v63, %v1251_v49  ;;  %v1081_v49 = vand.u32 2147483648, %v15233_v6  ;;  %v15265_v63 = vpop.permute.xlu0 %1201  ;;  %14097 = vrsqrt.f32 %v15260_v0  ;;  %v1254_v59 = vmul.f32 %v14092_v19, %v1238_v50  ;;  %v14094_v24 = vpop.eup %14093 }
 0x2fe   : > { %14099 = vrcp.f32 %v1144_v28  ;;  %v14096_v32 = vpop.eup %14095  ;;  %v1086_v23 = vsel %vm1085_vm5, %v15247_v26, %v1084_v10  ;;  %v1105_v8 = vmul.f32 %v14094_v24, %v15253_v57  ;;  %vm1099_vm10 = vcmp.eq.f32.partialorder %v15260_v0, inf }
 0x2ff   : > { %1367 = vrot.lane.b32.xlu0 %v1331_v52, %s14582_s5  ;;  %v1061_v52 = vsel %vm1059_vm14, %v1060_v40, %v1058_v48  ;;  %v1082_v31 = vsel %vm1080_vm0, %v1081_v49, %v1079_v51  ;;  %14101 = vrsqrt.f32 %v15271_v56  ;;  %v1253_v40 = vmul.f32 %v14096_v32, %v1237_v39 }
 0x300   : > { %v1143_v9 = vadd.f32 1e-06, %v1061_v52  ;;  %v1146_v6 = vadd.f32 1e-06, %v1082_v31  ;;  %v1089_v49 = vsel %vm1087_vm7, %v1088_v25, %v1086_v23  ;;  %v1107_v47 = vsel %vm1106_vm8, %v15253_v57, %v1105_v8 }
 0x301   : > { %v15291_v42 = vpop.permute.xlu0 %1203  ;;  %v1239_v52 = vmul.f32 %v15239_v12, %v15166_v41  ;;  %v1147_v26 = vadd.f32 1e-06, %v1089_v49  ;;  %vm1101_vm11 = vcmp.eq.f32.partialorder %v15260_v0, 0.0  ;;  %v1102_v31 = vand.u32 2147483648, %v15260_v0 }
 0x302   : > { %14103 = vrcp.f32 %v1143_v9  ;;  %v1110_v41 = vsel %vm1108_vm9, %v1109_v45, %v1107_v47  ;;  %v1242_v50 = vmul.f32 %v15265_v63, %v15171_v33  ;;  %vm1113_vm12 = vcmp.eq.f32.partialorder %v15271_v56, inf }
 0x303   : > { %14105 = vrsqrt.f32 %v15279_v21  ;;  %vm1115_vm13 = vcmp.eq.f32.partialorder %v15271_v56, 0.0  ;;  %v1150_v57 = vadd.f32 1e-06, %v1110_v41  ;;  %v1116_v7 = vand.u32 2147483648, %v15271_v56 }
 0x304   : > { %14107 = vrsqrt.f32 %v15286_v14  ;;  %vm1120_vm14 = vcmp.eq.f32.partialorder %v15279_v21, inf  ;;  %vm1127_vm0 = vcmp.eq.f32.partialorder %v15286_v14, inf  ;;  %v1123_v23 = vand.u32 2147483648, %v15279_v21 }
 0x305   : > { %14109 = vrcp.f32 %v1146_v6  ;;  %v15311_v38 = vpop.permute.xlu0 %1205  ;;  %vm14584_vm5 = vmmov 0  }
 0x306   : > { %14111 = vrsqrt.f32 %v15302_v16 }
 0x307   : > { %14113 = vrcp.f32 %v1145_v55 }
 0x308   : > { %14115 = vrcp.f32 %v1148_v61 }
 0x309   : > { %v15331_v3 = vpop.permute.xlu0 %1207  ;;  %14117 = vrcp.f32 %v1147_v26 }
 0x30a   : > { %v14098_v46 = vpop.eup %14097  ;;  %14119 = vrcp.f32 %v1150_v57 }
 0x30b   : > { %v14100_v28 = vpop.eup %14099  ;;  %v1098_v18 = vmul.f32 %v14098_v46, %v15260_v0  ;;  %v1244_v46 = vmul.f32 %v15311_v38, %v15186_v1  ;;  %v1243_v1 = vmul.f32 %v15291_v42, %v15191_v4 }
 0x30c   : > { %v1256_v2 = vmul.f32 %v14100_v28, %v1240_v36  ;;  %v14102_v51 = vpop.eup %14101 }
 0x30d   : > { %v1100_v15 = vsel %vm1099_vm10, %v15260_v0, %v1098_v18  ;;  %v1112_v13 = vmul.f32 %v14102_v51, %v15271_v56  ;;  %v1210_v33 = vpop.permute.xlu0 %1209 }
 0x30e   : > { %v1103_v63 = vsel %vm1101_vm11, %v1102_v31, %v1100_v15 }
 0x30f   : > { %v14104_v11 = vpop.eup %14103  ;;  %v1149_v25 = vadd.f32 1e-06, %v1103_v63 }
 0x310   : > { %v14106_v12 = vpop.eup %14105  ;;  %v1255_v27 = vmul.f32 %v14104_v11, %v1239_v52  ;;  %v1137_v52 = vand.u32 2147483648, %v15302_v16  ;;  %v1246_v11 = vmul.f32 %v1210_v33, %v15196_v53 }
 0x311   : > { %v14108_v6 = vpop.eup %14107  ;;  %v1119_v39 = vmul.f32 %v14106_v12, %v15279_v21  ;;  %14121 = vrcp.f32 %v1149_v25 }
 0x312   : > { %v14110_v10 = vpop.eup %14109  ;;  %v1126_v24 = vmul.f32 %v14108_v6, %v15286_v14 }
 0x313   : > { %v14112_v55 = vpop.eup %14111  ;;  %v1121_v8 = vsel %vm1120_vm14, %v15279_v21, %v1119_v39 }
 0x314   : > { %v14114_v44 = vpop.eup %14113  ;;  %v1128_v36 = vsel %vm1127_vm0, %v15286_v14, %v1126_v24  ;;  %v1124_v49 = vsel %vm1122_vm15, %v1123_v23, %v1121_v8 }
 0x315   : > { %v1152_v51 = vadd.f32 1e-06, %v1124_v49 }
 0x337   : > { %v1290_v43 = vpop.permute.xlu1 %1289 }
 0x338   : > { %v1334_v29 = vadd.f32 %v1290_v43, %v1254_v59  ;;  %v1114_v59 = vsel %vm1113_vm12, %v15271_v56, %v1112_v13  ;;  %v1241_v43 = vmul.f32 %v15255_v35, %v15181_v60  ;;  %v1130_v60 = vand.u32 2147483648, %v15286_v14  ;;  %v14116_v56 = vpop.eup %14115 }
 0x339   : > { %v1117_v35 = vsel %vm1115_vm13, %v1116_v7, %v1114_v59  ;;  %v1260_v38 = vmul.f32 %v14116_v56, %v1244_v46 }
 0x33a   : > { %1373 = vrot.lane.b32.xlu1 %v1334_v29, %s14582_s5  ;;  %v1258_v29 = vmul.f32 %v14110_v10, %v1242_v50  ;;  %v1151_v45 = vadd.f32 1e-06, %v1117_v35  ;;  %v1131_v47 = vsel %vm1129_vm2, %v1130_v60, %v1128_v36 }
 0x33b   : > { %v1288_v48 = vpop.permute.xlu1 %1287  ;;  %v1153_v21 = vadd.f32 1e-06, %v1131_v47 }
 0x33c   : > { %v1333_v54 = vadd.f32 %v1288_v48, %v1253_v40  ;;  %v1133_v40 = vmul.f32 %v14112_v55, %v15302_v16  ;;  %v1257_v48 = vmul.f32 %v14114_v44, %v1241_v43  ;;  %14123 = vrcp.f32 %v1151_v45 }
 0x33d   : > { %14125 = vrcp.f32 %v1152_v51 }
 0x33e   : > { %1371 = vrot.lane.b32.xlu0 %v1333_v54, %s14582_s5  ;;  %v1212_v54 = vpop.permute.xlu0 %1211  ;;  %v1135_v18 = vsel %vm1134_vm3, %v15302_v16, %v1133_v40  ;;  %14127 = vrcp.f32 %v1153_v21  ;;  %v1245_v16 = vmul.f32 %v15331_v3, %v15201_v17 }
 0x33f   : > { %v1294_v37 = vpop.permute.xlu1 %1293  ;;  %v1138_v26 = vsel %vm1136_vm4, %v1137_v52, %v1135_v18  ;;  %v1247_v6 = vmul.f32 %v1212_v54, %v15206_v22  ;;  %v14387_v52 = vld [vmem:[#allocation7 + $0xe0] sm:$0xff] }
 0x340   : > { %v1336_v9 = vadd.f32 %v1294_v37, %v1256_v2  ;;  %v1154_v41 = vadd.f32 1e-06, %v1138_v26 }
 0x342   : > { %1377 = vrot.lane.b32.xlu1 %v1336_v9, %s14582_s5  ;;  %v14118_v9 = vpop.eup %14117  ;;  %v1214_v14 = vpop.permute.xlu0 %1213  ;;  %14129 = vrcp.f32 %v1154_v41 }
 0x343   : > { %v1292_v19 = vpop.permute.xlu1 %1291  ;;  %v1259_v4 = vmul.f32 %v14118_v9, %v1243_v1  ;;  %v14120_v12 = vpop.eup %14119  ;;  %v1248_v39 = vmul.f32 %v1214_v14, %v15211_v30  ;;  %v17825_v1 = vmov 0.0  }
 0x344   : > { %v1335_v20 = vadd.f32 %v1292_v19, %v1255_v27  ;;  %v1262_v15 = vmul.f32 %v14120_v12, %v1246_v11  ;;  %v14122_v53 = vpop.eup %14121  ;;  %13350 = vmatprep.subr.mxu1 %v17825_v1  ;;  %13360 = vmatprep.subr.mxu0 %v17825_v1 }
 0x345   : > { %v1261_v19 = vmul.f32 %v14122_v53, %v1245_v16 }
 0x346   : > { %1375 = vrot.lane.b32.xlu0 %v1335_v20, %s14582_s5  ;;  %v1216_v13 = vpop.permute.xlu0 %1215 }
 0x347   : > { %v1298_v32 = vpop.permute.xlu1 %1297  ;;  %v1249_v17 = vmul.f32 %v1216_v13, %v15174_v58 }
 0x348   : > { %v1338_v0 = vadd.f32 %v1298_v32, %v1258_v29 }
 0x349   : > { %v14124_v10 = vpop.eup %14123 }
 0x34a   : > { %1381 = vrot.lane.b32.xlu1 %v1338_v0, %s14582_s5  ;;  %v1218_v7 = vpop.permute.xlu0 %1217  ;;  %v1263_v3 = vmul.f32 %v14124_v10, %v1247_v6  ;;  %v14126_v63 = vpop.eup %14125 }
 0x34b   : > { %v1296_v61 = vpop.permute.xlu1 %1295  ;;  %v14128_v24 = vpop.eup %14127  ;;  %v1250_v22 = vmul.f32 %v1218_v7, %v15214_v34  ;;  %v1264_v55 = vmul.f32 %v14126_v63, %v1248_v39 }
 0x34c   : > { %v1337_v28 = vadd.f32 %v1296_v61, %v1257_v48  ;;  %v1265_v29 = vmul.f32 %v14128_v24, %v1249_v17 }
 0x34e   : > { %1379 = vrot.lane.b32.xlu0 %v1337_v28, %s14582_s5  ;;  %v1312_v43 = vpop.permute.xlu0 %1311 }
 0x34f   : > { %v1302_v2 = vpop.permute.xlu1 %1301  ;;  %v1345_v23 = vadd.f32 %v1312_v43, %v1265_v29  ;;  %v14130_v30 = vpop.eup %14129 }
 0x350   : > { %v1340_v37 = vadd.f32 %v1302_v2, %v1260_v38  ;;  %v1266_v58 = vmul.f32 %v14130_v30, %v1250_v22  ;;  %v1349_v38 = vsub.s32 0, %v14922_v5 }
 0x352   : > { %1385 = vrot.lane.b32.xlu1 %v1340_v37, %s14582_s5  ;;  %v1350_v2 = vrot.slane %v14387_v52, %v1349_v38 }
 0x353   : > { %v1300_v42 = vpop.permute.xlu1 %1299 }
 0x354   : > { %v1339_v31 = vadd.f32 %v1300_v42, %v1259_v4 }
 0x356   : > { %1383 = vrot.lane.b32.xlu0 %v1339_v31, %s14582_s5 }
 0x357   : > { %v1306_v50 = vpop.permute.xlu1 %1305 }
 0x358   : > { %v1342_v27 = vadd.f32 %v1306_v50, %v1262_v15 }
 0x35a   : > { %1389 = vrot.lane.b32.xlu1 %v1342_v27, %s14582_s5 }
 0x35b   : > { %v1304_v20 = vpop.permute.xlu1 %1303 }
 0x35c   : > { %v1341_v57 = vadd.f32 %v1304_v20, %v1261_v19 }
 0x35e   : > { %1387 = vrot.lane.b32.xlu0 %v1341_v57, %s14582_s5 }
 0x35f   : > { %v1308_v33 = vpop.permute.xlu1 %1307 }
 0x360   : > { %v1343_v59 = vadd.f32 %v1308_v33, %v1263_v3 }
 0x362   : > { %1391 = vrot.lane.b32.xlu0 %v1343_v59, %s14582_s5 }
 0x363   : > { %v1310_v32 = vpop.permute.xlu1 %1309 }
 0x364   : > { %v1344_v0 = vadd.f32 %v1310_v32, %v1264_v55 }
 0x366   : > { %1393 = vrot.lane.b32.xlu1 %v1344_v0, %s14582_s5  ;;  %1395 = vrot.lane.b32.xlu0 %v1345_v23, %s14582_s5 }
 0x367   : > { %v1314_v25 = vpop.permute.xlu1 %1313 }
 0x368   : > { %v1346_v44 = vadd.f32 %v1314_v25, %v1266_v58 }
 0x36a   : > { %1397 = vrot.lane.b32.xlu1 %v1346_v44, %s14582_s5 }
 0x36d   : > { %v1370_v60 = vpop.permute.xlu1 %1369 }
 0x371   : > { %v1368_v8 = vpop.permute.xlu0 %1367 }
 0x372   : > { %13294 = vmatprep.mubr.msk.f32.mxu1 %vm865_vm1, %v1368_v8  ;;  %13326 = vmatprep.mubr.msk.f32.mxu0 %vm865_vm1, %v1368_v8 }
 0x373   : > { %13295 = vmatmul.mubr.msk.f32.vlgmr.msra.gmra.mxu1 %vm865_vm1, %v1370_v60  ;;  %13327 = vmatmul.mubr.msk.f32.vlgmr.msra.gmra.mxu0 %vm865_vm1, %v1370_v60 }
 0x3ac   : > { %v1374_v35 = vpop.permute.xlu1 %1373 }
 0x3b0   : > { %v1372_v34 = vpop.permute.xlu0 %1371 }
 0x3b1   : > { %13297 = vmatprep.mubr.msk.f32.mxu1 %vm865_vm1, %v1372_v34  ;;  %13329 = vmatprep.mubr.msk.f32.mxu0 %vm865_vm1, %v1372_v34 }
 0x3b2   : > { %13298 = vmatmul.mubr.msk.f32.gmra.mxu1 %vm865_vm1, %v1374_v35  ;;  %13330 = vmatmul.mubr.msk.f32.gmra.mxu0 %vm865_vm1, %v1374_v35 }
 0x3b4   : > { %v1378_v40 = vpop.permute.xlu1 %1377 }
 0x3b8   : > { %v1376_v36 = vpop.permute.xlu0 %1375 }
 0x3b9   : > { %13300 = vmatprep.mubr.msk.f32.mxu1 %vm865_vm1, %v1376_v36  ;;  %13332 = vmatprep.mubr.msk.f32.mxu0 %vm865_vm1, %v1376_v36 }
 0x3ba   : > { %13301 = vmatmul.mubr.msk.f32.gmra.mxu1 %vm865_vm1, %v1378_v40  ;;  %13333 = vmatmul.mubr.msk.f32.gmra.mxu0 %vm865_vm1, %v1378_v40 }
 0x3bc   : > { %v1382_v48 = vpop.permute.xlu1 %1381 }
 0x3c0   : > { %v1380_v46 = vpop.permute.xlu0 %1379 }
 0x3c1   : > { %13303 = vmatprep.mubr.msk.f32.mxu1 %vm865_vm1, %v1380_v46  ;;  %13335 = vmatprep.mubr.msk.f32.mxu0 %vm865_vm1, %v1380_v46 }
 0x3c2   : > { %13304 = vmatmul.mubr.msk.f32.gmra.mxu1 %vm865_vm1, %v1382_v48  ;;  %13336 = vmatmul.mubr.msk.f32.gmra.mxu0 %vm865_vm1, %v1382_v48  ;;  %v15637_v48 = vld [vmem:[%s15634_s29] ss:$0 sm:$0xff] }
 0x3c3   : > { %17929 = vst [vmem:[#allocation21_spill] sm:$0xff] %v15637_v48 }
 0x3c4   : > { %v1386_v61 = vpop.permute.xlu1 %1385 }
 0x3c8   : > { %v1384_v54 = vpop.permute.xlu0 %1383 }
 0x3c9   : > { %13306 = vmatprep.mubr.msk.f32.mxu1 %vm865_vm1, %v1384_v54  ;;  %13338 = vmatprep.mubr.msk.f32.mxu0 %vm865_vm1, %v1384_v54 }
 0x3ca   : > { %13307 = vmatmul.mubr.msk.f32.gmra.mxu1 %vm865_vm1, %v1386_v61  ;;  %13339 = vmatmul.mubr.msk.f32.gmra.mxu0 %vm865_vm1, %v1386_v61 }
 0x3cc   : > { %v1390_v45 = vpop.permute.xlu1 %1389 }
 0x3d0   : > { %v1388_v28 = vpop.permute.xlu0 %1387 }
 0x3d1   : > { %13309 = vmatprep.mubr.msk.f32.mxu1 %vm865_vm1, %v1388_v28  ;;  %13341 = vmatprep.mubr.msk.f32.mxu0 %vm865_vm1, %v1388_v28 }
 0x3d2   : > { %13310 = vmatmul.mubr.msk.f32.gmra.mxu1 %vm865_vm1, %v1390_v45  ;;  %13342 = vmatmul.mubr.msk.f32.gmra.mxu0 %vm865_vm1, %v1390_v45  ;;  %v15643_v45 = vld [vmem:[%s15634_s29 + $0x1] ss:$0 sm:$0xff] }
 0x3d3   : > { %17930 = vst [vmem:[#allocation22_spill] sm:$0xff] %v15643_v45 }
 0x3d4   : > { %v1392_v49 = vpop.permute.xlu0 %1391 }
 0x3d5   : > { %13312 = vmatprep.mubr.msk.f32.mxu1 %vm865_vm1, %v1392_v49  ;;  %13344 = vmatprep.mubr.msk.f32.mxu0 %vm865_vm1, %v1392_v49 }
 0x3d8   : > { %v1394_v56 = vpop.permute.xlu1 %1393  ;;  %v1396_v47 = vpop.permute.xlu0 %1395 }
 0x3d9   : > { %13313 = vmatmul.mubr.msk.f32.gmra.mxu1 %vm865_vm1, %v1394_v56  ;;  %13345 = vmatmul.mubr.msk.f32.gmra.mxu0 %vm865_vm1, %v1394_v56 }
 0x3da   : > { %13315 = vmatprep.mubr.msk.f32.mxu1 %vm865_vm1, %v1396_v47  ;;  %13347 = vmatprep.mubr.msk.f32.mxu0 %vm865_vm1, %v1396_v47 }
 0x3dc   : > { %v1398_v18 = vpop.permute.xlu1 %1397 }
 0x3dd   : > { %13316 = vmatmul.mubr.msk.f32.gmra.mxu1 %vm865_vm1, %v1398_v18  ;;  %13348 = vmatmul.mubr.msk.f32.gmra.mxu0 %vm865_vm1, %v1398_v18 }
 0x3de   : > { %13352 = vmatprep.mubr.msk.f32.mxu1 %vm14584_vm5, %v17825_v1  ;;  %13362 = vmatprep.mubr.msk.f32.mxu0 %vm14584_vm5, %v17825_v1 }
 0x433   : > { %v13296_v51 = vpop.f32.mrf.mxu1  ;;  %v15607_v36 = vpop.f32.mrf.mxu0 }
 0x434   : > { %v15434_v21 = vadd.f32 %v13296_v51, %v1350_v2 }
 0x435   : > { %v1497_v37 = vpop.f32.mrf.mxu1  ;;  %v15621_v46 = vpop.f32.mrf.mxu0 }
 0x436   : > { %v15436_v9 = vadd.f32 %v1497_v37, %v1350_v2  ;;  %1896 = vrot.lane.b32.xlu1 %v15434_v21, %s14582_s5  ;;  %17928 = vst [vmem:[#allocation20_spill] sm:$0xff] %v15621_v46 }
 0x438   : > { %1818 = vrot.lane.b32.xlu0 %v15436_v9, %s14582_s5 }
 0x472   : > { %v13299_v5 = vpop.f32.mrf.mxu1  ;;  %v15652_v52 = vpop.f32.mrf.mxu0 }
 0x473   : > { %v15442_v14 = vadd.f32 %v13299_v5, %v1350_v2  ;;  %17931 = vst [vmem:[#allocation23_spill] sm:$0xff] %v15652_v52 }
 0x474   : > { %v1507_v26 = vpop.f32.mrf.mxu1 }
 0x475   : > { %v15444_v11 = vadd.f32 %v1507_v26, %v1350_v2  ;;  %2050 = vrot.lane.b32.xlu1 %v15442_v14, %s14582_s5 }
 0x477   : > { %1973 = vrot.lane.b32.xlu0 %v15444_v11, %s14582_s5 }
 0x47a   : > { %v13302_v4 = vpop.f32.mrf.mxu1 }
 0x47b   : > { %v15450_v42 = vadd.f32 %v13302_v4, %v1350_v2 }
 0x47c   : > { %v1517_v31 = vpop.f32.mrf.mxu1 }
 0x47d   : > { %v15452_v41 = vadd.f32 %v1517_v31, %v1350_v2  ;;  %2204 = vrot.lane.b32.xlu1 %v15450_v42, %s14582_s5 }
 0x47f   : > { %2127 = vrot.lane.b32.xlu0 %v15452_v41, %s14582_s5 }
 0x482   : > { %v13305_v12 = vpop.f32.mrf.mxu1 }
 0x483   : > { %v15458_v16 = vadd.f32 %v13305_v12, %v1350_v2 }
 0x484   : > { %v1527_v15 = vpop.f32.mrf.mxu1 }
 0x485   : > { %17923 = vst [vmem:[#allocation15_spill] sm:$0xff] %v15458_v16  ;;  %v15460_v13 = vadd.f32 %v1527_v15, %v1350_v2  ;;  %2358 = vrot.lane.b32.xlu1 %v15458_v16, %s14582_s5 }
 0x487   : > { %2281 = vrot.lane.b32.xlu0 %v15460_v13, %s14582_s5 }
 0x48a   : > { %v13308_v50 = vpop.f32.mrf.mxu1 }
 0x48b   : > { %v15466_v27 = vadd.f32 %v13308_v50, %v1350_v2 }
 0x48c   : > { %v1537_v53 = vpop.f32.mrf.mxu1 }
 0x48d   : > { %v15468_v6 = vadd.f32 %v1537_v53, %v1350_v2  ;;  %2512 = vrot.lane.b32.xlu1 %v15466_v27, %s14582_s5 }
 0x48f   : > { %17924 = vst [vmem:[#allocation16_spill] sm:$0xff] %v15468_v6  ;;  %2435 = vrot.lane.b32.xlu0 %v15468_v6, %s14582_s5 }
 0x492   : > { %v13311_v19 = vpop.f32.mrf.mxu1 }
 0x493   : > { %v15474_v20 = vadd.f32 %v13311_v19, %v1350_v2 }
 0x494   : > { %v1547_v57 = vpop.f32.mrf.mxu1 }
 0x495   : > { %v15476_v10 = vadd.f32 %v1547_v57, %v1350_v2  ;;  %2666 = vrot.lane.b32.xlu1 %v15474_v20, %s14582_s5 }
 0x497   : > { %17925 = vst [vmem:[#allocation17_spill] sm:$0xff] %v15476_v10  ;;  %2589 = vrot.lane.b32.xlu0 %v15476_v10, %s14582_s5 }
 0x499   : > { %v13314_v7 = vpop.f32.mrf.mxu1 }
 0x49a   : > { %v15482_v39 = vadd.f32 %v13314_v7, %v1350_v2 }
 0x49b   : > { %v1557_v17 = vpop.f32.mrf.mxu1 }
 0x49c   : > { %v15484_v3 = vadd.f32 %v1557_v17, %v1350_v2  ;;  %2820 = vrot.lane.b32.xlu1 %v15482_v39, %s14582_s5  ;;  %v15681_v17 = vld [vmem:[%s15634_s29 + $0x2] ss:$0 sm:$0xff] }
 0x49d   : > { %v13317_v33 = vpop.f32.mrf.mxu1  ;;  %17935 = vst [vmem:[#allocation27_spill] sm:$0xff] %v15681_v17 }
 0x49e   : > { %17926 = vst [vmem:[#allocation18_spill] sm:$0xff] %v15484_v3  ;;  %v15488_v63 = vadd.f32 %v13317_v33, %v1350_v2  ;;  %2743 = vrot.lane.b32.xlu0 %v15484_v3, %s14582_s5  ;;  %v15684_v33 = vld [vmem:[%s15634_s29 + $0x3] ss:$0 sm:$0xff] }
 0x49f   : > { %v1567_v59 = vpop.f32.mrf.mxu1  ;;  %17936 = vst [vmem:[#allocation28_spill] sm:$0xff] %v15684_v33 }
 0x4a0   : > { %v15492_v24 = vadd.f32 %v1567_v59, %v1350_v2  ;;  %2974 = vrot.lane.b32.xlu1 %v15488_v63, %s14582_s5  ;;  %v15654_v2 = vpop.f32.mrf.mxu0 }
 0x4a2   : > { %17927 = vst [vmem:[#allocation19_spill] sm:$0xff] %v15492_v24  ;;  %2897 = vrot.lane.b32.xlu0 %v15492_v24, %s14582_s5  ;;  %v15656_v51 = vpop.f32.mrf.mxu0 }
 0x4a3   : > { %17932 = vst [vmem:[#allocation24_spill] sm:$0xff] %v15656_v51 }
 0x4a4   : > { %4474 = vrot.lane.b32.xlu1 %v15434_v21, %s14585_s14  ;;  %v15658_v37 = vpop.f32.mrf.mxu0 }
 0x4a6   : > { %4396 = vrot.lane.b32.xlu0 %v15436_v9, %s14585_s14  ;;  %v15660_v5 = vpop.f32.mrf.mxu0 }
 0x4a8   : > { %4394 = vrot.lane.b32.xlu1 %v15436_v9, %s14586_s20  ;;  %v1897_v22 = vpop.permute.xlu1 %1896  ;;  %v15662_v26 = vpop.f32.mrf.mxu0 }
 0x4aa   : > { %4552 = vrot.lane.b32.xlu0 %v15444_v11, %s14585_s14  ;;  %v1819_v43 = vpop.permute.xlu0 %1818  ;;  %v15664_v4 = vpop.f32.mrf.mxu0 }
 0x4ab   : > { %13351 = vmatpush3.xpose.msk.msra.mxu1 %vm1820_vm6, %v1819_v43 }
 0x4ac   : > { %4472 = vrot.lane.b32.xlu1 %v15434_v21, %s14586_s20  ;;  %13355 = vmatprep.subr.mxu1 %v17825_v1  ;;  %v15666_v31 = vpop.f32.mrf.mxu0 }
 0x4ae   : > { %4550 = vrot.lane.b32.xlu0 %v15444_v11, %s14586_s20  ;;  %13353 = vmatmul.mubr.msk.f32.vlgmr.msra.gmra.mxu1 %vm1820_vm6, %v15436_v9  ;;  %v15668_v12 = vpop.f32.mrf.mxu0 }
 0x4af   : > { %13356 = vmatpush3.xpose.msk.msra.mxu1 %vm1820_vm6, %v1897_v22  ;;  %13357 = vmatprep.mubr.msk.f32.mxu1 %vm14584_vm5, %v17825_v1 }
 0x4b0   : > { %4630 = vrot.lane.b32.xlu1 %v15442_v14, %s14585_s14  ;;  %13365 = vmatprep.subr.mxu1 %v17825_v1  ;;  %v15670_v15 = vpop.f32.mrf.mxu0 }
 0x4b2   : > { %4708 = vrot.lane.b32.xlu0 %v15452_v41, %s14585_s14  ;;  %13358 = vmatmul.mubr.msk.f32.vlgmr.msra.gmra.mxu1 %vm1820_vm6, %v15434_v21  ;;  %v15672_v50 = vpop.f32.mrf.mxu0 }
 0x4b3   : > { %13367 = vmatprep.mubr.msk.f32.mxu1 %vm14584_vm5, %v17825_v1 }
 0x4b4   : > { %4628 = vrot.lane.b32.xlu1 %v15442_v14, %s14586_s20  ;;  %v15674_v53 = vpop.f32.mrf.mxu0 }
 0x4b6   : > { %4706 = vrot.lane.b32.xlu0 %v15452_v41, %s14586_s20  ;;  %v15676_v19 = vpop.f32.mrf.mxu0 }
 0x4b7   : > { %17933 = vst [vmem:[#allocation25_spill] sm:$0xff] %v15676_v19 }
 0x4b8   : > { %4786 = vrot.lane.b32.xlu1 %v15450_v42, %s14585_s14  ;;  %v15678_v57 = vpop.f32.mrf.mxu0 }
 0x4b9   : > { %17934 = vst [vmem:[#allocation26_spill] sm:$0xff] %v15678_v57 }
 0x4ba   : > { %4864 = vrot.lane.b32.xlu0 %v15460_v13, %s14585_s14 }
 0x4bc   : > { %4784 = vrot.lane.b32.xlu1 %v15450_v42, %s14586_s20 }
 0x4c0   : > { %4942 = vrot.lane.b32.xlu1 %v15458_v16, %s14585_s14 }
 0x4e7   : > { %v2051_v29 = vpop.permute.xlu1 %2050 }
 0x4e8   : > { %13366 = vmatpush3.xpose.msk.msra.mxu1 %vm1820_vm6, %v2051_v29 }
 0x4e9   : > { %v1974_v55 = vpop.permute.xlu0 %1973  ;;  %13375 = vmatprep.subr.mxu1 %v17825_v1 }
 0x4ea   : > { %13361 = vmatpush3.xpose.msk.msra.mxu0 %vm1820_vm6, %v1974_v55 }
 0x4eb   : > { %13368 = vmatmul.mubr.msk.f32.vlgmr.msra.gmra.mxu1 %vm1820_vm6, %v15442_v14  ;;  %13370 = vmatprep.subr.mxu0 %v17825_v1 }
 0x4ec   : > { %13377 = vmatprep.mubr.msk.f32.mxu1 %vm14584_vm5, %v17825_v1 }
 0x4ed   : > { %13363 = vmatmul.mubr.msk.f32.vlgmr.msra.gmra.mxu0 %vm1820_vm6, %v15444_v11 }
 0x4ee   : > { %13372 = vmatprep.mubr.msk.f32.mxu0 %vm14584_vm5, %v17825_v1 }
 0x4ef   : > { %v2205_v32 = vpop.permute.xlu1 %2204 }
 0x4f0   : > { %13376 = vmatpush3.xpose.msk.msra.mxu1 %vm1820_vm6, %v2205_v32 }
 0x4f1   : > { %v2128_v23 = vpop.permute.xlu0 %2127  ;;  %13385 = vmatprep.subr.mxu1 %v17825_v1 }
 0x4f2   : > { %13371 = vmatpush3.xpose.msk.msra.mxu0 %vm1820_vm6, %v2128_v23  ;;  %v15695_v23 = vld [vmem:[%s15634_s29 + $0x5] ss:$0 sm:$0xff] }
 0x4f3   : > { %13378 = vmatmul.mubr.msk.f32.vlgmr.msra.gmra.mxu1 %vm1820_vm6, %v15450_v42  ;;  %13380 = vmatprep.subr.mxu0 %v17825_v1  ;;  %17937 = vst [vmem:[#allocation29_spill] sm:$0xff] %v15695_v23 }
 0x4f4   : > { %13387 = vmatprep.mubr.msk.f32.mxu1 %vm14584_vm5, %v17825_v1 }
 0x4f5   : > { %13373 = vmatmul.mubr.msk.f32.vlgmr.msra.gmra.mxu0 %vm1820_vm6, %v15452_v41 }
 0x4f6   : > { %13382 = vmatprep.mubr.msk.f32.mxu0 %vm14584_vm5, %v17825_v1 }
 0x4f7   : > { %v2359_v0 = vpop.permute.xlu1 %2358 }
 0x4f8   : > { %13386 = vmatpush3.xpose.msk.msra.mxu1 %vm1820_vm6, %v2359_v0 }
 0x4f9   : > { %v2282_v30 = vpop.permute.xlu0 %2281  ;;  %13395 = vmatprep.subr.mxu1 %v17825_v1 }
 0x4fa   : > { %13381 = vmatpush3.xpose.msk.msra.mxu0 %vm1820_vm6, %v2282_v30  ;;  %v15698_v30 = vld [vmem:[%s15634_s29 + $0x4] ss:$0 sm:$0xff] }
 0x4fb   : > { %13388 = vmatmul.mubr.msk.f32.vlgmr.msra.gmra.mxu1 %vm1820_vm6, %v15458_v16  ;;  %13390 = vmatprep.subr.mxu0 %v17825_v1  ;;  %17938 = vst [vmem:[#allocation30_spill] sm:$0xff] %v15698_v30 }
 0x4fc   : > { %13397 = vmatprep.mubr.msk.f32.mxu1 %vm14584_vm5, %v17825_v1 }
 0x4fd   : > { %13383 = vmatmul.mubr.msk.f32.vlgmr.msra.gmra.mxu0 %vm1820_vm6, %v15460_v13 }
 0x4fe   : > { %13392 = vmatprep.mubr.msk.f32.mxu0 %vm14584_vm5, %v17825_v1 }
 0x4ff   : > { %v2513_v58 = vpop.permute.xlu1 %2512 }
 0x500   : > { %13396 = vmatpush3.xpose.msk.msra.mxu1 %vm1820_vm6, %v2513_v58 }
 0x501   : > { %v2436_v25 = vpop.permute.xlu0 %2435  ;;  %13405 = vmatprep.subr.mxu1 %v17825_v1 }
 0x502   : > { %13391 = vmatpush3.xpose.msk.msra.mxu0 %vm1820_vm6, %v2436_v25 }
 0x503   : > { %13398 = vmatmul.mubr.msk.f32.vlgmr.msra.gmra.mxu1 %vm1820_vm6, %v15466_v27  ;;  %13400 = vmatprep.subr.mxu0 %v17825_v1 }
 0x504   : > { %13407 = vmatprep.mubr.msk.f32.mxu1 %vm14584_vm5, %v17825_v1 }
 0x505   : > { %13393 = vmatmul.mubr.msk.f32.vlgmr.msra.gmra.mxu0 %vm1820_vm6, %v15468_v6 }
 0x506   : > { %13402 = vmatprep.mubr.msk.f32.mxu0 %vm14584_vm5, %v17825_v1 }
 0x507   : > { %v2667_v44 = vpop.permute.xlu1 %2666 }
 0x508   : > { %13406 = vmatpush3.xpose.msk.msra.mxu1 %vm1820_vm6, %v2667_v44 }
 0x509   : > { %v2590_v8 = vpop.permute.xlu0 %2589  ;;  %13415 = vmatprep.subr.mxu1 %v17825_v1 }
 0x50a   : > { %13401 = vmatpush3.xpose.msk.msra.mxu0 %vm1820_vm6, %v2590_v8 }
 0x50b   : > { %13408 = vmatmul.mubr.msk.f32.vlgmr.msra.gmra.mxu1 %vm1820_vm6, %v15474_v20  ;;  %13410 = vmatprep.subr.mxu0 %v17825_v1 }
 0x50c   : > { %13417 = vmatprep.mubr.msk.f32.mxu1 %vm14584_vm5, %v17825_v1 }
 0x50d   : > { %13403 = vmatmul.mubr.msk.f32.vlgmr.msra.gmra.mxu0 %vm1820_vm6, %v15476_v10 }
 0x50e   : > { %v2821_v60 = vpop.permute.xlu1 %2820  ;;  %13412 = vmatprep.mubr.msk.f32.mxu0 %vm14584_vm5, %v17825_v1 }
 0x50f   : > { %13416 = vmatpush3.xpose.msk.msra.mxu1 %vm1820_vm6, %v2821_v60 }
 0x510   : > { %v2744_v34 = vpop.permute.xlu0 %2743  ;;  %13425 = vmatprep.subr.mxu1 %v17825_v1 }
 0x511   : > { %13411 = vmatpush3.xpose.msk.msra.mxu0 %vm1820_vm6, %v2744_v34 }
 0x512   : > { %v2975_v35 = vpop.permute.xlu1 %2974  ;;  %13418 = vmatmul.mubr.msk.f32.vlgmr.msra.gmra.mxu1 %vm1820_vm6, %v15482_v39  ;;  %13420 = vmatprep.subr.mxu0 %v17825_v1 }
 0x513   : > { %13426 = vmatpush3.xpose.msk.msra.mxu1 %vm1820_vm6, %v2975_v35  ;;  %13427 = vmatprep.mubr.msk.f32.mxu1 %vm14584_vm5, %v17825_v1 }
 0x514   : > { %13413 = vmatmul.mubr.msk.f32.vlgmr.msra.gmra.mxu0 %vm1820_vm6, %v15484_v3  ;;  %v2898_v40 = vpop.permute.xlu0 %2897  ;;  %13435 = vmatprep.subr.mxu1 %v17825_v1 }
 0x515   : > { %13421 = vmatpush3.xpose.msk.msra.mxu0 %vm1820_vm6, %v2898_v40  ;;  %13422 = vmatprep.mubr.msk.f32.mxu0 %vm14584_vm5, %v17825_v1 }
 0x516   : > { %13428 = vmatmul.mubr.msk.f32.vlgmr.msra.gmra.mxu1 %vm1820_vm6, %v15488_v63  ;;  %13430 = vmatprep.subr.mxu0 %v17825_v1  ;;  %v15763_v62 = vpop.permute.xlu1 %4474 }
 0x517   : > { %13436 = vmatpush3.msra.mxu1 %v15607_v36  ;;  %13437 = vmatprep.mubr.msk.f32.mxu1 %vm14584_vm5, %v17825_v1 }
 0x518   : > { %13423 = vmatmul.mubr.msk.f32.vlgmr.msra.gmra.mxu0 %vm1820_vm6, %v15492_v24  ;;  %13445 = vmatprep.subr.mxu1 %v17825_v1 }
 0x519   : > { %13431 = vmatpush3.msra.mxu0 %v15621_v46  ;;  %13432 = vmatprep.mubr.msk.f32.mxu0 %vm14584_vm5, %v17825_v1 }
 0x51a   : > { %13440 = vmatprep.subr.mxu0 %v17825_v1  ;;  %v15761_v1 = vld [vmem:[%s15634_s29 + $0xd] ss:$0 sm:$0xff] }
 0x51b   : > { %17945 = vst [vmem:[#allocation37_spill] sm:$0xff] %v15761_v1 }
 0x56e   : > { %v1891_v54 = vpop.f32.mrf.mxu1 }
 0x56f   : > { %v15640_v61 = vadd.f32 %v15637_v48, %v1891_v54  ;;  %v15713_v54 = vld [vmem:[%s15634_s29 + $0x7] ss:$0 sm:$0xff] }
 0x570   : > { %v13354_v28 = vpop.f32.mrf.mxu1  ;;  %17939 = vst [vmem:[#allocation31_spill] sm:$0xff] %v15713_v54 }
 0x571   : > { %v3050_v49 = vsel %vm1820_vm6, %v15640_v61, -inf }
 0x572   : > { %3051 = vmax.xlane.f32.xlu0 %v3050_v49  ;;  %v1968_v56 = vpop.f32.mrf.mxu1  ;;  %v15716_v49 = vld [vmem:[%s15634_s29 + $0x6] ss:$0 sm:$0xff] }
 0x573   : > { %v15648_v47 = vadd.f32 %v15643_v45, %v1968_v56  ;;  %17940 = vst [vmem:[#allocation32_spill] sm:$0xff] %v15716_v49 }
 0x574   : > { %v13359_v18 = vpop.f32.mrf.mxu1 }
 0x575   : > { %v3053_v38 = vsel %vm1820_vm6, %v15648_v47, -inf }
 0x576   : > { %3054 = vmax.xlane.f32.xlu1 %v3053_v38 }
 0x5ab   : > { %v2122_v7 = vpop.f32.mrf.mxu1 }
 0x5ac   : > { %v15690_v55 = vadd.f32 %v15684_v33, %v2122_v7 }
 0x5ad   : > { %v2045_v59 = vpop.f32.mrf.mxu0  ;;  %v13369_v43 = vpop.f32.mrf.mxu1 }
 0x5ae   : > { %v15687_v22 = vadd.f32 %v15681_v17, %v2045_v59  ;;  %v3059_v25 = vsel %vm1820_vm6, %v15690_v55, -inf }
 0x5af   : > { %v13364_v29 = vpop.f32.mrf.mxu0 }
 0x5b0   : > { %v3056_v32 = vsel %vm1820_vm6, %v15687_v22, -inf }
 0x5b1   : > { %3057 = vmax.xlane.f32.xlu0 %v3056_v32  ;;  %v15729_v32 = vld [vmem:[%s15634_s29 + $0x9] ss:$0 sm:$0xff] }
 0x5b2   : > { %17941 = vst [vmem:[#allocation33_spill] sm:$0xff] %v15729_v32 }
 0x5b3   : > { %v2276_v0 = vpop.f32.mrf.mxu1 }
 0x5b4   : > { %v15701_v58 = vadd.f32 %v15695_v23, %v2276_v0 }
 0x5b5   : > { %v13379_v44 = vpop.f32.mrf.mxu1  ;;  %3060 = vmax.xlane.f32.xlu0 %v3059_v25  ;;  %v2199_v8 = vpop.f32.mrf.mxu0  ;;  %v15732_v25 = vld [vmem:[%s15634_s29 + $0x8] ss:$0 sm:$0xff] }
 0x5b6   : > { %v15706_v60 = vadd.f32 %v15698_v30, %v2199_v8  ;;  %v3065_v34 = vsel %vm1820_vm6, %v15701_v58, -inf  ;;  %17942 = vst [vmem:[#allocation34_spill] sm:$0xff] %v15732_v25 }
 0x5b7   : > { %3066 = vmax.xlane.f32.xlu1 %v3065_v34  ;;  %v13374_v35 = vpop.f32.mrf.mxu0 }
 0x5b8   : > { %v3062_v40 = vsel %vm1820_vm6, %v15706_v60, -inf }
 0x5b9   : > { %3063 = vmax.xlane.f32.xlu0 %v3062_v40 }
 0x5bb   : > { %v2430_v28 = vpop.f32.mrf.mxu1 }
 0x5bc   : > { %v15719_v56 = vadd.f32 %v15713_v54, %v2430_v28  ;;  %v15777_v54 = vld [vmem:[%s15634_s29 + $0xe] ss:$0 sm:$0xff] }
 0x5bd   : > { %v2353_v18 = vpop.f32.mrf.mxu0  ;;  %v13389_v38 = vpop.f32.mrf.mxu1  ;;  %17947 = vst [vmem:[#allocation39_spill] sm:$0xff] %v15777_v54 }
 0x5be   : > { %v15722_v7 = vadd.f32 %v15716_v49, %v2353_v18  ;;  %v3071_v59 = vsel %vm1820_vm6, %v15719_v56, -inf  ;;  %v15745_v38 = vld [vmem:[%s15634_s29 + $0xb] ss:$0 sm:$0xff] }
 0x5bf   : > { %3072 = vmax.xlane.f32.xlu1 %v3071_v59  ;;  %v13384_v43 = vpop.f32.mrf.mxu0  ;;  %17943 = vst [vmem:[#allocation35_spill] sm:$0xff] %v15745_v38 }
 0x5c0   : > { %v3068_v29 = vsel %vm1820_vm6, %v15722_v7, -inf  ;;  %v15748_v43 = vld [vmem:[%s15634_s29 + $0xa] ss:$0 sm:$0xff] }
 0x5c1   : > { %3069 = vmax.xlane.f32.xlu0 %v3068_v29  ;;  %17944 = vst [vmem:[#allocation36_spill] sm:$0xff] %v15748_v43 }
 0x5c3   : > { %v2584_v0 = vpop.f32.mrf.mxu1 }
 0x5c4   : > { %v15735_v44 = vadd.f32 %v15729_v32, %v2584_v0 }
 0x5c5   : > { %v2507_v8 = vpop.f32.mrf.mxu0  ;;  %v13399_v34 = vpop.f32.mrf.mxu1 }
 0x5c6   : > { %v15738_v35 = vadd.f32 %v15732_v25, %v2507_v8  ;;  %v3077_v40 = vsel %vm1820_vm6, %v15735_v44, -inf }
 0x5c7   : > { %3078 = vmax.xlane.f32.xlu1 %v3077_v40  ;;  %v13394_v28 = vpop.f32.mrf.mxu0 }
 0x5c8   : > { %v3074_v18 = vsel %vm1820_vm6, %v15738_v35, -inf }
 0x5c9   : > { %3075 = vmax.xlane.f32.xlu0 %v3074_v18 }
 0x5cb   : > { %v2738_v59 = vpop.f32.mrf.mxu1 }
 0x5cc   : > { %v15751_v29 = vadd.f32 %v15745_v38, %v2738_v59  ;;  %v15766_v38 = vld [vmem:[%s15634_s29 + $0xc] ss:$0 sm:$0xff] }
 0x5cd   : > { %v2661_v0 = vpop.f32.mrf.mxu0  ;;  %v13409_v8 = vpop.f32.mrf.mxu1  ;;  %17946 = vst [vmem:[#allocation38_spill] sm:$0xff] %v15766_v38 }
 0x5ce   : > { %v15754_v34 = vadd.f32 %v15748_v43, %v2661_v0  ;;  %v3083_v40 = vsel %vm1820_vm6, %v15751_v29, -inf }
 0x5cf   : > { %3084 = vmax.xlane.f32.xlu1 %v3083_v40  ;;  %v13404_v28 = vpop.f32.mrf.mxu0 }
 0x5d0   : > { %v3080_v18 = vsel %vm1820_vm6, %v15754_v34, -inf }
 0x5d1   : > { %3081 = vmax.xlane.f32.xlu0 %v3080_v18  ;;  %v15779_v18 = vpop.permute.xlu1 %4394 }
 0x5d2   : > { %v2892_v59 = vpop.f32.mrf.mxu1 }
 0x5d3   : > { %v15769_v0 = vadd.f32 %v15761_v1, %v2892_v59 }
 0x5d4   : > { %v2815_v8 = vpop.f32.mrf.mxu0  ;;  %v13419_v43 = vpop.f32.mrf.mxu1 }
 0x5d5   : > { %v15772_v40 = vadd.f32 %v15766_v38, %v2815_v8  ;;  %v3089_v28 = vsel %vm1820_vm6, %v15769_v0, -inf  ;;  %v15783_v43 = vpop.permute.xlu0 %4396 }
 0x5d6   : > { %3090 = vmax.xlane.f32.xlu1 %v3089_v28  ;;  %v13414_v32 = vpop.f32.mrf.mxu0  ;;  %v3046_v25 = vpop.f32.mrf.mxu1 }
 0x5d7   : > { %v3086_v49 = vsel %vm1820_vm6, %v15772_v40, -inf  ;;  %v15790_v28 = vpop.permute.xlu1 %4472 }
 0x5d8   : > { %v13429_v59 = vpop.f32.mrf.mxu1  ;;  %3087 = vmax.xlane.f32.xlu0 %v3086_v49  ;;  %v2969_v1 = vpop.f32.mrf.mxu0  ;;  %17948 = vst [vmem:[#allocation40_spill] sm:$0xff] %v15790_v28  ;;  %v15827_v28 = vld [vmem:[%s15634_s29 + $0xf] ss:$0 sm:$0xff] }
 0x5d9   : > { %v15786_v8 = vadd.f32 %v15777_v54, %v2969_v1  ;;  %v15792_v23 = vpop.permute.xlu0 %4552 }
 0x5da   : > { %v13424_v38 = vpop.f32.mrf.mxu0 }
 0x5db   : > { %v3092_v32 = vsel %vm1820_vm6, %v15786_v8, -inf  ;;  %v15794_v30 = vpop.permute.xlu1 %4630 }
 0x5dc   : > { %3093 = vmax.xlane.f32.xlu0 %v3092_v32  ;;  %17949 = vst [vmem:[#allocation41_spill] sm:$0xff] %v15794_v30 }
 0x5dd   : > { %v15796_v33 = vpop.permute.xlu0 %4550 }
 0x5df   : > { %v15800_v49 = vpop.permute.xlu1 %4628 }
 0x5e0   : > { %17950 = vst [vmem:[#allocation42_spill] sm:$0xff] %v15800_v49 }
 0x5e1   : > { %v15802_v1 = vpop.permute.xlu0 %4708 }
 0x5e3   : > { %v15804_v38 = vpop.permute.xlu1 %4786 }
 0x5e4   : > { %17951 = vst [vmem:[#allocation43_spill] sm:$0xff] %v15804_v38 }
 0x5e5   : > { %v15806_v59 = vpop.permute.xlu0 %4706 }
 0x5e7   : > { %4940 = vrot.lane.b32.xlu1 %v15458_v16, %s14586_s20  ;;  %v15810_v32 = vpop.permute.xlu1 %4784 }
 0x5e8   : > { %17952 = vst [vmem:[#allocation44_spill] sm:$0xff] %v15810_v32 }
 0x5e9   : > { %v15814_v54 = vpop.permute.xlu0 %4864 }
 0x5eb   : > { %v15818_v45 = vpop.permute.xlu1 %4942 }
 0x5f2   : > { %4862 = vrot.lane.b32.xlu0 %v15460_v13, %s14586_s20 }
 0x5f6   : > { %5020 = vrot.lane.b32.xlu0 %v15468_v6, %s14585_s14 }
 0x5fa   : > { %5018 = vrot.lane.b32.xlu0 %v15468_v6, %s14586_s20  ;;  %v15830_v6 = vadd.f32 %v15827_v28, %v3046_v25 }
 0x5fb   : > { %v3052_v17 = vpop.xlane.xlu0 %3051 }
 0x5fc   : > { %v3098_v48 = vsub.f32 %v15640_v61, %v3052_v17 }
 0x5fe   : > { %v3114_v38 = vmul.f32 1.442695, %v3098_v48  ;;  %5176 = vrot.lane.b32.xlu0 %v15476_v10, %s14585_s14  ;;  %v3095_v48 = vsel %vm1820_vm6, %v15830_v6, -inf }
 0x5ff   : > { %v3055_v49 = vpop.xlane.xlu1 %3054 }
 0x600   : > { %14131 = vpow2.f32 %v3114_v38  ;;  %v3099_v32 = vsub.f32 %v15648_v47, %v3055_v49  ;;  %v17954_v47 = vmov 0.0  }
 0x602   : > { %v3116_v30 = vmul.f32 1.442695, %v3099_v32  ;;  %5174 = vrot.lane.b32.xlu0 %v15476_v10, %s14586_s20 }
 0x604   : > { %14133 = vpow2.f32 %v3116_v30 }
 0x606   : > { %5332 = vrot.lane.b32.xlu0 %v15484_v3, %s14585_s14 }
 0x60a   : > { %5330 = vrot.lane.b32.xlu0 %v15484_v3, %s14586_s20 }
 0x60b   : > { %3096 = vmax.xlane.f32.xlu1 %v3095_v48 }
 0x60d   : > { %v15838_v61 = vpop.eup %14131 }
 0x60e   : > { %17953 = vst [vmem:[#allocation45_spill] sm:$0xff] %v15838_v61  ;;  %5488 = vrot.lane.b32.xlu0 %v15492_v24, %s14585_s14  ;;  %13433 = vmatmul.mubr.msk.f32.vlgmr.msra.gmra.mxu0 %vm1820_vm6, %v15838_v61 }
 0x60f   : > { %13441 = vmatpush3.msra.mxu0 %v15654_v2  ;;  %13442 = vmatprep.mubr.msk.f32.mxu0 %vm14584_vm5, %v17954_v47 }
 0x610   : > { %13450 = vmatprep.subr.mxu0 %v17954_v47 }
 0x611   : > { %v15848_v17 = vpop.eup %14133 }
 0x612   : > { %17955 = vst [vmem:[#allocation46_spill] sm:$0xff] %v15848_v17  ;;  %13438 = vmatmul.mubr.msk.f32.vlgmr.msra.gmra.mxu1 %vm1820_vm6, %v15848_v17  ;;  %5486 = vrot.lane.b32.xlu0 %v15492_v24, %s14586_s20 }
 0x613   : > { %13446 = vmatpush3.msra.mxu1 %v15652_v52  ;;  %13447 = vmatprep.mubr.msk.f32.mxu1 %vm14584_vm5, %v17954_v47 }
 0x614   : > { %13455 = vmatprep.subr.mxu1 %v17954_v47 }
 0x616   : > { %5787 = vrot.lane.b32.xlu0 %v15621_v46, %s14582_s5 }
 0x61a   : > { %6095 = vrot.lane.b32.xlu0 %v15658_v37, %s14582_s5 }
 0x61c   : > { %5098 = vrot.lane.b32.xlu1 %v15466_v27, %s14585_s14 }
 0x61e   : > { %6249 = vrot.lane.b32.xlu0 %v15662_v26, %s14582_s5 }
 0x620   : > { %5096 = vrot.lane.b32.xlu1 %v15466_v27, %s14586_s20 }
 0x622   : > { %6403 = vrot.lane.b32.xlu0 %v15666_v31, %s14582_s5 }
 0x624   : > { %5254 = vrot.lane.b32.xlu1 %v15474_v20, %s14585_s14 }
 0x626   : > { %6557 = vrot.lane.b32.xlu0 %v15670_v15, %s14582_s5 }
 0x628   : > { %5252 = vrot.lane.b32.xlu1 %v15474_v20, %s14586_s20 }
 0x62a   : > { %6711 = vrot.lane.b32.xlu0 %v15674_v53, %s14582_s5 }
 0x62c   : > { %5410 = vrot.lane.b32.xlu1 %v15482_v39, %s14585_s14 }
 0x62e   : > { %6865 = vrot.lane.b32.xlu0 %v15678_v57, %s14582_s5 }
 0x630   : > { %5408 = vrot.lane.b32.xlu1 %v15482_v39, %s14586_s20 }
 0x632   : > { %7068 = vrot.lane.b32.xlu0 %v15436_v9, %s14587_s30 }
 0x634   : > { %5566 = vrot.lane.b32.xlu1 %v15488_v63, %s14585_s14 }
 0x636   : > { %7066 = vrot.lane.b32.xlu0 %v15436_v9, %s14588_s13 }
 0x638   : > { %5564 = vrot.lane.b32.xlu1 %v15488_v63, %s14586_s20 }
 0x63a   : > { %7224 = vrot.lane.b32.xlu0 %v15444_v11, %s14587_s30  ;;  %v3058_v30 = vpop.xlane.xlu0 %3057 }
 0x63b   : > { %v3100_v25 = vsub.f32 %v15687_v22, %v3058_v30 }
 0x63c   : > { %5864 = vrot.lane.b32.xlu1 %v15607_v36, %s14582_s5 }
 0x63d   : > { %v3118_v49 = vmul.f32 1.442695, %v3100_v25 }
 0x63e   : > { %7222 = vrot.lane.b32.xlu0 %v15444_v11, %s14588_s13  ;;  %v3061_v38 = vpop.xlane.xlu0 %3060 }
 0x63f   : > { %14135 = vpow2.f32 %v3118_v49  ;;  %v3101_v32 = vsub.f32 %v15690_v55, %v3061_v38 }
 0x640   : > { %v3067_v48 = vpop.xlane.xlu1 %3066  ;;  %5941 = vrot.lane.b32.xlu1 %v15654_v2, %s14582_s5 }
 0x641   : > { %v3120_v61 = vmul.f32 1.442695, %v3101_v32  ;;  %v3103_v17 = vsub.f32 %v15701_v58, %v3067_v48 }
 0x642   : > { %7380 = vrot.lane.b32.xlu0 %v15452_v41, %s14587_s30  ;;  %v3064_v22 = vpop.xlane.xlu0 %3063 }
 0x643   : > { %14137 = vpow2.f32 %v3120_v61  ;;  %v3124_v30 = vmul.f32 1.442695, %v3103_v17  ;;  %v3102_v25 = vsub.f32 %v15706_v60, %v3064_v22 }
 0x644   : > { %6018 = vrot.lane.b32.xlu1 %v15652_v52, %s14582_s5 }
 0x645   : > { %v3122_v49 = vmul.f32 1.442695, %v3102_v25  ;;  %14139 = vpow2.f32 %v3124_v30 }
 0x646   : > { %7378 = vrot.lane.b32.xlu0 %v15452_v41, %s14588_s13 }
 0x647   : > { %14141 = vpow2.f32 %v3122_v49 }
 0x648   : > { %v3073_v55 = vpop.xlane.xlu1 %3072  ;;  %6172 = vrot.lane.b32.xlu1 %v15656_v51, %s14582_s5 }
 0x649   : > { %v3105_v58 = vsub.f32 %v15719_v56, %v3073_v55 }
 0x64a   : > { %7536 = vrot.lane.b32.xlu0 %v15460_v13, %s14587_s30  ;;  %v3070_v61 = vpop.xlane.xlu0 %3069 }
 0x64b   : > { %v3128_v60 = vmul.f32 1.442695, %v3105_v58  ;;  %v3104_v17 = vsub.f32 %v15722_v7, %v3070_v61 }
 0x64c   : > { %v15916_v38 = vpop.eup %14135  ;;  %6326 = vrot.lane.b32.xlu1 %v15660_v5, %s14582_s5 }
 0x64d   : > { %17956 = vst [vmem:[#allocation47_spill] sm:$0xff] %v15916_v38  ;;  %14143 = vpow2.f32 %v3128_v60  ;;  %v3126_v32 = vmul.f32 1.442695, %v3104_v17  ;;  %13443 = vmatmul.mubr.msk.f32.vlgmr.msra.gmra.mxu0 %vm1820_vm6, %v15916_v38 }
 0x64e   : > { %13451 = vmatpush3.msra.mxu0 %v15658_v37  ;;  %13452 = vmatprep.mubr.msk.f32.mxu0 %vm14584_vm5, %v17954_v47 }
 0x64f   : > { %14145 = vpow2.f32 %v3126_v32  ;;  %13460 = vmatprep.subr.mxu0 %v17954_v47 }
 0x650   : > { %v15926_v56 = vpop.eup %14137  ;;  %v3079_v7 = vpop.xlane.xlu1 %3078  ;;  %6480 = vrot.lane.b32.xlu1 %v15664_v4, %s14582_s5 }
 0x651   : > { %17957 = vst [vmem:[#allocation48_spill] sm:$0xff] %v15926_v56  ;;  %v3107_v48 = vsub.f32 %v15735_v44, %v3079_v7  ;;  %13448 = vmatmul.mubr.msk.f32.vlgmr.msra.gmra.mxu1 %vm1820_vm6, %v15926_v56 }
 0x652   : > { %13456 = vmatpush3.msra.mxu1 %v15656_v51  ;;  %v3076_v22 = vpop.xlane.xlu0 %3075  ;;  %13457 = vmatprep.mubr.msk.f32.mxu1 %vm14584_vm5, %v17954_v47  ;;  %v15936_v30 = vpop.eup %14139 }
 0x653   : > { %17958 = vst [vmem:[#allocation49_spill] sm:$0xff] %v15936_v30  ;;  %v3132_v25 = vmul.f32 1.442695, %v3107_v48  ;;  %v3106_v49 = vsub.f32 %v15738_v35, %v3076_v22  ;;  %13465 = vmatprep.subr.mxu1 %v17954_v47 }
 0x654   : > { %v15940_v55 = vpop.eup %14141  ;;  %6634 = vrot.lane.b32.xlu1 %v15668_v12, %s14582_s5 }
 0x655   : > { %17959 = vst [vmem:[#allocation50_spill] sm:$0xff] %v15940_v55  ;;  %14147 = vpow2.f32 %v3132_v25  ;;  %v3130_v44 = vmul.f32 1.442695, %v3106_v49  ;;  %13453 = vmatmul.mubr.msk.f32.vlgmr.msra.gmra.mxu0 %vm1820_vm6, %v15940_v55  ;;  %13458 = vmatmul.mubr.msk.f32.vlgmr.msra.gmra.mxu1 %vm1820_vm6, %v15936_v30 }
 0x656   : > { %13461 = vmatpush3.msra.mxu0 %v15662_v26  ;;  %13466 = vmatpush3.msra.mxu1 %v15660_v5 }
 0x657   : > { %14149 = vpow2.f32 %v3130_v44  ;;  %13467 = vmatprep.mubr.msk.f32.mxu1 %vm14584_vm5, %v17954_v47  ;;  %13475 = vmatprep.subr.mxu1 %v17954_v47 }
 0x658   : > { %v3085_v35 = vpop.xlane.xlu1 %3084  ;;  %6788 = vrot.lane.b32.xlu1 %v15672_v50, %s14582_s5  ;;  %13462 = vmatprep.mubr.msk.f32.mxu0 %vm14584_vm5, %v17954_v47 }
 0x659   : > { %v3109_v58 = vsub.f32 %v15751_v29, %v3085_v35  ;;  %13470 = vmatprep.subr.mxu0 %v17954_v47 }
 0x65a   : > { %v15959_v61 = vpop.eup %14143  ;;  %v3082_v60 = vpop.xlane.xlu0 %3081 }
 0x65b   : > { %17960 = vst [vmem:[#allocation51_spill] sm:$0xff] %v15959_v61  ;;  %v3136_v17 = vmul.f32 1.442695, %v3109_v58  ;;  %v3108_v32 = vsub.f32 %v15754_v34, %v3082_v60  ;;  %13468 = vmatmul.mubr.msk.f32.vlgmr.msra.gmra.mxu1 %vm1820_vm6, %v15959_v61 }
 0x65c   : > { %v15964_v7 = vpop.eup %14145  ;;  %13476 = vmatpush3.msra.mxu1 %v15664_v4  ;;  %6942 = vrot.lane.b32.xlu1 %v15676_v19, %s14582_s5  ;;  %s14592_s5 = smov [#allocation8]  }
 0x65d   : > { %17961 = vst [vmem:[#allocation52_spill] sm:$0xff] %v15964_v7  ;;  %14151 = vpow2.f32 %v3136_v17  ;;  %v3134_v29 = vmul.f32 1.442695, %v3108_v32  ;;  %13463 = vmatmul.mubr.msk.f32.vlgmr.msra.gmra.mxu0 %vm1820_vm6, %v15964_v7  ;;  %13477 = vmatprep.mubr.msk.f32.mxu1 %vm14584_vm5, %v17954_v47  ;;  %s14506_s14 = sshll.u32 %s14592_s5, 4  ;;  %s14507_s14 = int_to_ptr.vmem [resolvable:$false] %s14506_s14 }
 0x65e   : > { %13471 = vmatpush3.msra.mxu0 %v15666_v31  ;;  %13485 = vmatprep.subr.mxu1 %v17954_v47  ;;  %s14508_s20 = scalar_lea.vmem %s14507_s14, 4096  ;;  %p14509_p5 = scmp.lt.s32.totalorder %s17765_s23, %s14507_s14 }
 0x65f   : > { %14153 = vpow2.f32 %v3134_v29  ;;  %v3091_v34 = vpop.xlane.xlu1 %3090  ;;  %13472 = vmatprep.mubr.msk.f32.mxu0 %vm14584_vm5, %v17954_v47  ;;  %13480 = vmatprep.subr.mxu0 %v17954_v47 }
 0x660   : > { %v3111_v48 = vsub.f32 %v15769_v0, %v3091_v34  ;;  %7146 = vrot.lane.b32.xlu1 %v15434_v21, %s14587_s30 }
 0x661   : > { %v3088_v22 = vpop.xlane.xlu0 %3087 }
 0x662   : > { %v15981_v25 = vpop.eup %14147  ;;  %v3140_v49 = vmul.f32 1.442695, %v3111_v48  ;;  %v3110_v44 = vsub.f32 %v15772_v40, %v3088_v22 }
 0x663   : > { %17962 = vst [vmem:[#allocation53_spill] sm:$0xff] %v15981_v25  ;;  %13478 = vmatmul.mubr.msk.f32.vlgmr.msra.gmra.mxu1 %vm1820_vm6, %v15981_v25 }
 0x664   : > { %v15986_v35 = vpop.eup %14149  ;;  %14155 = vpow2.f32 %v3140_v49  ;;  %v3138_v58 = vmul.f32 1.442695, %v3110_v44  ;;  %13486 = vmatpush3.msra.mxu1 %v15668_v12  ;;  %7144 = vrot.lane.b32.xlu1 %v15434_v21, %s14588_s13 }
 0x665   : > { %17963 = vst [vmem:[#allocation54_spill] sm:$0xff] %v15986_v35  ;;  %13473 = vmatmul.mubr.msk.f32.vlgmr.msra.gmra.mxu0 %vm1820_vm6, %v15986_v35  ;;  %v3094_v0 = vpop.xlane.xlu0 %3093  ;;  %13487 = vmatprep.mubr.msk.f32.mxu1 %vm14584_vm5, %v17954_v47 }
 0x666   : > { %14157 = vpow2.f32 %v3138_v58  ;;  %13481 = vmatpush3.msra.mxu0 %v15670_v15  ;;  %v3112_v40 = vsub.f32 %v15786_v8, %v3094_v0  ;;  %13495 = vmatprep.subr.mxu1 %v17954_v47 }
 0x667   : > { %13482 = vmatprep.mubr.msk.f32.mxu0 %vm14584_vm5, %v17954_v47  ;;  %13490 = vmatprep.subr.mxu0 %v17954_v47 }
 0x668   : > { %v3142_v60 = vmul.f32 1.442695, %v3112_v40  ;;  %7302 = vrot.lane.b32.xlu1 %v15442_v14, %s14587_s30 }
 0x669   : > { %v4863_v17 = vpop.permute.xlu0 %4862 }
 0x66a   : > { %v16003_v32 = vpop.eup %14151  ;;  %14159 = vpow2.f32 %v3142_v60 }
 0x66b   : > { %17964 = vst [vmem:[#allocation55_spill] sm:$0xff] %v16003_v32  ;;  %13488 = vmatmul.mubr.msk.f32.vlgmr.msra.gmra.mxu1 %vm1820_vm6, %v16003_v32 }
 0x66c   : > { %v16007_v29 = vpop.eup %14153  ;;  %13496 = vmatpush3.msra.mxu1 %v15672_v50  ;;  %7300 = vrot.lane.b32.xlu1 %v15442_v14, %s14588_s13 }
 0x66d   : > { %17965 = vst [vmem:[#allocation56_spill] sm:$0xff] %v16007_v29  ;;  %13483 = vmatmul.mubr.msk.f32.vlgmr.msra.gmra.mxu0 %vm1820_vm6, %v16007_v29  ;;  %v5021_v8 = vpop.permute.xlu0 %5020  ;;  %13497 = vmatprep.mubr.msk.f32.mxu1 %vm14584_vm5, %v17954_v47 }
 0x66e   : > { %13491 = vmatpush3.msra.mxu0 %v15674_v53  ;;  %13505 = vmatprep.subr.mxu1 %v17954_v47 }
 0x66f   : > { %13492 = vmatprep.mubr.msk.f32.mxu0 %vm14584_vm5, %v17954_v47  ;;  %13500 = vmatprep.subr.mxu0 %v17954_v47 }
 0x670   : > { %7458 = vrot.lane.b32.xlu1 %v15450_v42, %s14587_s30 }
 0x671   : > { %v16023_v34 = vpop.eup %14155  ;;  %v5019_v48 = vpop.permute.xlu0 %5018 }
 0x672   : > { %17966 = vst [vmem:[#allocation57_spill] sm:$0xff] %v16023_v34  ;;  %13498 = vmatmul.mubr.msk.f32.vlgmr.msra.gmra.mxu1 %vm1820_vm6, %v16023_v34 }
 0x673   : > { %v16027_v22 = vpop.eup %14157  ;;  %13506 = vmatpush3.msra.mxu1 %v15676_v19  ;;  %13507 = vmatprep.mubr.msk.f32.mxu1 %vm14584_vm5, %v17954_v47 }
 0x674   : > { %17967 = vst [vmem:[#allocation58_spill] sm:$0xff] %v16027_v22  ;;  %7456 = vrot.lane.b32.xlu1 %v15450_v42, %s14588_s13  ;;  %13493 = vmatmul.mubr.msk.f32.vlgmr.msra.gmra.mxu0 %vm1820_vm6, %v16027_v22 }
 0x675   : > { %13501 = vmatpush3.msra.mxu0 %v15678_v57  ;;  %v5177_v49 = vpop.permute.xlu0 %5176  ;;  %13502 = vmatprep.mubr.msk.f32.mxu0 %vm14584_vm5, %v17954_v47 }
 0x676   : > { %13510 = vmatprep.subr.mxu0 %v17954_v47  ;;  %13515 = vmatprep.subr.mxu1 %v17954_v47 }
 0x677   : > { %v16041_v44 = vpop.eup %14159 }
 0x678   : > { %17968 = vst [vmem:[#allocation59_spill] sm:$0xff] %v16041_v44  ;;  %7614 = vrot.lane.b32.xlu1 %v15458_v16, %s14587_s30  ;;  %13503 = vmatmul.mubr.msk.f32.vlgmr.msra.gmra.mxu0 %vm1820_vm6, %v16041_v44 }
 0x679   : > { %13511 = vmatpush3.xpose.msk.msra.mxu0 %vm1820_vm6, %v15783_v43  ;;  %13512 = vmatprep.mubr.msk.f32.mxu0 %vm14584_vm5, %v17954_v47  ;;  %v5175_v58 = vpop.permute.xlu0 %5174 }
 0x67a   : > { %13520 = vmatprep.subr.mxu0 %v17954_v47 }
 0x67c   : > { %13513 = vmatmul.mubr.msk.f32.vlgmr.msra.gmra.mxu0 %vm1820_vm6, %v15779_v18 }
 0x67d   : > { %13521 = vmatpush3.xpose.msk.msra.mxu0 %vm1820_vm6, %v15792_v23  ;;  %13522 = vmatprep.mubr.msk.f32.mxu0 %vm14584_vm5, %v17954_v47  ;;  %v5333_v0 = vpop.permute.xlu0 %5332 }
 0x67e   : > { %13530 = vmatprep.subr.mxu0 %v17954_v47 }
 0x680   : > { %13523 = vmatmul.mubr.msk.f32.vlgmr.msra.gmra.mxu0 %vm1820_vm6, %v15796_v33 }
 0x681   : > { %13531 = vmatpush3.xpose.msk.msra.mxu0 %vm1820_vm6, %v15802_v1  ;;  %13532 = vmatprep.mubr.msk.f32.mxu0 %vm14584_vm5, %v17954_v47  ;;  %v5331_v23 = vpop.permute.xlu0 %5330 }
 0x682   : > { %13540 = vmatprep.subr.mxu0 %v17954_v47 }
 0x684   : > { %13533 = vmatmul.mubr.msk.f32.vlgmr.msra.gmra.mxu0 %vm1820_vm6, %v15806_v59 }
 0x685   : > { %13541 = vmatpush3.xpose.msk.msra.mxu0 %vm1820_vm6, %v15814_v54  ;;  %13542 = vmatprep.mubr.msk.f32.mxu0 %vm14584_vm5, %v17954_v47  ;;  %v5489_v33 = vpop.permute.xlu0 %5488  ;;  %v4941_v54 = vpop.permute.xlu1 %4940 }
 0x686   : > { %13550 = vmatprep.subr.mxu0 %v17954_v47 }
 0x688   : > { %13543 = vmatmul.mubr.msk.f32.vlgmr.msra.gmra.mxu0 %vm1820_vm6, %v4863_v17 }
 0x689   : > { %13551 = vmatpush3.xpose.msk.msra.mxu0 %vm1820_vm6, %v5021_v8  ;;  %13552 = vmatprep.mubr.msk.f32.mxu0 %vm14584_vm5, %v17954_v47  ;;  %v5487_v18 = vpop.permute.xlu0 %5486 }
 0x68a   : > { %13560 = vmatprep.subr.mxu0 %v17954_v47 }
 0x68c   : > { %13553 = vmatmul.mubr.msk.f32.vlgmr.msra.gmra.mxu0 %vm1820_vm6, %v5019_v48 }
 0x68d   : > { %13561 = vmatpush3.xpose.msk.msra.mxu0 %vm1820_vm6, %v5177_v49  ;;  %13562 = vmatprep.mubr.msk.f32.mxu0 %vm14584_vm5, %v17954_v47  ;;  %v5788_v40 = vpop.permute.xlu0 %5787  ;;  %v17970_v49 = vld [vmem:[#allocation40_spill] sm:$0xff] }
 0x68e   : > { %13570 = vmatprep.subr.mxu0 %v17954_v47 }
 0x690   : > { %13563 = vmatmul.mubr.msk.f32.vlgmr.msra.gmra.mxu0 %vm1820_vm6, %v5175_v58  ;;  %v17971_v58 = vld [vmem:[#allocation41_spill] sm:$0xff] }
 0x691   : > { %13571 = vmatpush3.xpose.msk.msra.mxu0 %vm1820_vm6, %v5333_v0  ;;  %13572 = vmatprep.mubr.msk.f32.mxu0 %vm14584_vm5, %v17954_v47 }
 0x692   : > { %13580 = vmatprep.subr.mxu0 %v17954_v47 }
 0x694   : > { %v3097_v43 = vpop.xlane.xlu1 %3096  ;;  %13573 = vmatmul.mubr.msk.f32.vlgmr.msra.gmra.mxu0 %vm1820_vm6, %v5331_v23  ;;  %v17972_v23 = vld [vmem:[#allocation42_spill] sm:$0xff] }
 0x695   : > { %v3113_v1 = vsub.f32 %v15830_v6, %v3097_v43  ;;  %13581 = vmatpush3.xpose.msk.msra.mxu0 %vm1820_vm6, %v5489_v33  ;;  %13582 = vmatprep.mubr.msk.f32.mxu0 %vm14584_vm5, %v17954_v47  ;;  %v17974_v33 = vld [vmem:[#allocation44_spill] sm:$0xff] }
 0x696   : > { %13590 = vmatprep.subr.mxu0 %v17954_v47 }
 0x697   : > { %v3144_v59 = vmul.f32 1.442695, %v3113_v1 }
 0x698   : > { %v5099_v60 = vpop.permute.xlu1 %5098  ;;  %13583 = vmatmul.mubr.msk.f32.vlgmr.msra.gmra.mxu0 %vm1820_vm6, %v5487_v18 }
 0x699   : > { %14161 = vpow2.f32 %v3144_v59  ;;  %13591 = vmatpush3.msra.mxu0 %v5788_v40  ;;  %13592 = vmatprep.mubr.msk.f32.mxu0 %vm14584_vm5, %v17954_v47 }
 0x69a   : > { %13600 = vmatprep.subr.mxu0 %v17954_v47 }
 0x69c   : > { %v5097_v6 = vpop.permute.xlu1 %5096 }
 0x6a0   : > { %v5255_v17 = vpop.permute.xlu1 %5254 }
 0x6a4   : > { %v5253_v48 = vpop.permute.xlu1 %5252 }
 0x6a6   : > { %v16098_v8 = vpop.eup %14161 }
 0x6a7   : > { %17969 = vst [vmem:[#allocation60_spill] sm:$0xff] %v16098_v8  ;;  %13508 = vmatmul.mubr.msk.f32.vlgmr.msra.gmra.mxu1 %vm1820_vm6, %v16098_v8 }
 0x6a8   : > { %13516 = vmatpush3.xpose.msk.msra.mxu1 %vm1820_vm6, %v15763_v62  ;;  %13517 = vmatprep.mubr.msk.f32.mxu1 %vm14584_vm5, %v17954_v47  ;;  %v5411_v0 = vpop.permute.xlu1 %5410  ;;  %v17973_v62 = vld [vmem:[#allocation43_spill] sm:$0xff] }
 0x6a9   : > { %13525 = vmatprep.subr.mxu1 %v17954_v47 }
 0x6ab   : > { %13518 = vmatmul.mubr.msk.f32.vlgmr.msra.gmra.mxu1 %vm1820_vm6, %v17970_v49 }
 0x6ac   : > { %13526 = vmatpush3.xpose.msk.msra.mxu1 %vm1820_vm6, %v17971_v58  ;;  %13527 = vmatprep.mubr.msk.f32.mxu1 %vm14584_vm5, %v17954_v47  ;;  %v5409_v18 = vpop.permute.xlu1 %5408 }
 0x6ad   : > { %13535 = vmatprep.subr.mxu1 %v17954_v47 }
 0x6af   : > { %13528 = vmatmul.mubr.msk.f32.vlgmr.msra.gmra.mxu1 %vm1820_vm6, %v17972_v23 }
 0x6b0   : > { %13536 = vmatpush3.xpose.msk.msra.mxu1 %vm1820_vm6, %v17973_v62  ;;  %13537 = vmatprep.mubr.msk.f32.mxu1 %vm14584_vm5, %v17954_v47  ;;  %v5567_v43 = vpop.permute.xlu1 %5566 }
 0x6b1   : > { %13545 = vmatprep.subr.mxu1 %v17954_v47 }
 0x6b3   : > { %13538 = vmatmul.mubr.msk.f32.vlgmr.msra.gmra.mxu1 %vm1820_vm6, %v17974_v33 }
 0x6b4   : > { %13546 = vmatpush3.xpose.msk.msra.mxu1 %vm1820_vm6, %v15818_v45  ;;  %13547 = vmatprep.mubr.msk.f32.mxu1 %vm14584_vm5, %v17954_v47  ;;  %v5565_v45 = vpop.permute.xlu1 %5564 }
 0x6b5   : > { %13555 = vmatprep.subr.mxu1 %v17954_v47 }
 0x6b7   : > { %13548 = vmatmul.mubr.msk.f32.vlgmr.msra.gmra.mxu1 %vm1820_vm6, %v4941_v54 }
 0x6b8   : > { %13556 = vmatpush3.xpose.msk.msra.mxu1 %vm1820_vm6, %v5099_v60  ;;  %13557 = vmatprep.mubr.msk.f32.mxu1 %vm14584_vm5, %v17954_v47  ;;  %v5865_v54 = vpop.permute.xlu1 %5864 }
 0x6b9   : > { %13565 = vmatprep.subr.mxu1 %v17954_v47 }
 0x6bb   : > { %13558 = vmatmul.mubr.msk.f32.vlgmr.msra.gmra.mxu1 %vm1820_vm6, %v5097_v6 }
 0x6bc   : > { %13566 = vmatpush3.xpose.msk.msra.mxu1 %vm1820_vm6, %v5255_v17  ;;  %13567 = vmatprep.mubr.msk.f32.mxu1 %vm14584_vm5, %v17954_v47 }
 0x6bd   : > { %13575 = vmatprep.subr.mxu1 %v17954_v47 }
 0x6bf   : > { %13568 = vmatmul.mubr.msk.f32.vlgmr.msra.gmra.mxu1 %vm1820_vm6, %v5253_v48 }
 0x6c0   : > { %13576 = vmatpush3.xpose.msk.msra.mxu1 %vm1820_vm6, %v5411_v0  ;;  %13577 = vmatprep.mubr.msk.f32.mxu1 %vm14584_vm5, %v17954_v47 }
 0x6c1   : > { %13585 = vmatprep.subr.mxu1 %v17954_v47 }
 0x6c3   : > { %13578 = vmatmul.mubr.msk.f32.vlgmr.msra.gmra.mxu1 %vm1820_vm6, %v5409_v18 }
 0x6c4   : > { %13586 = vmatpush3.xpose.msk.msra.mxu1 %vm1820_vm6, %v5567_v43  ;;  %13587 = vmatprep.mubr.msk.f32.mxu1 %vm14584_vm5, %v17954_v47 }
 0x6c5   : > { %13595 = vmatprep.subr.mxu1 %v17954_v47 }
 0x6c7   : > { %13588 = vmatmul.mubr.msk.f32.vlgmr.msra.gmra.mxu1 %vm1820_vm6, %v5565_v45 }
 0x6c8   : > { %13596 = vmatpush3.msra.mxu1 %v5865_v54  ;;  %13597 = vmatprep.mubr.msk.f32.mxu1 %vm14584_vm5, %v17954_v47 }
 0x6c9   : > { %13605 = vmatprep.subr.mxu1 %v17954_v47 }
 0x6ce   : > { %v16152_v1 = vpop.f32.mrf.mxu0 }
 0x6cf   : > { %17975 = vst [vmem:[#allocation40_spill] sm:$0xff] %v16152_v1  ;;  %v17990_v1 = vld [vmem:[#allocation21_spill] sm:$0xff] }
 0x6d0   : > { %v13434_v59 = vpop.f32.mrf.mxu0 }
 0x6d2   : > { %v16154_v40 = vpop.f32.mrf.mxu1 }
 0x6d3   : > { %17976 = vst [vmem:[#allocation41_spill] sm:$0xff] %v16154_v40 }
 0x6d4   : > { %v13439_v60 = vpop.f32.mrf.mxu1 }
 0x70d   : > { %v16156_v6 = vpop.f32.mrf.mxu0 }
 0x70e   : > { %17977 = vst [vmem:[#allocation42_spill] sm:$0xff] %v16156_v6 }
 0x70f   : > { %v13444_v17 = vpop.f32.mrf.mxu0 }
 0x711   : > { %v16158_v48 = vpop.f32.mrf.mxu1 }
 0x712   : > { %17978 = vst [vmem:[#allocation43_spill] sm:$0xff] %v16158_v48 }
 0x713   : > { %v13449_v49 = vpop.f32.mrf.mxu1 }
 0x715   : > { %v16160_v58 = vpop.f32.mrf.mxu0  ;;  %v16162_v0 = vpop.f32.mrf.mxu1 }
 0x716   : > { %17979 = vst [vmem:[#allocation44_spill] sm:$0xff] %v16160_v58  ;;  %17980 = vst [vmem:[#allocation61_spill] sm:$0xff] %v16162_v0 }
 0x717   : > { %v13454_v23 = vpop.f32.mrf.mxu0  ;;  %v13459_v62 = vpop.f32.mrf.mxu1 }
 0x71b   : > { %v16164_v33 = vpop.f32.mrf.mxu1 }
 0x71c   : > { %17981 = vst [vmem:[#allocation62_spill] sm:$0xff] %v16164_v33 }
 0x71d   : > { %v16166_v18 = vpop.f32.mrf.mxu0  ;;  %v13469_v43 = vpop.f32.mrf.mxu1 }
 0x71e   : > { %17982 = vst [vmem:[#allocation63_spill] sm:$0xff] %v16166_v18 }
 0x71f   : > { %v13464_v45 = vpop.f32.mrf.mxu0 }
 0x723   : > { %v16168_v54 = vpop.f32.mrf.mxu1 }
 0x724   : > { %17983 = vst [vmem:[#allocation64_spill] sm:$0xff] %v16168_v54 }
 0x725   : > { %v16170_v59 = vpop.f32.mrf.mxu0  ;;  %v13479_v60 = vpop.f32.mrf.mxu1 }
 0x726   : > { %17984 = vst [vmem:[#allocation65_spill] sm:$0xff] %v16170_v59 }
 0x727   : > { %v13474_v17 = vpop.f32.mrf.mxu0 }
 0x72b   : > { %v16172_v48 = vpop.f32.mrf.mxu1 }
 0x72c   : > { %17985 = vst [vmem:[#allocation66_spill] sm:$0xff] %v16172_v48 }
 0x72d   : > { %v16174_v49 = vpop.f32.mrf.mxu0  ;;  %v13489_v40 = vpop.f32.mrf.mxu1 }
 0x72e   : > { %17986 = vst [vmem:[#allocation67_spill] sm:$0xff] %v16174_v49 }
 0x72f   : > { %v13484_v0 = vpop.f32.mrf.mxu0 }
 0x730   : > { %v17991_v0 = vld [vmem:[#allocation27_spill] sm:$0xff] }
 0x732   : > { %v16176_v23 = vpop.f32.mrf.mxu1 }
 0x733   : > { %17987 = vst [vmem:[#allocation68_spill] sm:$0xff] %v16176_v23 }
 0x734   : > { %v16178_v62 = vpop.f32.mrf.mxu0  ;;  %v13499_v33 = vpop.f32.mrf.mxu1 }
 0x735   : > { %17988 = vst [vmem:[#allocation69_spill] sm:$0xff] %v16178_v62 }
 0x736   : > { %v13494_v6 = vpop.f32.mrf.mxu0 }
 0x738   : > { %v16180_v43 = vpop.f32.mrf.mxu0 }
 0x739   : > { %17989 = vst [vmem:[#allocation70_spill] sm:$0xff] %v16180_v43 }
 0x73a   : > { %v13504_v45 = vpop.f32.mrf.mxu0 }
 0x73c   : > { %v4468_v54 = vpop.f32.mrf.mxu0 }
 0x73d   : > { %v16183_v59 = vadd.f32 %v17990_v1, %v4468_v54 }
 0x73e   : > { %v13514_v60 = vpop.f32.mrf.mxu0 }
 0x73f   : > { %v5642_v17 = vsel %vm1820_vm6, %v16183_v59, -inf }
 0x740   : > { %5643 = vmax.xlane.f32.xlu0 %v5642_v17  ;;  %v4624_v40 = vpop.f32.mrf.mxu0 }
 0x741   : > { %v16188_v49 = vadd.f32 %v17991_v0, %v4624_v40  ;;  %v17993_v0 = vld [vmem:[#allocation22_spill] sm:$0xff] }
 0x742   : > { %v13524_v23 = vpop.f32.mrf.mxu0 }
 0x743   : > { %v5648_v6 = vsel %vm1820_vm6, %v16188_v49, -inf }
 0x744   : > { %5649 = vmax.xlane.f32.xlu0 %v5648_v6  ;;  %v4780_v33 = vpop.f32.mrf.mxu0 }
 0x746   : > { %v13534_v45 = vpop.f32.mrf.mxu0 }
 0x748   : > { %v4936_v43 = vpop.f32.mrf.mxu0 }
 0x74a   : > { %v13544_v62 = vpop.f32.mrf.mxu0 }
 0x74c   : > { %v5092_v1 = vpop.f32.mrf.mxu0 }
 0x74e   : > { %v13554_v54 = vpop.f32.mrf.mxu0 }
 0x74f   : > { %v17994_v54 = vld [vmem:[#allocation28_spill] sm:$0xff] }
 0x750   : > { %v5248_v60 = vpop.f32.mrf.mxu0 }
 0x752   : > { %v13564_v18 = vpop.f32.mrf.mxu0 }
 0x754   : > { %v5404_v48 = vpop.f32.mrf.mxu0 }
 0x756   : > { %v13574_v58 = vpop.f32.mrf.mxu0 }
 0x757   : > { %v17995_v58 = vld [vmem:[#allocation30_spill] sm:$0xff] }
 0x758   : > { %v5560_v17 = vpop.f32.mrf.mxu0  ;;  %v16203_v35 = vadd.f32 %v17995_v58, %v4780_v33 }
 0x75a   : > { %v13584_v44 = vpop.f32.mrf.mxu0 }
 0x767   : > { %v16192_v22 = vpop.f32.mrf.mxu1 }
 0x768   : > { %17992 = vst [vmem:[#allocation21_spill] sm:$0xff] %v16192_v22  ;;  %v17997_v22 = vld [vmem:[#allocation32_spill] sm:$0xff] }
 0x769   : > { %v13509_v40 = vpop.f32.mrf.mxu1  ;;  %v16211_v34 = vadd.f32 %v17997_v22, %v4936_v43 }
 0x76b   : > { %v4546_v23 = vpop.f32.mrf.mxu1  ;;  %v5660_v43 = vsel %vm1820_vm6, %v16211_v34, -inf }
 0x76c   : > { %v16195_v29 = vadd.f32 %v17993_v0, %v4546_v23  ;;  %v17996_v23 = vld [vmem:[#allocation29_spill] sm:$0xff] }
 0x76d   : > { %v13519_v6 = vpop.f32.mrf.mxu1 }
 0x76e   : > { %v5645_v45 = vsel %vm1820_vm6, %v16195_v29, -inf }
 0x76f   : > { %5646 = vmax.xlane.f32.xlu1 %v5645_v45  ;;  %v4702_v62 = vpop.f32.mrf.mxu1 }
 0x770   : > { %v16200_v8 = vadd.f32 %v17994_v54, %v4702_v62  ;;  %v5654_v62 = vsel %vm1820_vm6, %v16203_v35, -inf  ;;  %v17998_v54 = vld [vmem:[#allocation31_spill] sm:$0xff] }
 0x771   : > { %v13529_v18 = vpop.f32.mrf.mxu1 }
 0x772   : > { %v5651_v44 = vsel %vm1820_vm6, %v16200_v8, -inf }
 0x773   : > { %v4858_v40 = vpop.f32.mrf.mxu1  ;;  %5652 = vmax.xlane.f32.xlu0 %v5651_v44  ;;  %v17999_v44 = vld [vmem:[#allocation34_spill] sm:$0xff] }
 0x774   : > { %v16208_v0 = vadd.f32 %v17996_v23, %v4858_v40  ;;  %v16221_v40 = vadd.f32 %v17999_v44, %v5092_v1 }
 0x775   : > { %v13539_v6 = vpop.f32.mrf.mxu1 }
 0x776   : > { %v5657_v45 = vsel %vm1820_vm6, %v16208_v0, -inf  ;;  %v18000_v6 = vld [vmem:[#allocation33_spill] sm:$0xff]  ;;  %v5666_v44 = vsel %vm1820_vm6, %v16221_v40, -inf }
 0x777   : > { %5658 = vmax.xlane.f32.xlu1 %v5657_v45  ;;  %v5014_v33 = vpop.f32.mrf.mxu1  ;;  %5655 = vmax.xlane.f32.xlu0 %v5654_v62  ;;  %v16230_v62 = vpop.permute.xlu0 %6095 }
 0x778   : > { %v16218_v18 = vadd.f32 %v17998_v54, %v5014_v33  ;;  %v18001_v54 = vld [vmem:[#allocation36_spill] sm:$0xff] }
 0x779   : > { %v13549_v58 = vpop.f32.mrf.mxu1 }
 0x77a   : > { %v5663_v22 = vsel %vm1820_vm6, %v16218_v18, -inf  ;;  %v16233_v58 = vadd.f32 %v18001_v54, %v5248_v60 }
 0x77b   : > { %5664 = vmax.xlane.f32.xlu1 %v5663_v22  ;;  %v5170_v23 = vpop.f32.mrf.mxu1  ;;  %5661 = vmax.xlane.f32.xlu0 %v5660_v43  ;;  %v18002_v22 = vld [vmem:[#allocation35_spill] sm:$0xff]  ;;  %v16249_v54 = vpop.permute.xlu0 %6249 }
 0x77c   : > { %v16228_v45 = vadd.f32 %v18000_v6, %v5170_v23  ;;  %v18003_v6 = vld [vmem:[#allocation38_spill] sm:$0xff] }
 0x77d   : > { %v13559_v33 = vpop.f32.mrf.mxu1  ;;  %v16243_v32 = vadd.f32 %v18003_v6, %v5404_v48 }
 0x77e   : > { %v5669_v1 = vsel %vm1820_vm6, %v16228_v45, -inf  ;;  %v5672_v33 = vsel %vm1820_vm6, %v16233_v58, -inf }
 0x77f   : > { %5670 = vmax.xlane.f32.xlu1 %v5669_v1  ;;  %v5326_v7 = vpop.f32.mrf.mxu1  ;;  %5667 = vmax.xlane.f32.xlu0 %v5666_v44  ;;  %v18004_v1 = vld [vmem:[#allocation37_spill] sm:$0xff]  ;;  %v5678_v6 = vsel %vm1820_vm6, %v16243_v32, -inf  ;;  %v16261_v56 = vpop.permute.xlu0 %6403 }
 0x780   : > { %v16240_v43 = vadd.f32 %v18002_v22, %v5326_v7  ;;  %v18005_v22 = vld [vmem:[#allocation39_spill] sm:$0xff] }
 0x781   : > { %v13569_v23 = vpop.f32.mrf.mxu1 }
 0x782   : > { %v5675_v60 = vsel %vm1820_vm6, %v16240_v43, -inf  ;;  %v16255_v23 = vadd.f32 %v18005_v22, %v5560_v17 }
 0x783   : > { %5676 = vmax.xlane.f32.xlu1 %v5675_v60  ;;  %v5482_v55 = vpop.f32.mrf.mxu1  ;;  %5673 = vmax.xlane.f32.xlu0 %v5672_v33  ;;  %v16265_v33 = vpop.permute.xlu0 %6557 }
 0x784   : > { %v16252_v44 = vadd.f32 %v18004_v1, %v5482_v55  ;;  %v5684_v55 = vsel %vm1820_vm6, %v16255_v23, -inf }
 0x785   : > { %v13579_v7 = vpop.f32.mrf.mxu1 }
 0x786   : > { %v5681_v48 = vsel %vm1820_vm6, %v16252_v44, -inf  ;;  %v5942_v7 = vpop.permute.xlu1 %5941 }
 0x787   : > { %5682 = vmax.xlane.f32.xlu1 %v5681_v48  ;;  %v5638_v25 = vpop.f32.mrf.mxu1  ;;  %5679 = vmax.xlane.f32.xlu0 %v5678_v6  ;;  %v16267_v17 = vpop.permute.xlu0 %6711  ;;  %v18006_v48 = vld [vmem:[#allocation16_spill] sm:$0xff] }
 0x789   : > { %v13589_v60 = vpop.f32.mrf.mxu1 }
 0x78a   : > { %v16279_v6 = vpop.permute.xlu1 %6018 }
 0x78b   : > { %5685 = vmax.xlane.f32.xlu0 %v5684_v55  ;;  %v16271_v1 = vpop.permute.xlu0 %6865 }
 0x78e   : > { %v16285_v55 = vpop.permute.xlu1 %6172 }
 0x78f   : > { %v16273_v22 = vpop.permute.xlu0 %7068 }
 0x792   : > { %v16293_v38 = vpop.permute.xlu1 %6326 }
 0x793   : > { %v16281_v60 = vpop.permute.xlu0 %7066 }
 0x794   : > { %18007 = vst [vmem:[#allocation27_spill] sm:$0xff] %v16281_v60  ;;  %v16300_v60 = vadd.f32 %v15827_v28, %v5638_v25 }
 0x796   : > { %18010 = vst [vmem:[#allocation30_spill] sm:$0xff] %v16300_v60 }
 0x797   : > { %v16287_v61 = vpop.permute.xlu0 %7224 }
 0x798   : > { %7612 = vrot.lane.b32.xlu1 %v15458_v16, %s14588_s13  ;;  %18008 = vst [vmem:[#allocation22_spill] sm:$0xff] %v16287_v61 }
 0x79b   : > { %v16295_v30 = vpop.permute.xlu0 %7222 }
 0x79c   : > { %18009 = vst [vmem:[#allocation28_spill] sm:$0xff] %v16295_v30 }
 0x79f   : > { %v16304_v16 = vpop.permute.xlu0 %7380 }
 0x7a0   : > { %18011 = vst [vmem:[#allocation29_spill] sm:$0xff] %v16304_v16 }
 0x7a1   : > { %7534 = vrot.lane.b32.xlu0 %v15460_v13, %s14588_s13 }
 0x7a3   : > { %v16314_v61 = vpop.permute.xlu0 %7378 }
 0x7a4   : > { %18012 = vst [vmem:[#allocation32_spill] sm:$0xff] %v16314_v61 }
 0x7a5   : > { %7692 = vrot.lane.b32.xlu0 %v18006_v48, %s14587_s30 }
 0x7a7   : > { %v16320_v25 = vpop.permute.xlu0 %7536 }
 0x7a8   : > { %18013 = vst [vmem:[#allocation31_spill] sm:$0xff] %v16320_v25 }
 0x7a9   : > { %7690 = vrot.lane.b32.xlu0 %v18006_v48, %s14588_s13  ;;  %v16302_v48 = vpop.permute.xlu1 %6480 }
 0x7ad   : > { %7848 = vrot.lane.b32.xlu0 %v15476_v10, %s14587_s30  ;;  %v16312_v30 = vpop.permute.xlu1 %6634 }
 0x7b1   : > { %7846 = vrot.lane.b32.xlu0 %v15476_v10, %s14588_s13  ;;  %v5687_v10 = vsel %vm1820_vm6, %v16300_v60, -inf  ;;  %v16318_v28 = vpop.permute.xlu1 %6788 }
 0x7b5   : > { %8004 = vrot.lane.b32.xlu0 %v15484_v3, %s14587_s30 }
 0x7b9   : > { %8002 = vrot.lane.b32.xlu0 %v15484_v3, %s14588_s13  ;;  %v16326_v3 = vpop.permute.xlu1 %6942 }
 0x7bc   : > { %5688 = vmax.xlane.f32.xlu1 %v5687_v10 }
 0x7bd   : > { %8160 = vrot.lane.b32.xlu0 %v15492_v24, %s14587_s30 }
 0x7c1   : > { %8158 = vrot.lane.b32.xlu0 %v15492_v24, %s14588_s13 }
 0x7c5   : > { %8458 = vrot.lane.b32.xlu0 %v15621_v46, %s14589_s24  ;;  %v16334_v46 = vpop.permute.xlu1 %7146 }
 0x7c9   : > { %8762 = vrot.lane.b32.xlu0 %v15658_v37, %s14589_s24  ;;  %v5644_v10 = vpop.xlane.xlu0 %5643 }
 0x7ca   : > { %v5690_v60 = vsub.f32 %v16183_v59, %v5644_v10  ;;  %v16344_v59 = vpop.permute.xlu1 %7144 }
 0x7cc   : > { %v5706_v61 = vmul.f32 1.442695, %v5690_v60 }
 0x7cd   : > { %7770 = vrot.lane.b32.xlu1 %v15466_v27, %s14587_s30  ;;  %8914 = vrot.lane.b32.xlu0 %v15662_v26, %s14589_s24  ;;  %v5650_v24 = vpop.xlane.xlu0 %5649 }
 0x7ce   : > { %14163 = vpow2.f32 %v5706_v61  ;;  %v5692_v25 = vsub.f32 %v16188_v49, %v5650_v24  ;;  %v16352_v61 = vpop.permute.xlu1 %7302 }
 0x7d0   : > { %v5710_v16 = vmul.f32 1.442695, %v5692_v25 }
 0x7d1   : > { %7768 = vrot.lane.b32.xlu1 %v15466_v27, %s14588_s13  ;;  %9066 = vrot.lane.b32.xlu0 %v15666_v31, %s14589_s24 }
 0x7d2   : > { %14165 = vpow2.f32 %v5710_v16  ;;  %v16370_v49 = vpop.permute.xlu1 %7300 }
 0x7d5   : > { %7926 = vrot.lane.b32.xlu1 %v15474_v20, %s14587_s30  ;;  %9218 = vrot.lane.b32.xlu0 %v15670_v15, %s14589_s24 }
 0x7d9   : > { %7924 = vrot.lane.b32.xlu1 %v15474_v20, %s14588_s13  ;;  %9370 = vrot.lane.b32.xlu0 %v15674_v53, %s14589_s24 }
 0x7db   : > { %v16350_v24 = vpop.eup %14163 }
 0x7dc   : > { %18014 = vst [vmem:[#allocation34_spill] sm:$0xff] %v16350_v24  ;;  %13593 = vmatmul.mubr.msk.f32.vlgmr.msra.gmra.mxu0 %vm1820_vm6, %v16350_v24 }
 0x7dd   : > { %13601 = vmatpush3.msra.mxu0 %v5942_v7  ;;  %8082 = vrot.lane.b32.xlu1 %v15482_v39, %s14587_s30 }
 0x7de   : > { %9522 = vrot.lane.b32.xlu0 %v15678_v57, %s14589_s24  ;;  %13602 = vmatprep.mubr.msk.f32.mxu0 %vm14584_vm5, %v17954_v47 }
 0x7df   : > { %v16362_v16 = vpop.eup %14165  ;;  %13610 = vmatprep.subr.mxu0 %v17954_v47 }
 0x7e0   : > { %18015 = vst [vmem:[#allocation33_spill] sm:$0xff] %v16362_v16  ;;  %13603 = vmatmul.mubr.msk.f32.vlgmr.msra.gmra.mxu0 %vm1820_vm6, %v16362_v16 }
 0x7e1   : > { %13611 = vmatpush3.msra.mxu0 %v16230_v62  ;;  %8080 = vrot.lane.b32.xlu1 %v15482_v39, %s14588_s13  ;;  %v16381_v62 = vpop.permute.xlu1 %7458 }
 0x7e2   : > { %9724 = vrot.lane.b32.xlu0 %v15436_v9, %s14590_s26  ;;  %13612 = vmatprep.mubr.msk.f32.mxu0 %vm14584_vm5, %v17954_v47 }
 0x7e3   : > { %13620 = vmatprep.subr.mxu0 %v17954_v47 }
 0x7e5   : > { %8238 = vrot.lane.b32.xlu1 %v15488_v63, %s14587_s30  ;;  %v16389_v7 = vpop.permute.xlu1 %7456 }
 0x7e6   : > { %9722 = vrot.lane.b32.xlu0 %v15436_v9, %s14591_s8 }
 0x7e9   : > { %8236 = vrot.lane.b32.xlu1 %v15488_v63, %s14588_s13  ;;  %v16397_v9 = vpop.permute.xlu1 %7614 }
 0x7ea   : > { %9880 = vrot.lane.b32.xlu0 %v15444_v11, %s14590_s26 }
 0x7ed   : > { %8534 = vrot.lane.b32.xlu1 %v15607_v36, %s14589_s24 }
 0x7ee   : > { %9878 = vrot.lane.b32.xlu0 %v15444_v11, %s14591_s8 }
 0x7f1   : > { %8610 = vrot.lane.b32.xlu1 %v15654_v2, %s14589_s24 }
 0x7f2   : > { %10036 = vrot.lane.b32.xlu0 %v15452_v41, %s14590_s26 }
 0x7f5   : > { %8686 = vrot.lane.b32.xlu1 %v15652_v52, %s14589_s24 }
 0x7f6   : > { %10034 = vrot.lane.b32.xlu0 %v15452_v41, %s14591_s8 }
 0x7f8   : > { %v5647_v60 = vpop.xlane.xlu1 %5646 }
 0x7f9   : > { %v5691_v25 = vsub.f32 %v16195_v29, %v5647_v60  ;;  %8838 = vrot.lane.b32.xlu1 %v15656_v51, %s14589_s24 }
 0x7fa   : > { %10192 = vrot.lane.b32.xlu0 %v15460_v13, %s14590_s26 }
 0x7fb   : > { %v5708_v11 = vmul.f32 1.442695, %v5691_v25 }
 0x7fc   : > { %v5653_v10 = vpop.xlane.xlu0 %5652 }
 0x7fd   : > { %14167 = vpow2.f32 %v5708_v11  ;;  %v5693_v16 = vsub.f32 %v16200_v8, %v5653_v10  ;;  %8990 = vrot.lane.b32.xlu1 %v15660_v5, %s14589_s24 }
 0x7ff   : > { %v5712_v24 = vmul.f32 1.442695, %v5693_v16 }
 0x800   : > { %v5659_v57 = vpop.xlane.xlu1 %5658  ;;  %v5656_v41 = vpop.xlane.xlu0 %5655 }
 0x801   : > { %14169 = vpow2.f32 %v5712_v24  ;;  %v5695_v29 = vsub.f32 %v16208_v0, %v5659_v57  ;;  %v5694_v60 = vsub.f32 %v16203_v35, %v5656_v41  ;;  %9142 = vrot.lane.b32.xlu1 %v15664_v4, %s14589_s24 }
 0x803   : > { %v5716_v51 = vmul.f32 1.442695, %v5695_v29  ;;  %v5714_v25 = vmul.f32 1.442695, %v5694_v60 }
 0x804   : > { %v5665_v52 = vpop.xlane.xlu1 %5664  ;;  %v5662_v11 = vpop.xlane.xlu0 %5661 }
 0x805   : > { %14171 = vpow2.f32 %v5716_v51  ;;  %v5697_v8 = vsub.f32 %v16218_v18, %v5665_v52  ;;  %v5696_v10 = vsub.f32 %v16211_v34, %v5662_v11  ;;  %9294 = vrot.lane.b32.xlu1 %v15668_v12, %s14589_s24 }
 0x806   : > { %14173 = vpow2.f32 %v5714_v25 }
 0x807   : > { %v5720_v24 = vmul.f32 1.442695, %v5697_v8  ;;  %v5718_v57 = vmul.f32 1.442695, %v5696_v10 }
 0x808   : > { %v5671_v0 = vpop.xlane.xlu1 %5670  ;;  %v5668_v35 = vpop.xlane.xlu0 %5667 }
 0x809   : > { %14175 = vpow2.f32 %v5720_v24  ;;  %v5699_v16 = vsub.f32 %v16228_v45, %v5671_v0  ;;  %v5698_v41 = vsub.f32 %v16221_v40, %v5668_v35  ;;  %9446 = vrot.lane.b32.xlu1 %v15672_v50, %s14589_s24 }
 0x80a   : > { %v16423_v51 = vpop.eup %14167  ;;  %14177 = vpow2.f32 %v5718_v57 }
 0x80b   : > { %18016 = vst [vmem:[#allocation36_spill] sm:$0xff] %v16423_v51  ;;  %v5724_v52 = vmul.f32 1.442695, %v5699_v16  ;;  %v5722_v34 = vmul.f32 1.442695, %v5698_v41  ;;  %13598 = vmatmul.mubr.msk.f32.vlgmr.msra.gmra.mxu1 %vm1820_vm6, %v16423_v51  ;;  %v18031_v41 = vld [vmem:[#allocation22_spill] sm:$0xff] }
 0x80c   : > { %13606 = vmatpush3.msra.mxu1 %v16279_v6  ;;  %v5677_v18 = vpop.xlane.xlu1 %5676  ;;  %v5674_v29 = vpop.xlane.xlu0 %5673  ;;  %13607 = vmatprep.mubr.msk.f32.mxu1 %vm14584_vm5, %v17954_v47 }
 0x80d   : > { %14179 = vpow2.f32 %v5724_v52  ;;  %v5701_v40 = vsub.f32 %v16240_v43, %v5677_v18  ;;  %v5700_v45 = vsub.f32 %v16233_v58, %v5674_v29  ;;  %9598 = vrot.lane.b32.xlu1 %v15676_v19, %s14589_s24  ;;  %13615 = vmatprep.subr.mxu1 %v17954_v47  ;;  %v18032_v52 = vld [vmem:[#allocation28_spill] sm:$0xff]  ;;  %v18035_v29 = vld [vmem:[#allocation31_spill] sm:$0xff]  ;;  %v18067_v19 = vld [vmem:[#allocation18_spill] sm:$0xff] }
 0x80e   : > { %v16435_v60 = vpop.eup %14169  ;;  %14181 = vpow2.f32 %v5722_v34  ;;  %v18033_v34 = vld [vmem:[#allocation29_spill] sm:$0xff]  ;;  %v18034_v18 = vld [vmem:[#allocation32_spill] sm:$0xff] }
 0x80f   : > { %18017 = vst [vmem:[#allocation35_spill] sm:$0xff] %v16435_v60  ;;  %v5728_v25 = vmul.f32 1.442695, %v5701_v40  ;;  %v5726_v6 = vmul.f32 1.442695, %v5700_v45  ;;  %13608 = vmatmul.mubr.msk.f32.vlgmr.msra.gmra.mxu1 %vm1820_vm6, %v16435_v60  ;;  %v18066_v60 = vld [vmem:[#allocation17_spill] sm:$0xff] }
 0x810   : > { %13616 = vmatpush3.msra.mxu1 %v16285_v55  ;;  %v5683_v11 = vpop.xlane.xlu1 %5682  ;;  %v5680_v8 = vpop.xlane.xlu0 %5679  ;;  %13617 = vmatprep.mubr.msk.f32.mxu1 %vm14584_vm5, %v17954_v47 }
 0x811   : > { %14183 = vpow2.f32 %v5728_v25  ;;  %v5703_v58 = vsub.f32 %v16252_v44, %v5683_v11  ;;  %v5702_v43 = vsub.f32 %v16243_v32, %v5680_v8  ;;  %9802 = vrot.lane.b32.xlu1 %v15434_v21, %s14590_s26  ;;  %13625 = vmatprep.subr.mxu1 %v17954_v47  ;;  %v18036_v8 = vld [vmem:[#allocation30_spill] sm:$0xff] }
 0x812   : > { %v16447_v10 = vpop.eup %14171  ;;  %14185 = vpow2.f32 %v5726_v6 }
 0x813   : > { %18018 = vst [vmem:[#allocation38_spill] sm:$0xff] %v16447_v10  ;;  %v16449_v24 = vpop.eup %14173  ;;  %v5732_v55 = vmul.f32 1.442695, %v5703_v58  ;;  %v5730_v57 = vmul.f32 1.442695, %v5702_v43  ;;  %13618 = vmatmul.mubr.msk.f32.vlgmr.msra.gmra.mxu1 %vm1820_vm6, %v16447_v10 }
 0x814   : > { %18019 = vst [vmem:[#allocation37_spill] sm:$0xff] %v16449_v24  ;;  %13613 = vmatmul.mubr.msk.f32.vlgmr.msra.gmra.mxu0 %vm1820_vm6, %v16449_v24  ;;  %13626 = vmatpush3.msra.mxu1 %v16293_v38  ;;  %v5686_v32 = vpop.xlane.xlu0 %5685  ;;  %v7613_v25 = vpop.permute.xlu1 %7612 }
 0x815   : > { %14187 = vpow2.f32 %v5732_v55  ;;  %13621 = vmatpush3.msra.mxu0 %v16249_v54  ;;  %v5704_v44 = vsub.f32 %v16255_v23, %v5686_v32  ;;  %9800 = vrot.lane.b32.xlu1 %v15434_v21, %s14591_s8 }
 0x816   : > { %v16460_v0 = vpop.eup %14175  ;;  %14189 = vpow2.f32 %v5730_v57  ;;  %13622 = vmatprep.mubr.msk.f32.mxu0 %vm14584_vm5, %v17954_v47  ;;  %13627 = vmatprep.mubr.msk.f32.mxu1 %vm14584_vm5, %v17954_v47 }
 0x817   : > { %18020 = vst [vmem:[#allocation39_spill] sm:$0xff] %v16460_v0  ;;  %v16466_v35 = vpop.eup %14177  ;;  %v5734_v38 = vmul.f32 1.442695, %v5704_v44  ;;  %13630 = vmatprep.subr.mxu0 %v17954_v47  ;;  %13635 = vmatprep.subr.mxu1 %v17954_v47 }
 0x818   : > { %18021 = vst [vmem:[#allocation71_spill] sm:$0xff] %v16466_v35  ;;  %13623 = vmatmul.mubr.msk.f32.vlgmr.msra.gmra.mxu0 %vm1820_vm6, %v16466_v35  ;;  %13628 = vmatmul.mubr.msk.f32.vlgmr.msra.gmra.mxu1 %vm1820_vm6, %v16460_v0  ;;  %v16474_v21 = vpop.permute.xlu0 %7534 }
 0x819   : > { %14191 = vpow2.f32 %v5734_v38  ;;  %13631 = vmatpush3.msra.mxu0 %v16261_v56  ;;  %13636 = vmatpush3.msra.mxu1 %v16302_v48 }
 0x81a   : > { %v16478_v54 = vpop.eup %14179  ;;  %9958 = vrot.lane.b32.xlu1 %v15442_v14, %s14590_s26  ;;  %13632 = vmatprep.mubr.msk.f32.mxu0 %vm14584_vm5, %v17954_v47 }
 0x81b   : > { %18022 = vst [vmem:[#allocation72_spill] sm:$0xff] %v16478_v54  ;;  %v16484_v23 = vpop.eup %14181  ;;  %13637 = vmatprep.mubr.msk.f32.mxu1 %vm14584_vm5, %v17954_v47  ;;  %13640 = vmatprep.subr.mxu0 %v17954_v47 }
 0x81c   : > { %18023 = vst [vmem:[#allocation73_spill] sm:$0xff] %v16484_v23  ;;  %13645 = vmatprep.subr.mxu1 %v17954_v47  ;;  %13633 = vmatmul.mubr.msk.f32.vlgmr.msra.gmra.mxu0 %vm1820_vm6, %v16484_v23  ;;  %v7693_v56 = vpop.permute.xlu0 %7692  ;;  %v16793_v23 = vld [vmem:[%s15634_s29 + $0xd] ss:$0 sm:$0xff] }
 0x81d   : > { %13638 = vmatmul.mubr.msk.f32.vlgmr.msra.gmra.mxu1 %vm1820_vm6, %v16478_v54  ;;  %13641 = vmatpush3.msra.mxu0 %v16265_v33  ;;  %18063 = vst [vmem:[#allocation97_spill] sm:$0xff] %v16793_v23 }
 0x81e   : > { %v16495_v48 = vpop.eup %14183  ;;  %13646 = vmatpush3.msra.mxu1 %v16312_v30  ;;  %9956 = vrot.lane.b32.xlu1 %v15442_v14, %s14591_s8 }
 0x81f   : > { %18024 = vst [vmem:[#allocation74_spill] sm:$0xff] %v16495_v48  ;;  %v16500_v16 = vpop.eup %14185  ;;  %13642 = vmatprep.mubr.msk.f32.mxu0 %vm14584_vm5, %v17954_v47  ;;  %13647 = vmatprep.mubr.msk.f32.mxu1 %vm14584_vm5, %v17954_v47 }
 0x820   : > { %18025 = vst [vmem:[#allocation75_spill] sm:$0xff] %v16500_v16  ;;  %13650 = vmatprep.subr.mxu0 %v17954_v47  ;;  %13655 = vmatprep.subr.mxu1 %v17954_v47  ;;  %v7691_v33 = vpop.permute.xlu0 %7690 }
 0x821   : > { %13643 = vmatmul.mubr.msk.f32.vlgmr.msra.gmra.mxu0 %vm1820_vm6, %v16500_v16  ;;  %13648 = vmatmul.mubr.msk.f32.vlgmr.msra.gmra.mxu1 %vm1820_vm6, %v16495_v48 }
 0x822   : > { %v16512_v14 = vpop.eup %14187  ;;  %13651 = vmatpush3.msra.mxu0 %v16267_v17  ;;  %13656 = vmatpush3.msra.mxu1 %v16318_v28 }
 0x823   : > { %18026 = vst [vmem:[#allocation76_spill] sm:$0xff] %v16512_v14  ;;  %v16516_v30 = vpop.eup %14189  ;;  %10114 = vrot.lane.b32.xlu1 %v15450_v42, %s14590_s26  ;;  %13652 = vmatprep.mubr.msk.f32.mxu0 %vm14584_vm5, %v17954_v47 }
 0x824   : > { %18027 = vst [vmem:[#allocation77_spill] sm:$0xff] %v16516_v30  ;;  %13657 = vmatprep.mubr.msk.f32.mxu1 %vm14584_vm5, %v17954_v47  ;;  %13660 = vmatprep.subr.mxu0 %v17954_v47  ;;  %v7849_v17 = vpop.permute.xlu0 %7848 }
 0x825   : > { %13665 = vmatprep.subr.mxu1 %v17954_v47  ;;  %13653 = vmatmul.mubr.msk.f32.vlgmr.msra.gmra.mxu0 %vm1820_vm6, %v16516_v30  ;;  %v16781_v30 = vld [vmem:[%s15634_s29 + $0xc] ss:$0 sm:$0xff] }
 0x826   : > { %v16528_v28 = vpop.eup %14191  ;;  %13658 = vmatmul.mubr.msk.f32.vlgmr.msra.gmra.mxu1 %vm1820_vm6, %v16512_v14  ;;  %13661 = vmatpush3.msra.mxu0 %v16271_v1  ;;  %v18030_v1 = vld [vmem:[#allocation27_spill] sm:$0xff]  ;;  %18062 = vst [vmem:[#allocation96_spill] sm:$0xff] %v16781_v30  ;;  %v16799_v14 = vld [vmem:[%s15634_s29 + $0xe] ss:$0 sm:$0xff] }
 0x827   : > { %18028 = vst [vmem:[#allocation78_spill] sm:$0xff] %v16528_v28  ;;  %13666 = vmatpush3.msra.mxu1 %v16326_v3  ;;  %10112 = vrot.lane.b32.xlu1 %v15450_v42, %s14591_s8  ;;  %v18029_v42 = vld [vmem:[#allocation15_spill] sm:$0xff]  ;;  %18064 = vst [vmem:[#allocation98_spill] sm:$0xff] %v16799_v14 }
 0x828   : > { %13662 = vmatprep.mubr.msk.f32.mxu0 %vm14584_vm5, %v17954_v47  ;;  %13670 = vmatprep.subr.mxu0 %v17954_v47  ;;  %v7847_v3 = vpop.permute.xlu0 %7846 }
 0x829   : > { %13663 = vmatmul.mubr.msk.f32.vlgmr.msra.gmra.mxu0 %vm1820_vm6, %v16528_v28  ;;  %13667 = vmatprep.mubr.msk.f32.mxu1 %vm14584_vm5, %v17954_v47 }
 0x82a   : > { %13671 = vmatpush3.xpose.msk.msra.mxu0 %vm1820_vm6, %v16273_v22  ;;  %13672 = vmatprep.mubr.msk.f32.mxu0 %vm14584_vm5, %v17954_v47 }
 0x82b   : > { %10270 = vrot.lane.b32.xlu1 %v18029_v42, %s14590_s26  ;;  %13680 = vmatprep.subr.mxu0 %v17954_v47 }
 0x82c   : > { %13675 = vmatprep.subr.mxu1 %v17954_v47  ;;  %v8005_v22 = vpop.permute.xlu0 %8004 }
 0x82d   : > { %13673 = vmatmul.mubr.msk.f32.vlgmr.msra.gmra.mxu0 %vm1820_vm6, %v18030_v1 }
 0x82e   : > { %13681 = vmatpush3.xpose.msk.msra.mxu0 %vm1820_vm6, %v18031_v41  ;;  %13682 = vmatprep.mubr.msk.f32.mxu0 %vm14584_vm5, %v17954_v47 }
 0x82f   : > { %13690 = vmatprep.subr.mxu0 %v17954_v47 }
 0x830   : > { %v8003_v40 = vpop.permute.xlu0 %8002 }
 0x831   : > { %13683 = vmatmul.mubr.msk.f32.vlgmr.msra.gmra.mxu0 %vm1820_vm6, %v18032_v52 }
 0x832   : > { %13691 = vmatpush3.xpose.msk.msra.mxu0 %vm1820_vm6, %v18033_v34  ;;  %13692 = vmatprep.mubr.msk.f32.mxu0 %vm14584_vm5, %v17954_v47 }
 0x833   : > { %13700 = vmatprep.subr.mxu0 %v17954_v47 }
 0x834   : > { %v8161_v45 = vpop.permute.xlu0 %8160 }
 0x835   : > { %13693 = vmatmul.mubr.msk.f32.vlgmr.msra.gmra.mxu0 %vm1820_vm6, %v18034_v18 }
 0x836   : > { %13701 = vmatpush3.xpose.msk.msra.mxu0 %vm1820_vm6, %v18035_v29  ;;  %13702 = vmatprep.mubr.msk.f32.mxu0 %vm14584_vm5, %v17954_v47 }
 0x837   : > { %13710 = vmatprep.subr.mxu0 %v17954_v47 }
 0x838   : > { %v8159_v6 = vpop.permute.xlu0 %8158 }
 0x839   : > { %13703 = vmatmul.mubr.msk.f32.vlgmr.msra.gmra.mxu0 %vm1820_vm6, %v16474_v21 }
 0x83a   : > { %13711 = vmatpush3.xpose.msk.msra.mxu0 %vm1820_vm6, %v7693_v56  ;;  %13712 = vmatprep.mubr.msk.f32.mxu0 %vm14584_vm5, %v17954_v47 }
 0x83b   : > { %13720 = vmatprep.subr.mxu0 %v17954_v47 }
 0x83c   : > { %v8459_v55 = vpop.permute.xlu0 %8458 }
 0x83d   : > { %13713 = vmatmul.mubr.msk.f32.vlgmr.msra.gmra.mxu0 %vm1820_vm6, %v7691_v33 }
 0x83e   : > { %13721 = vmatpush3.xpose.msk.msra.mxu0 %vm1820_vm6, %v7849_v17  ;;  %13722 = vmatprep.mubr.msk.f32.mxu0 %vm14584_vm5, %v17954_v47 }
 0x83f   : > { %13730 = vmatprep.subr.mxu0 %v17954_v47 }
 0x841   : > { %13723 = vmatmul.mubr.msk.f32.vlgmr.msra.gmra.mxu0 %vm1820_vm6, %v7847_v3 }
 0x842   : > { %13731 = vmatpush3.xpose.msk.msra.mxu0 %vm1820_vm6, %v8005_v22  ;;  %13732 = vmatprep.mubr.msk.f32.mxu0 %vm14584_vm5, %v17954_v47 }
 0x843   : > { %13740 = vmatprep.subr.mxu0 %v17954_v47 }
 0x845   : > { %13733 = vmatmul.mubr.msk.f32.vlgmr.msra.gmra.mxu0 %vm1820_vm6, %v8003_v40  ;;  %v5689_v11 = vpop.xlane.xlu1 %5688 }
 0x846   : > { %13741 = vmatpush3.xpose.msk.msra.mxu0 %vm1820_vm6, %v8161_v45  ;;  %v5705_v58 = vsub.f32 %v18036_v8, %v5689_v11  ;;  %13742 = vmatprep.mubr.msk.f32.mxu0 %vm14584_vm5, %v17954_v47 }
 0x847   : > { %13750 = vmatprep.subr.mxu0 %v17954_v47 }
 0x848   : > { %v5736_v43 = vmul.f32 1.442695, %v5705_v58 }
 0x849   : > { %13743 = vmatmul.mubr.msk.f32.vlgmr.msra.gmra.mxu0 %vm1820_vm6, %v8159_v6  ;;  %v7771_v57 = vpop.permute.xlu1 %7770 }
 0x84a   : > { %14193 = vpow2.f32 %v5736_v43  ;;  %13751 = vmatpush3.msra.mxu0 %v8459_v55  ;;  %13752 = vmatprep.mubr.msk.f32.mxu0 %vm14584_vm5, %v17954_v47 }
 0x84b   : > { %13760 = vmatprep.subr.mxu0 %v17954_v47 }
 0x84d   : > { %v7769_v32 = vpop.permute.xlu1 %7768 }
 0x851   : > { %v7927_v44 = vpop.permute.xlu1 %7926 }
 0x855   : > { %v7925_v21 = vpop.permute.xlu1 %7924 }
 0x857   : > { %v16598_v38 = vpop.eup %14193 }
 0x858   : > { %18037 = vst [vmem:[#allocation15_spill] sm:$0xff] %v16598_v38  ;;  %13668 = vmatmul.mubr.msk.f32.vlgmr.msra.gmra.mxu1 %vm1820_vm6, %v16598_v38 }
 0x859   : > { %13676 = vmatpush3.xpose.msk.msra.mxu1 %vm1820_vm6, %v16334_v46  ;;  %13677 = vmatprep.mubr.msk.f32.mxu1 %vm14584_vm5, %v17954_v47  ;;  %v8083_v56 = vpop.permute.xlu1 %8082 }
 0x85a   : > { %13685 = vmatprep.subr.mxu1 %v17954_v47 }
 0x85c   : > { %13678 = vmatmul.mubr.msk.f32.vlgmr.msra.gmra.mxu1 %vm1820_vm6, %v16344_v59 }
 0x85d   : > { %13686 = vmatpush3.xpose.msk.msra.mxu1 %vm1820_vm6, %v16352_v61  ;;  %13687 = vmatprep.mubr.msk.f32.mxu1 %vm14584_vm5, %v17954_v47  ;;  %v8081_v46 = vpop.permute.xlu1 %8080 }
 0x85e   : > { %13695 = vmatprep.subr.mxu1 %v17954_v47 }
 0x860   : > { %13688 = vmatmul.mubr.msk.f32.vlgmr.msra.gmra.mxu1 %vm1820_vm6, %v16370_v49 }
 0x861   : > { %13696 = vmatpush3.xpose.msk.msra.mxu1 %vm1820_vm6, %v16381_v62  ;;  %13697 = vmatprep.mubr.msk.f32.mxu1 %vm14584_vm5, %v17954_v47  ;;  %v8239_v59 = vpop.permute.xlu1 %8238 }
 0x862   : > { %13705 = vmatprep.subr.mxu1 %v17954_v47 }
 0x864   : > { %13698 = vmatmul.mubr.msk.f32.vlgmr.msra.gmra.mxu1 %vm1820_vm6, %v16389_v7 }
 0x865   : > { %13706 = vmatpush3.xpose.msk.msra.mxu1 %vm1820_vm6, %v16397_v9  ;;  %13707 = vmatprep.mubr.msk.f32.mxu1 %vm14584_vm5, %v17954_v47  ;;  %v8237_v61 = vpop.permute.xlu1 %8236 }
 0x866   : > { %13715 = vmatprep.subr.mxu1 %v17954_v47 }
 0x868   : > { %13708 = vmatmul.mubr.msk.f32.vlgmr.msra.gmra.mxu1 %vm1820_vm6, %v7613_v25 }
 0x869   : > { %13716 = vmatpush3.xpose.msk.msra.mxu1 %vm1820_vm6, %v7771_v57  ;;  %13717 = vmatprep.mubr.msk.f32.mxu1 %vm14584_vm5, %v17954_v47  ;;  %v8535_v49 = vpop.permute.xlu1 %8534 }
 0x86a   : > { %13725 = vmatprep.subr.mxu1 %v17954_v47 }
 0x86c   : > { %13718 = vmatmul.mubr.msk.f32.vlgmr.msra.gmra.mxu1 %vm1820_vm6, %v7769_v32 }
 0x86d   : > { %13726 = vmatpush3.xpose.msk.msra.mxu1 %vm1820_vm6, %v7927_v44  ;;  %13727 = vmatprep.mubr.msk.f32.mxu1 %vm14584_vm5, %v17954_v47 }
 0x86e   : > { %13735 = vmatprep.subr.mxu1 %v17954_v47 }
 0x870   : > { %13728 = vmatmul.mubr.msk.f32.vlgmr.msra.gmra.mxu1 %vm1820_vm6, %v7925_v21 }
 0x871   : > { %13736 = vmatpush3.xpose.msk.msra.mxu1 %vm1820_vm6, %v8083_v56  ;;  %13737 = vmatprep.mubr.msk.f32.mxu1 %vm14584_vm5, %v17954_v47 }
 0x872   : > { %13745 = vmatprep.subr.mxu1 %v17954_v47 }
 0x874   : > { %13738 = vmatmul.mubr.msk.f32.vlgmr.msra.gmra.mxu1 %vm1820_vm6, %v8081_v46 }
 0x875   : > { %13746 = vmatpush3.xpose.msk.msra.mxu1 %vm1820_vm6, %v8239_v59  ;;  %13747 = vmatprep.mubr.msk.f32.mxu1 %vm14584_vm5, %v17954_v47 }
 0x876   : > { %13755 = vmatprep.subr.mxu1 %v17954_v47 }
 0x878   : > { %13748 = vmatmul.mubr.msk.f32.vlgmr.msra.gmra.mxu1 %vm1820_vm6, %v8237_v61 }
 0x879   : > { %13756 = vmatpush3.msra.mxu1 %v8535_v49  ;;  %13757 = vmatprep.mubr.msk.f32.mxu1 %vm14584_vm5, %v17954_v47 }
 0x87a   : > { %13765 = vmatprep.subr.mxu1 %v17954_v47 }
 0x89c   : > { %v16652_v62 = vpop.f32.mrf.mxu0 }
 0x89d   : > { %18038 = vst [vmem:[#allocation27_spill] sm:$0xff] %v16652_v62 }
 0x89e   : > { %v13594_v7 = vpop.f32.mrf.mxu0 }
 0x89f   : > { %v16683_v7 = vld [vmem:[%s15634_s29] ss:$0 sm:$0xff] }
 0x8a0   : > { %v16654_v9 = vpop.f32.mrf.mxu0 }
 0x8a1   : > { %18039 = vst [vmem:[#allocation22_spill] sm:$0xff] %v16654_v9 }
 0x8a2   : > { %v13604_v33 = vpop.f32.mrf.mxu0 }
 0x8cb   : > { %v16656_v17 = vpop.f32.mrf.mxu1 }
 0x8cc   : > { %18040 = vst [vmem:[#allocation28_spill] sm:$0xff] %v16656_v17  ;;  %v16717_v17 = vld [vmem:[%s15634_s29 + $0x4] ss:$0 sm:$0xff] }
 0x8cd   : > { %v13599_v3 = vpop.f32.mrf.mxu1  ;;  %18054 = vst [vmem:[#allocation88_spill] sm:$0xff] %v16717_v17 }
 0x8cf   : > { %v16658_v1 = vpop.f32.mrf.mxu1 }
 0x8d0   : > { %18041 = vst [vmem:[#allocation29_spill] sm:$0xff] %v16658_v1  ;;  %v16703_v1 = vld [vmem:[%s15634_s29 + $0x1] ss:$0 sm:$0xff] }
 0x8d1   : > { %v13609_v41 = vpop.f32.mrf.mxu1 }
 0x8d3   : > { %v16660_v22 = vpop.f32.mrf.mxu1 }
 0x8d4   : > { %18042 = vst [vmem:[#allocation32_spill] sm:$0xff] %v16660_v22  ;;  %v16662_v52 = vpop.f32.mrf.mxu0 }
 0x8d5   : > { %18043 = vst [vmem:[#allocation31_spill] sm:$0xff] %v16662_v52  ;;  %v13619_v34 = vpop.f32.mrf.mxu1 }
 0x8d6   : > { %v13614_v18 = vpop.f32.mrf.mxu0 }
 0x8d7   : > { %v16691_v18 = vld [vmem:[%s15634_s29 + $0x2] ss:$0 sm:$0xff] }
 0x8d8   : > { %v16664_v29 = vpop.f32.mrf.mxu0  ;;  %v16666_v40 = vpop.f32.mrf.mxu1 }
 0x8d9   : > { %18044 = vst [vmem:[#allocation30_spill] sm:$0xff] %v16664_v29  ;;  %18045 = vst [vmem:[#allocation79_spill] sm:$0xff] %v16666_v40  ;;  %v16765_v29 = vld [vmem:[%s15634_s29 + $0xa] ss:$0 sm:$0xff] }
 0x8da   : > { %v13624_v45 = vpop.f32.mrf.mxu0  ;;  %v13629_v25 = vpop.f32.mrf.mxu1  ;;  %18060 = vst [vmem:[#allocation94_spill] sm:$0xff] %v16765_v29 }
 0x8dc   : > { %v16668_v6 = vpop.f32.mrf.mxu0 }
 0x8dd   : > { %18046 = vst [vmem:[#allocation80_spill] sm:$0xff] %v16668_v6  ;;  %v16670_v11 = vpop.f32.mrf.mxu1 }
 0x8de   : > { %18047 = vst [vmem:[#allocation81_spill] sm:$0xff] %v16670_v11  ;;  %v13634_v8 = vpop.f32.mrf.mxu0 }
 0x8df   : > { %v13639_v58 = vpop.f32.mrf.mxu1 }
 0x8e1   : > { %v16672_v43 = vpop.f32.mrf.mxu0  ;;  %v16674_v55 = vpop.f32.mrf.mxu1 }
 0x8e2   : > { %18048 = vst [vmem:[#allocation82_spill] sm:$0xff] %v16672_v43  ;;  %18049 = vst [vmem:[#allocation83_spill] sm:$0xff] %v16674_v55  ;;  %v16741_v43 = vld [vmem:[%s15634_s29 + $0x7] ss:$0 sm:$0xff] }
 0x8e3   : > { %v13644_v57 = vpop.f32.mrf.mxu0  ;;  %v13649_v32 = vpop.f32.mrf.mxu1  ;;  %18057 = vst [vmem:[#allocation91_spill] sm:$0xff] %v16741_v43 }
 0x8e5   : > { %v16676_v44 = vpop.f32.mrf.mxu0 }
 0x8e6   : > { %18050 = vst [vmem:[#allocation84_spill] sm:$0xff] %v16676_v44  ;;  %v16678_v21 = vpop.f32.mrf.mxu1 }
 0x8e7   : > { %18051 = vst [vmem:[#allocation85_spill] sm:$0xff] %v16678_v21  ;;  %v13654_v56 = vpop.f32.mrf.mxu0  ;;  %v16757_v21 = vld [vmem:[%s15634_s29 + $0x9] ss:$0 sm:$0xff] }
 0x8e8   : > { %v13659_v46 = vpop.f32.mrf.mxu1  ;;  %18059 = vst [vmem:[#allocation93_spill] sm:$0xff] %v16757_v21 }
 0x8e9   : > { %v16680_v59 = vpop.f32.mrf.mxu0 }
 0x8ea   : > { %18052 = vst [vmem:[#allocation86_spill] sm:$0xff] %v16680_v59  ;;  %v16731_v59 = vld [vmem:[%s15634_s29 + $0x6] ss:$0 sm:$0xff] }
 0x8eb   : > { %v13664_v61 = vpop.f32.mrf.mxu0  ;;  %18056 = vst [vmem:[#allocation90_spill] sm:$0xff] %v16731_v59 }
 0x8ed   : > { %v7140_v49 = vpop.f32.mrf.mxu0 }
 0x8ee   : > { %v16686_v33 = vadd.f32 %v16683_v7, %v7140_v49 }
 0x8ef   : > { %v13674_v3 = vpop.f32.mrf.mxu0 }
 0x8f0   : > { %v8314_v41 = vsel %vm1820_vm6, %v16686_v33, -inf }
 0x8f1   : > { %8315 = vmax.xlane.f32.xlu0 %v8314_v41  ;;  %v7296_v34 = vpop.f32.mrf.mxu0 }
 0x8f2   : > { %v16694_v45 = vadd.f32 %v16691_v18, %v7296_v34 }
 0x8f3   : > { %v13684_v25 = vpop.f32.mrf.mxu0 }
 0x8f4   : > { %v8320_v8 = vsel %vm1820_vm6, %v16694_v45, -inf }
 0x8f5   : > { %8321 = vmax.xlane.f32.xlu0 %v8320_v8  ;;  %v7452_v58 = vpop.f32.mrf.mxu0 }
 0x8f6   : > { %v16720_v9 = vadd.f32 %v16717_v17, %v7452_v58 }
 0x8f7   : > { %v13694_v57 = vpop.f32.mrf.mxu0 }
 0x8f8   : > { %v8326_v44 = vsel %vm1820_vm6, %v16720_v9, -inf }
 0x8f9   : > { %v7608_v32 = vpop.f32.mrf.mxu0 }
 0x8fb   : > { %v13704_v56 = vpop.f32.mrf.mxu0 }
 0x8fd   : > { %v7764_v46 = vpop.f32.mrf.mxu0 }
 0x8ff   : > { %v13714_v61 = vpop.f32.mrf.mxu0 }
 0x901   : > { %v7920_v49 = vpop.f32.mrf.mxu0 }
 0x902   : > { %v16768_v55 = vadd.f32 %v16765_v29, %v7920_v49 }
 0x903   : > { %v13724_v3 = vpop.f32.mrf.mxu0 }
 0x904   : > { %v16711_v3 = vld [vmem:[%s15634_s29 + $0x3] ss:$0 sm:$0xff] }
 0x905   : > { %v8076_v41 = vpop.f32.mrf.mxu0 }
 0x906   : > { %v16784_v49 = vadd.f32 %v16781_v30, %v8076_v41 }
 0x907   : > { %v13734_v11 = vpop.f32.mrf.mxu0 }
 0x909   : > { %v16698_v34 = vpop.f32.mrf.mxu0 }
 0x90a   : > { %v16803_v41 = vadd.f32 %v16799_v14, %v16698_v34  ;;  %v16848_v14 = vld [vmem:[%s15634_s29 + $0xf] ss:$0 sm:$0xff] }
 0x90b   : > { %v13744_v25 = vpop.f32.mrf.mxu0 }
 0x918   : > { %v16700_v40 = vpop.f32.mrf.mxu1 }
 0x919   : > { %18053 = vst [vmem:[#allocation87_spill] sm:$0xff] %v16700_v40  ;;  %v16747_v40 = vld [vmem:[%s15634_s29 + $0x8] ss:$0 sm:$0xff] }
 0x91a   : > { %v13669_v22 = vpop.f32.mrf.mxu1  ;;  %18058 = vst [vmem:[#allocation92_spill] sm:$0xff] %v16747_v40 }
 0x91c   : > { %v7218_v8 = vpop.f32.mrf.mxu1 }
 0x91d   : > { %v16706_v57 = vadd.f32 %v16703_v1, %v7218_v8 }
 0x91e   : > { %v13679_v56 = vpop.f32.mrf.mxu1 }
 0x91f   : > { %v8317_v61 = vsel %vm1820_vm6, %v16706_v57, -inf }
 0x920   : > { %8318 = vmax.xlane.f32.xlu1 %v8317_v61  ;;  %v7374_v11 = vpop.f32.mrf.mxu1  ;;  %v16725_v61 = vld [vmem:[%s15634_s29 + $0x5] ss:$0 sm:$0xff] }
 0x921   : > { %v16714_v25 = vadd.f32 %v16711_v3, %v7374_v11  ;;  %18055 = vst [vmem:[#allocation89_spill] sm:$0xff] %v16725_v61 }
 0x922   : > { %v13689_v22 = vpop.f32.mrf.mxu1 }
 0x923   : > { %v8323_v8 = vsel %vm1820_vm6, %v16714_v25, -inf  ;;  %v16734_v22 = vadd.f32 %v16731_v59, %v7608_v32  ;;  %v16750_v32 = vadd.f32 %v16747_v40, %v7764_v46 }
 0x924   : > { %v7530_v56 = vpop.f32.mrf.mxu1  ;;  %8324 = vmax.xlane.f32.xlu0 %v8323_v8 }
 0x925   : > { %v16728_v62 = vadd.f32 %v16725_v61, %v7530_v56 }
 0x926   : > { %v13699_v11 = vpop.f32.mrf.mxu1 }
 0x927   : > { %v8329_v58 = vsel %vm1820_vm6, %v16728_v62, -inf }
 0x928   : > { %8330 = vmax.xlane.f32.xlu1 %v8329_v58  ;;  %v7686_v8 = vpop.f32.mrf.mxu1  ;;  %8327 = vmax.xlane.f32.xlu0 %v8326_v44  ;;  %v8332_v58 = vsel %vm1820_vm6, %v16734_v22, -inf }
 0x929   : > { %v16744_v56 = vadd.f32 %v16741_v43, %v7686_v8 }
 0x92a   : > { %v13709_v11 = vpop.f32.mrf.mxu1 }
 0x92b   : > { %v8335_v6 = vsel %vm1820_vm6, %v16744_v56, -inf  ;;  %v16762_v11 = vpop.permute.xlu0 %8762 }
 0x92c   : > { %8336 = vmax.xlane.f32.xlu1 %v8335_v6  ;;  %v7842_v44 = vpop.f32.mrf.mxu1  ;;  %8333 = vmax.xlane.f32.xlu0 %v8332_v58  ;;  %v8338_v6 = vsel %vm1820_vm6, %v16750_v32, -inf }
 0x92d   : > { %v16760_v8 = vadd.f32 %v16757_v21, %v7842_v44  ;;  %v16775_v44 = vld [vmem:[%s15634_s29 + $0xb] ss:$0 sm:$0xff] }
 0x92e   : > { %v13719_v46 = vpop.f32.mrf.mxu1  ;;  %18061 = vst [vmem:[#allocation95_spill] sm:$0xff] %v16775_v44 }
 0x92f   : > { %v8341_v52 = vsel %vm1820_vm6, %v16760_v8, -inf  ;;  %v16790_v38 = vpop.permute.xlu0 %8914 }
 0x930   : > { %8342 = vmax.xlane.f32.xlu1 %v8341_v52  ;;  %v7998_v58 = vpop.f32.mrf.mxu1  ;;  %8339 = vmax.xlane.f32.xlu0 %v8338_v6  ;;  %v8344_v52 = vsel %vm1820_vm6, %v16768_v55, -inf }
 0x931   : > { %v16778_v46 = vadd.f32 %v16775_v44, %v7998_v58  ;;  %v18069_v44 = vld [vmem:[#allocation19_spill] sm:$0xff] }
 0x932   : > { %v13729_v28 = vpop.f32.mrf.mxu1 }
 0x933   : > { %v8347_v16 = vsel %vm1820_vm6, %v16778_v46, -inf  ;;  %v16809_v48 = vpop.permute.xlu0 %9066 }
 0x934   : > { %8348 = vmax.xlane.f32.xlu1 %v8347_v16  ;;  %v8154_v6 = vpop.f32.mrf.mxu1  ;;  %8345 = vmax.xlane.f32.xlu0 %v8344_v52  ;;  %v8350_v16 = vsel %vm1820_vm6, %v16784_v49, -inf }
 0x935   : > { %v16796_v28 = vadd.f32 %v16793_v23, %v8154_v6 }
 0x936   : > { %v13739_v58 = vpop.f32.mrf.mxu1 }
 0x937   : > { %v8353_v35 = vsel %vm1820_vm6, %v16796_v28, -inf  ;;  %v8356_v58 = vsel %vm1820_vm6, %v16803_v41, -inf  ;;  %v16813_v24 = vpop.permute.xlu0 %9218 }
 0x938   : > { %8354 = vmax.xlane.f32.xlu1 %v8353_v35  ;;  %v8310_v52 = vpop.f32.mrf.mxu1  ;;  %8351 = vmax.xlane.f32.xlu0 %v8350_v16  ;;  %v8611_v35 = vpop.permute.xlu1 %8610  ;;  %v18065_v16 = vld [vmem:[#allocation16_spill] sm:$0xff] }
 0x939   : > { %18068 = vst [vmem:[#allocation16_spill] sm:$0xff] %v16848_v14 }
 0x93a   : > { %v13749_v6 = vpop.f32.mrf.mxu1 }
 0x93b   : > { %v16815_v34 = vpop.permute.xlu0 %9370 }
 0x93c   : > { %8357 = vmax.xlane.f32.xlu0 %v8356_v58  ;;  %v16827_v6 = vpop.permute.xlu1 %8686 }
 0x93f   : > { %v16819_v54 = vpop.permute.xlu0 %9522 }
 0x943   : > { %v16821_v0 = vpop.permute.xlu0 %9724 }
 0x947   : > { %v16829_v58 = vpop.permute.xlu0 %9722 }
 0x949   : > { %10268 = vrot.lane.b32.xlu1 %v18029_v42, %s14591_s8  ;;  %v16833_v42 = vpop.permute.xlu1 %8838 }
 0x94b   : > { %v16835_v10 = vpop.permute.xlu0 %9880 }
 0x94f   : > { %v16843_v51 = vpop.permute.xlu0 %9878 }
 0x952   : > { %10190 = vrot.lane.b32.xlu0 %v15460_v13, %s14591_s8  ;;  %v16841_v13 = vpop.permute.xlu1 %8990 }
 0x953   : > { %v16855_v30 = vpop.permute.xlu0 %10036 }
 0x956   : > { %10348 = vrot.lane.b32.xlu0 %v18065_v16, %s14590_s26  ;;  %v16853_v23 = vpop.permute.xlu1 %9142 }
 0x957   : > { %v16865_v21 = vpop.permute.xlu0 %10034 }
 0x95a   : > { %10346 = vrot.lane.b32.xlu0 %v18065_v16, %s14591_s8  ;;  %v16851_v16 = vadd.f32 %v16848_v14, %v8310_v52  ;;  %v16863_v29 = vpop.permute.xlu1 %9294 }
 0x95b   : > { %v16871_v14 = vpop.permute.xlu0 %10192 }
 0x95e   : > { %10504 = vrot.lane.b32.xlu0 %v18066_v60, %s14590_s26  ;;  %v16869_v52 = vpop.permute.xlu1 %9446 }
 0x962   : > { %10502 = vrot.lane.b32.xlu0 %v18066_v60, %s14591_s8  ;;  %v8359_v60 = vsel %vm1820_vm6, %v16851_v16, -inf }
 0x966   : > { %10660 = vrot.lane.b32.xlu0 %v18067_v19, %s14590_s26 }
 0x96a   : > { %10658 = vrot.lane.b32.xlu0 %v18067_v19, %s14591_s8  ;;  %v18070_v19 = vld [vmem:[#allocation20_spill] sm:$0xff] }
 0x96d   : > { %8360 = vmax.xlane.f32.xlu1 %v8359_v60  ;;  %v16877_v60 = vpop.permute.xlu1 %9598 }
 0x96e   : > { %10816 = vrot.lane.b32.xlu0 %v18069_v44, %s14590_s26 }
 0x972   : > { %10814 = vrot.lane.b32.xlu0 %v18069_v44, %s14591_s8 }
 0x976   : > { %11114 = vrot.lane.b32.xlu0 %v18070_v19, %s14581_s21  ;;  %v16885_v19 = vpop.permute.xlu1 %9802 }
 0x97a   : > { %v8316_v40 = vpop.xlane.xlu0 %8315  ;;  %11418 = vrot.lane.b32.xlu0 %v15658_v37, %s14581_s21  ;;  %v16895_v37 = vpop.permute.xlu1 %9800 }
 0x97b   : > { %v8362_v43 = vsub.f32 %v16686_v33, %v8316_v40 }
 0x97d   : > { %v8378_v59 = vmul.f32 1.442695, %v8362_v43 }
 0x97e   : > { %v8322_v61 = vpop.xlane.xlu0 %8321  ;;  %10426 = vrot.lane.b32.xlu1 %v15466_v27, %s14590_s26  ;;  %11570 = vrot.lane.b32.xlu0 %v15662_v26, %s14581_s21 }
 0x97f   : > { %14195 = vpow2.f32 %v8378_v59  ;;  %v8364_v44 = vsub.f32 %v16694_v45, %v8322_v61  ;;  %v18072_v59 = vld [vmem:[#allocation24_spill] sm:$0xff] }
 0x981   : > { %v8382_v17 = vmul.f32 1.442695, %v8364_v44 }
 0x982   : > { %10424 = vrot.lane.b32.xlu1 %v15466_v27, %s14591_s8  ;;  %11722 = vrot.lane.b32.xlu0 %v15666_v31, %s14581_s21  ;;  %v16903_v27 = vpop.permute.xlu1 %9958 }
 0x983   : > { %14197 = vpow2.f32 %v8382_v17  ;;  %v18071_v17 = vld [vmem:[#allocation23_spill] sm:$0xff] }
 0x986   : > { %10582 = vrot.lane.b32.xlu1 %v15474_v20, %s14590_s26  ;;  %11874 = vrot.lane.b32.xlu0 %v15670_v15, %s14581_s21  ;;  %v16919_v31 = vpop.permute.xlu1 %9956 }
 0x98a   : > { %10580 = vrot.lane.b32.xlu1 %v15474_v20, %s14591_s8  ;;  %12026 = vrot.lane.b32.xlu0 %v15674_v53, %s14581_s21  ;;  %v16926_v15 = vpop.permute.xlu1 %10114 }
 0x98c   : > { %v16901_v26 = vpop.eup %14195 }
 0x98d   : > { %13753 = vmatmul.mubr.msk.f32.vlgmr.msra.gmra.mxu0 %vm1820_vm6, %v16901_v26 }
 0x98e   : > { %13761 = vmatpush3.msra.mxu0 %v8611_v35  ;;  %10738 = vrot.lane.b32.xlu1 %v15482_v39, %s14590_s26  ;;  %v16932_v53 = vpop.permute.xlu1 %10112 }
 0x98f   : > { %13762 = vmatprep.mubr.msk.f32.mxu0 %vm14584_vm5, %v17954_v47  ;;  %13770 = vmatprep.subr.mxu0 %v17954_v47 }
 0x990   : > { %v16912_v20 = vpop.eup %14197 }
 0x991   : > { %13763 = vmatmul.mubr.msk.f32.vlgmr.msra.gmra.mxu0 %vm1820_vm6, %v16912_v20 }
 0x992   : > { %13771 = vmatpush3.msra.mxu0 %v16762_v11  ;;  %10736 = vrot.lane.b32.xlu1 %v15482_v39, %s14591_s8  ;;  %v16936_v39 = vpop.permute.xlu1 %10270 }
 0x993   : > { %13772 = vmatprep.mubr.msk.f32.mxu0 %vm14584_vm5, %v17954_v47  ;;  %13780 = vmatprep.subr.mxu0 %v17954_v47 }
 0x996   : > { %10894 = vrot.lane.b32.xlu1 %v15488_v63, %s14590_s26 }
 0x99a   : > { %10892 = vrot.lane.b32.xlu1 %v15488_v63, %s14591_s8 }
 0x99e   : > { %11190 = vrot.lane.b32.xlu1 %v15607_v36, %s14581_s21 }
 0x9a2   : > { %11266 = vrot.lane.b32.xlu1 %v15654_v2, %s14581_s21 }
 0x9a6   : > { %11342 = vrot.lane.b32.xlu1 %v18071_v17, %s14581_s21 }
 0x9a9   : > { %v8319_v40 = vpop.xlane.xlu1 %8318 }
 0x9aa   : > { %v8363_v43 = vsub.f32 %v16706_v57, %v8319_v40  ;;  %11494 = vrot.lane.b32.xlu1 %v18072_v59, %s14581_s21 }
 0x9ac   : > { %v8380_v63 = vmul.f32 1.442695, %v8363_v43 }
 0x9ad   : > { %v8325_v33 = vpop.xlane.xlu0 %8324 }
 0x9ae   : > { %14199 = vpow2.f32 %v8380_v63  ;;  %v8365_v36 = vsub.f32 %v16714_v25, %v8325_v33  ;;  %11646 = vrot.lane.b32.xlu1 %v15660_v5, %s14581_s21 }
 0x9b0   : > { %v8384_v2 = vmul.f32 1.442695, %v8365_v36 }
 0x9b1   : > { %v8331_v45 = vpop.xlane.xlu1 %8330  ;;  %v8328_v61 = vpop.xlane.xlu0 %8327 }
 0x9b2   : > { %14201 = vpow2.f32 %v8384_v2  ;;  %v8367_v11 = vsub.f32 %v16728_v62, %v8331_v45  ;;  %v8366_v35 = vsub.f32 %v16720_v9, %v8328_v61  ;;  %11798 = vrot.lane.b32.xlu1 %v15664_v4, %s14581_s21 }
 0x9b4   : > { %v8388_v57 = vmul.f32 1.442695, %v8367_v11  ;;  %v8386_v44 = vmul.f32 1.442695, %v8366_v35 }
 0x9b5   : > { %v8337_v17 = vpop.xlane.xlu1 %8336  ;;  %v8334_v40 = vpop.xlane.xlu0 %8333 }
 0x9b6   : > { %14203 = vpow2.f32 %v8388_v57  ;;  %v8369_v25 = vsub.f32 %v16744_v56, %v8337_v17  ;;  %v8368_v5 = vsub.f32 %v16734_v22, %v8334_v40  ;;  %11950 = vrot.lane.b32.xlu1 %v15668_v12, %s14581_s21 }
 0x9b7   : > { %14205 = vpow2.f32 %v8386_v44 }
 0x9b8   : > { %v8392_v43 = vmul.f32 1.442695, %v8369_v25  ;;  %v8390_v62 = vmul.f32 1.442695, %v8368_v5 }
 0x9b9   : > { %v8343_v59 = vpop.xlane.xlu1 %8342  ;;  %v8340_v9 = vpop.xlane.xlu0 %8339 }
 0x9ba   : > { %14207 = vpow2.f32 %v8392_v43  ;;  %v8371_v4 = vsub.f32 %v16760_v8, %v8343_v59  ;;  %v8370_v63 = vsub.f32 %v16750_v32, %v8340_v9  ;;  %12102 = vrot.lane.b32.xlu1 %v15672_v50, %s14581_s21 }
 0x9bb   : > { %v16958_v33 = vpop.eup %14199  ;;  %14209 = vpow2.f32 %v8390_v62 }
 0x9bc   : > { %v8396_v22 = vmul.f32 1.442695, %v8371_v4  ;;  %v8394_v56 = vmul.f32 1.442695, %v8370_v63  ;;  %13758 = vmatmul.mubr.msk.f32.vlgmr.msra.gmra.mxu1 %vm1820_vm6, %v16958_v33 }
 0x9bd   : > { %13766 = vmatpush3.msra.mxu1 %v16827_v6  ;;  %v8349_v12 = vpop.xlane.xlu1 %8348  ;;  %v8346_v36 = vpop.xlane.xlu0 %8345  ;;  %13767 = vmatprep.mubr.msk.f32.mxu1 %vm14584_vm5, %v17954_v47 }
 0x9be   : > { %14211 = vpow2.f32 %v8396_v22  ;;  %v8373_v32 = vsub.f32 %v16778_v46, %v8349_v12  ;;  %v8372_v50 = vsub.f32 %v16768_v55, %v8346_v36  ;;  %13775 = vmatprep.subr.mxu1 %v17954_v47 }
 0x9bf   : > { %v16968_v8 = vpop.eup %14201  ;;  %14213 = vpow2.f32 %v8394_v56 }
 0x9c0   : > { %v8400_v2 = vmul.f32 1.442695, %v8373_v32  ;;  %v8398_v45 = vmul.f32 1.442695, %v8372_v50  ;;  %13768 = vmatmul.mubr.msk.f32.vlgmr.msra.gmra.mxu1 %vm1820_vm6, %v16968_v8 }
 0x9c1   : > { %13776 = vmatpush3.msra.mxu1 %v16833_v42  ;;  %v8355_v6 = vpop.xlane.xlu1 %8354  ;;  %v8352_v61 = vpop.xlane.xlu0 %8351  ;;  %13777 = vmatprep.mubr.msk.f32.mxu1 %vm14584_vm5, %v17954_v47 }
 0x9c2   : > { %14215 = vpow2.f32 %v8400_v2  ;;  %v8375_v55 = vsub.f32 %v16796_v28, %v8355_v6  ;;  %v8374_v46 = vsub.f32 %v16784_v49, %v8352_v61  ;;  %13785 = vmatprep.subr.mxu1 %v17954_v47 }
 0x9c3   : > { %v16978_v11 = vpop.eup %14203  ;;  %14217 = vpow2.f32 %v8398_v45 }
 0x9c4   : > { %v16980_v35 = vpop.eup %14205  ;;  %v8404_v57 = vmul.f32 1.442695, %v8375_v55  ;;  %v8402_v44 = vmul.f32 1.442695, %v8374_v46  ;;  %13778 = vmatmul.mubr.msk.f32.vlgmr.msra.gmra.mxu1 %vm1820_vm6, %v16978_v11 }
 0x9c5   : > { %13773 = vmatmul.mubr.msk.f32.vlgmr.msra.gmra.mxu0 %vm1820_vm6, %v16980_v35  ;;  %13786 = vmatpush3.msra.mxu1 %v16841_v13  ;;  %v8358_v28 = vpop.xlane.xlu0 %8357 }
 0x9c6   : > { %14219 = vpow2.f32 %v8404_v57  ;;  %13781 = vmatpush3.msra.mxu0 %v16790_v38  ;;  %v8376_v49 = vsub.f32 %v16803_v41, %v8358_v28  ;;  %13782 = vmatprep.mubr.msk.f32.mxu0 %vm14584_vm5, %v17954_v47 }
 0x9c7   : > { %v16991_v42 = vpop.eup %14207  ;;  %14221 = vpow2.f32 %v8402_v44  ;;  %13787 = vmatprep.mubr.msk.f32.mxu1 %vm14584_vm5, %v17954_v47  ;;  %13790 = vmatprep.subr.mxu0 %v17954_v47 }
 0x9c8   : > { %v16996_v17 = vpop.eup %14209  ;;  %v8406_v13 = vmul.f32 1.442695, %v8376_v49  ;;  %13795 = vmatprep.subr.mxu1 %v17954_v47  ;;  %13788 = vmatmul.mubr.msk.f32.vlgmr.msra.gmra.mxu1 %vm1820_vm6, %v16991_v42 }
 0x9c9   : > { %13783 = vmatmul.mubr.msk.f32.vlgmr.msra.gmra.mxu0 %vm1820_vm6, %v16996_v17  ;;  %13796 = vmatpush3.msra.mxu1 %v16853_v23  ;;  %v10191_v38 = vpop.permute.xlu0 %10190 }
 0x9ca   : > { %14223 = vpow2.f32 %v8406_v13  ;;  %13791 = vmatpush3.msra.mxu0 %v16809_v48  ;;  %13792 = vmatprep.mubr.msk.f32.mxu0 %vm14584_vm5, %v17954_v47 }
 0x9cb   : > { %v17007_v41 = vpop.eup %14211  ;;  %13797 = vmatprep.mubr.msk.f32.mxu1 %vm14584_vm5, %v17954_v47  ;;  %13800 = vmatprep.subr.mxu0 %v17954_v47 }
 0x9cc   : > { %v17012_v40 = vpop.eup %14213  ;;  %13805 = vmatprep.subr.mxu1 %v17954_v47  ;;  %13798 = vmatmul.mubr.msk.f32.vlgmr.msra.gmra.mxu1 %vm1820_vm6, %v17007_v41 }
 0x9cd   : > { %13793 = vmatmul.mubr.msk.f32.vlgmr.msra.gmra.mxu0 %vm1820_vm6, %v17012_v40  ;;  %13806 = vmatpush3.msra.mxu1 %v16863_v29  ;;  %v10349_v23 = vpop.permute.xlu0 %10348 }
 0x9ce   : > { %13801 = vmatpush3.msra.mxu0 %v16813_v24  ;;  %13802 = vmatprep.mubr.msk.f32.mxu0 %vm14584_vm5, %v17954_v47 }
 0x9cf   : > { %v17023_v48 = vpop.eup %14215  ;;  %13807 = vmatprep.mubr.msk.f32.mxu1 %vm14584_vm5, %v17954_v47  ;;  %13810 = vmatprep.subr.mxu0 %v17954_v47 }
 0x9d0   : > { %v17028_v25 = vpop.eup %14217  ;;  %13815 = vmatprep.subr.mxu1 %v17954_v47  ;;  %13808 = vmatmul.mubr.msk.f32.vlgmr.msra.gmra.mxu1 %vm1820_vm6, %v17023_v48 }
 0x9d1   : > { %13803 = vmatmul.mubr.msk.f32.vlgmr.msra.gmra.mxu0 %vm1820_vm6, %v17028_v25  ;;  %13816 = vmatpush3.msra.mxu1 %v16869_v52  ;;  %v10347_v24 = vpop.permute.xlu0 %10346 }
 0x9d2   : > { %13811 = vmatpush3.msra.mxu0 %v16815_v34  ;;  %13812 = vmatprep.mubr.msk.f32.mxu0 %vm14584_vm5, %v17954_v47 }
 0x9d3   : > { %v17039_v29 = vpop.eup %14219  ;;  %13817 = vmatprep.mubr.msk.f32.mxu1 %vm14584_vm5, %v17954_v47  ;;  %13820 = vmatprep.subr.mxu0 %v17954_v47 }
 0x9d4   : > { %v17044_v5 = vpop.eup %14221  ;;  %13825 = vmatprep.subr.mxu1 %v17954_v47  ;;  %13818 = vmatmul.mubr.msk.f32.vlgmr.msra.gmra.mxu1 %vm1820_vm6, %v17039_v29 }
 0x9d5   : > { %13813 = vmatmul.mubr.msk.f32.vlgmr.msra.gmra.mxu0 %vm1820_vm6, %v17044_v5  ;;  %13826 = vmatpush3.msra.mxu1 %v16877_v60  ;;  %v10505_v34 = vpop.permute.xlu0 %10504 }
 0x9d6   : > { %13821 = vmatpush3.msra.mxu0 %v16819_v54  ;;  %13822 = vmatprep.mubr.msk.f32.mxu0 %vm14584_vm5, %v17954_v47 }
 0x9d7   : > { %v17055_v52 = vpop.eup %14223  ;;  %13830 = vmatprep.subr.mxu0 %v17954_v47  ;;  %13827 = vmatprep.mubr.msk.f32.mxu1 %vm14584_vm5, %v17954_v47 }
 0x9d8   : > { %13835 = vmatprep.subr.mxu1 %v17954_v47 }
 0x9d9   : > { %13823 = vmatmul.mubr.msk.f32.vlgmr.msra.gmra.mxu0 %vm1820_vm6, %v17055_v52  ;;  %v10503_v54 = vpop.permute.xlu0 %10502 }
 0x9da   : > { %13831 = vmatpush3.xpose.msk.msra.mxu0 %vm1820_vm6, %v16821_v0  ;;  %13832 = vmatprep.mubr.msk.f32.mxu0 %vm14584_vm5, %v17954_v47  ;;  %v10269_v0 = vpop.permute.xlu1 %10268 }
 0x9db   : > { %13840 = vmatprep.subr.mxu0 %v17954_v47 }
 0x9dd   : > { %13833 = vmatmul.mubr.msk.f32.vlgmr.msra.gmra.mxu0 %vm1820_vm6, %v16829_v58  ;;  %v10661_v60 = vpop.permute.xlu0 %10660 }
 0x9de   : > { %13841 = vmatpush3.xpose.msk.msra.mxu0 %vm1820_vm6, %v16835_v10  ;;  %13842 = vmatprep.mubr.msk.f32.mxu0 %vm14584_vm5, %v17954_v47 }
 0x9df   : > { %13850 = vmatprep.subr.mxu0 %v17954_v47 }
 0x9e1   : > { %13843 = vmatmul.mubr.msk.f32.vlgmr.msra.gmra.mxu0 %vm1820_vm6, %v16843_v51  ;;  %v10659_v10 = vpop.permute.xlu0 %10658 }
 0x9e2   : > { %13851 = vmatpush3.xpose.msk.msra.mxu0 %vm1820_vm6, %v16855_v30  ;;  %13852 = vmatprep.mubr.msk.f32.mxu0 %vm14584_vm5, %v17954_v47 }
 0x9e3   : > { %13860 = vmatprep.subr.mxu0 %v17954_v47 }
 0x9e5   : > { %13853 = vmatmul.mubr.msk.f32.vlgmr.msra.gmra.mxu0 %vm1820_vm6, %v16865_v21  ;;  %v10817_v51 = vpop.permute.xlu0 %10816 }
 0x9e6   : > { %13861 = vmatpush3.xpose.msk.msra.mxu0 %vm1820_vm6, %v16871_v14  ;;  %13862 = vmatprep.mubr.msk.f32.mxu0 %vm14584_vm5, %v17954_v47 }
 0x9e7   : > { %13870 = vmatprep.subr.mxu0 %v17954_v47 }
 0x9e9   : > { %13863 = vmatmul.mubr.msk.f32.vlgmr.msra.gmra.mxu0 %vm1820_vm6, %v10191_v38  ;;  %v10815_v14 = vpop.permute.xlu0 %10814 }
 0x9ea   : > { %13871 = vmatpush3.xpose.msk.msra.mxu0 %vm1820_vm6, %v10349_v23  ;;  %13872 = vmatprep.mubr.msk.f32.mxu0 %vm14584_vm5, %v17954_v47 }
 0x9eb   : > { %13880 = vmatprep.subr.mxu0 %v17954_v47 }
 0x9ed   : > { %13873 = vmatmul.mubr.msk.f32.vlgmr.msra.gmra.mxu0 %vm1820_vm6, %v10347_v24  ;;  %v11115_v58 = vpop.permute.xlu0 %11114 }
 0x9ee   : > { %13881 = vmatpush3.xpose.msk.msra.mxu0 %vm1820_vm6, %v10505_v34  ;;  %13882 = vmatprep.mubr.msk.f32.mxu0 %vm14584_vm5, %v17954_v47 }
 0x9ef   : > { %13890 = vmatprep.subr.mxu0 %v17954_v47 }
 0x9f1   : > { %13883 = vmatmul.mubr.msk.f32.vlgmr.msra.gmra.mxu0 %vm1820_vm6, %v10503_v54 }
 0x9f2   : > { %13891 = vmatpush3.xpose.msk.msra.mxu0 %vm1820_vm6, %v10661_v60  ;;  %13892 = vmatprep.mubr.msk.f32.mxu0 %vm14584_vm5, %v17954_v47 }
 0x9f3   : > { %13900 = vmatprep.subr.mxu0 %v17954_v47 }
 0x9f5   : > { %13893 = vmatmul.mubr.msk.f32.vlgmr.msra.gmra.mxu0 %vm1820_vm6, %v10659_v10 }
 0x9f6   : > { %13901 = vmatpush3.xpose.msk.msra.mxu0 %vm1820_vm6, %v10817_v51  ;;  %v8361_v30 = vpop.xlane.xlu1 %8360  ;;  %13902 = vmatprep.mubr.msk.f32.mxu0 %vm14584_vm5, %v17954_v47 }
 0x9f7   : > { %v8377_v21 = vsub.f32 %v16851_v16, %v8361_v30  ;;  %13910 = vmatprep.subr.mxu0 %v17954_v47 }
 0x9f9   : > { %v8408_v43 = vmul.f32 1.442695, %v8377_v21  ;;  %13903 = vmatmul.mubr.msk.f32.vlgmr.msra.gmra.mxu0 %vm1820_vm6, %v10815_v14 }
 0x9fa   : > { %13911 = vmatpush3.msra.mxu0 %v11115_v58  ;;  %v10427_v62 = vpop.permute.xlu1 %10426  ;;  %13912 = vmatprep.mubr.msk.f32.mxu0 %vm14584_vm5, %v17954_v47 }
 0x9fb   : > { %14225 = vpow2.f32 %v8408_v43  ;;  %13920 = vmatprep.subr.mxu0 %v17954_v47 }
 0x9fe   : > { %v10425_v59 = vpop.permute.xlu1 %10424 }
 0xa02   : > { %v10583_v9 = vpop.permute.xlu1 %10582 }
 0xa06   : > { %v10581_v16 = vpop.permute.xlu1 %10580 }
 0xa08   : > { %v17114_v4 = vpop.eup %14225 }
 0xa09   : > { %13828 = vmatmul.mubr.msk.f32.vlgmr.msra.gmra.mxu1 %vm1820_vm6, %v17114_v4 }
 0xa0a   : > { %13836 = vmatpush3.xpose.msk.msra.mxu1 %vm1820_vm6, %v16885_v19  ;;  %13837 = vmatprep.mubr.msk.f32.mxu1 %vm14584_vm5, %v17954_v47  ;;  %v10739_v63 = vpop.permute.xlu1 %10738 }
 0xa0b   : > { %13845 = vmatprep.subr.mxu1 %v17954_v47 }
 0xa0d   : > { %13838 = vmatmul.mubr.msk.f32.vlgmr.msra.gmra.mxu1 %vm1820_vm6, %v16895_v37 }
 0xa0e   : > { %13846 = vmatpush3.xpose.msk.msra.mxu1 %vm1820_vm6, %v16903_v27  ;;  %13847 = vmatprep.mubr.msk.f32.mxu1 %vm14584_vm5, %v17954_v47  ;;  %v10737_v19 = vpop.permute.xlu1 %10736 }
 0xa0f   : > { %13855 = vmatprep.subr.mxu1 %v17954_v47 }
 0xa11   : > { %13848 = vmatmul.mubr.msk.f32.vlgmr.msra.gmra.mxu1 %vm1820_vm6, %v16919_v31 }
 0xa12   : > { %13856 = vmatpush3.xpose.msk.msra.mxu1 %vm1820_vm6, %v16926_v15  ;;  %13857 = vmatprep.mubr.msk.f32.mxu1 %vm14584_vm5, %v17954_v47  ;;  %v10895_v37 = vpop.permute.xlu1 %10894 }
 0xa13   : > { %13865 = vmatprep.subr.mxu1 %v17954_v47 }
 0xa15   : > { %13858 = vmatmul.mubr.msk.f32.vlgmr.msra.gmra.mxu1 %vm1820_vm6, %v16932_v53 }
 0xa16   : > { %13866 = vmatpush3.xpose.msk.msra.mxu1 %vm1820_vm6, %v16936_v39  ;;  %13867 = vmatprep.mubr.msk.f32.mxu1 %vm14584_vm5, %v17954_v47  ;;  %v10893_v27 = vpop.permute.xlu1 %10892 }
 0xa17   : > { %13875 = vmatprep.subr.mxu1 %v17954_v47 }
 0xa19   : > { %13868 = vmatmul.mubr.msk.f32.vlgmr.msra.gmra.mxu1 %vm1820_vm6, %v10269_v0 }
 0xa1a   : > { %13876 = vmatpush3.xpose.msk.msra.mxu1 %vm1820_vm6, %v10427_v62  ;;  %13877 = vmatprep.mubr.msk.f32.mxu1 %vm14584_vm5, %v17954_v47  ;;  %v11191_v31 = vpop.permute.xlu1 %11190 }
 0xa1b   : > { %13885 = vmatprep.subr.mxu1 %v17954_v47 }
 0xa1d   : > { %13878 = vmatmul.mubr.msk.f32.vlgmr.msra.gmra.mxu1 %vm1820_vm6, %v10425_v59 }
 0xa1e   : > { %13886 = vmatpush3.xpose.msk.msra.mxu1 %vm1820_vm6, %v10583_v9  ;;  %13887 = vmatprep.mubr.msk.f32.mxu1 %vm14584_vm5, %v17954_v47 }
 0xa1f   : > { %13895 = vmatprep.subr.mxu1 %v17954_v47 }
 0xa21   : > { %13888 = vmatmul.mubr.msk.f32.vlgmr.msra.gmra.mxu1 %vm1820_vm6, %v10581_v16 }
 0xa22   : > { %13896 = vmatpush3.xpose.msk.msra.mxu1 %vm1820_vm6, %v10739_v63  ;;  %13897 = vmatprep.mubr.msk.f32.mxu1 %vm14584_vm5, %v17954_v47 }
 0xa23   : > { %13905 = vmatprep.subr.mxu1 %v17954_v47 }
 0xa25   : > { %13898 = vmatmul.mubr.msk.f32.vlgmr.msra.gmra.mxu1 %vm1820_vm6, %v10737_v19 }
 0xa26   : > { %13906 = vmatpush3.xpose.msk.msra.mxu1 %vm1820_vm6, %v10895_v37  ;;  %13907 = vmatprep.mubr.msk.f32.mxu1 %vm14584_vm5, %v17954_v47 }
 0xa27   : > { %13915 = vmatprep.subr.mxu1 %v17954_v47 }
 0xa29   : > { %13908 = vmatmul.mubr.msk.f32.vlgmr.msra.gmra.mxu1 %vm1820_vm6, %v10893_v27 }
 0xa2a   : > { %13916 = vmatpush3.msra.mxu1 %v11191_v31  ;;  %13917 = vmatprep.mubr.msk.f32.mxu1 %vm14584_vm5, %v17954_v47 }
 0xa2b   : > { %13925 = vmatprep.subr.mxu1 %v17954_v47 }
 0xa4d   : > { %v17168_v15 = vpop.f32.mrf.mxu0 }
 0xa4f   : > { %v13754_v53 = vpop.f32.mrf.mxu0 }
 0xa51   : > { %v17170_v39 = vpop.f32.mrf.mxu0 }
 0xa53   : > { %v13764_v22 = vpop.f32.mrf.mxu0 }
 0xa7c   : > { %v17172_v56 = vpop.f32.mrf.mxu1 }
 0xa7e   : > { %v13759_v12 = vpop.f32.mrf.mxu1 }
 0xa80   : > { %v17174_v36 = vpop.f32.mrf.mxu1 }
 0xa82   : > { %v13769_v32 = vpop.f32.mrf.mxu1 }
 0xa84   : > { %v17176_v50 = vpop.f32.mrf.mxu1 }
 0xa85   : > { %v17178_v2 = vpop.f32.mrf.mxu0 }
 0xa86   : > { %v13779_v45 = vpop.f32.mrf.mxu1 }
 0xa87   : > { %v13774_v6 = vpop.f32.mrf.mxu0 }
 0xa88   : > { %v17180_v61 = vpop.f32.mrf.mxu1 }
 0xa89   : > { %v17182_v55 = vpop.f32.mrf.mxu0 }
 0xa8a   : > { %v13789_v46 = vpop.f32.mrf.mxu1 }
 0xa8b   : > { %v13784_v57 = vpop.f32.mrf.mxu0 }
 0xa8c   : > { %v17184_v44 = vpop.f32.mrf.mxu1 }
 0xa8d   : > { %v17186_v28 = vpop.f32.mrf.mxu0 }
 0xa8e   : > { %18073 = vst [vmem:[#allocation17_spill] sm:$0xff] %v17186_v28  ;;  %v13799_v49 = vpop.f32.mrf.mxu1 }
 0xa8f   : > { %v13794_v13 = vpop.f32.mrf.mxu0 }
 0xa90   : > { %v17188_v38 = vpop.f32.mrf.mxu1 }
 0xa91   : > { %18074 = vst [vmem:[#allocation18_spill] sm:$0xff] %v17188_v38  ;;  %v17190_v23 = vpop.f32.mrf.mxu0 }
 0xa92   : > { %18075 = vst [vmem:[#allocation19_spill] sm:$0xff] %v17190_v23  ;;  %v13809_v24 = vpop.f32.mrf.mxu1 }
 0xa93   : > { %v13804_v34 = vpop.f32.mrf.mxu0 }
 0xa94   : > { %v17192_v54 = vpop.f32.mrf.mxu1 }
 0xa95   : > { %18076 = vst [vmem:[#allocation20_spill] sm:$0xff] %v17192_v54  ;;  %v17194_v60 = vpop.f32.mrf.mxu0 }
 0xa96   : > { %18077 = vst [vmem:[#allocation23_spill] sm:$0xff] %v17194_v60  ;;  %v13819_v10 = vpop.f32.mrf.mxu1  ;;  %v18119_v60 = vld [vmem:[#allocation71_spill] sm:$0xff] }
 0xa97   : > { %v13814_v51 = vpop.f32.mrf.mxu0 }
 0xa99   : > { %v17196_v0 = vpop.f32.mrf.mxu0 }
 0xa9a   : > { %18078 = vst [vmem:[#allocation24_spill] sm:$0xff] %v17196_v0 }
 0xa9b   : > { %v13824_v14 = vpop.f32.mrf.mxu0 }
 0xa9c   : > { %v18080_v14 = vld [vmem:[#allocation88_spill] sm:$0xff] }
 0xa9d   : > { %v9796_v30 = vpop.f32.mrf.mxu0 }
 0xa9e   : > { %v17199_v21 = vadd.f32 %v16683_v7, %v9796_v30 }
 0xa9f   : > { %v13834_v58 = vpop.f32.mrf.mxu0 }
 0xaa0   : > { %v10970_v43 = vsel %vm1820_vm6, %v17199_v21, -inf }
 0xaa1   : > { %10971 = vmax.xlane.f32.xlu0 %v10970_v43  ;;  %v9952_v62 = vpop.f32.mrf.mxu0 }
 0xaa2   : > { %v17204_v59 = vadd.f32 %v16691_v18, %v9952_v62 }
 0xaa3   : > { %v13844_v9 = vpop.f32.mrf.mxu0 }
 0xaa4   : > { %v10976_v16 = vsel %vm1820_vm6, %v17204_v59, -inf }
 0xaa5   : > { %10977 = vmax.xlane.f32.xlu0 %v10976_v16  ;;  %v10108_v63 = vpop.f32.mrf.mxu0  ;;  %v18082_v16 = vld [vmem:[#allocation90_spill] sm:$0xff] }
 0xaa6   : > { %v17219_v30 = vadd.f32 %v18080_v14, %v10108_v63  ;;  %v18086_v14 = vld [vmem:[#allocation94_spill] sm:$0xff] }
 0xaa7   : > { %v13854_v19 = vpop.f32.mrf.mxu0 }
 0xaa9   : > { %v10264_v37 = vpop.f32.mrf.mxu0 }
 0xaaa   : > { %v17227_v19 = vadd.f32 %v18082_v16, %v10264_v37 }
 0xaab   : > { %v13864_v27 = vpop.f32.mrf.mxu0 }
 0xaac   : > { %v10982_v27 = vsel %vm1820_vm6, %v17219_v30, -inf }
 0xaad   : > { %v10420_v7 = vpop.f32.mrf.mxu0 }
 0xaaf   : > { %v13874_v31 = vpop.f32.mrf.mxu0 }
 0xab0   : > { %v18083_v31 = vld [vmem:[#allocation91_spill] sm:$0xff] }
 0xab1   : > { %v10576_v53 = vpop.f32.mrf.mxu0 }
 0xab3   : > { %v13884_v22 = vpop.f32.mrf.mxu0 }
 0xab5   : > { %v10732_v12 = vpop.f32.mrf.mxu0 }
 0xab7   : > { %v13894_v32 = vpop.f32.mrf.mxu0 }
 0xab9   : > { %v10888_v45 = vpop.f32.mrf.mxu0 }
 0xabb   : > { %v13904_v6 = vpop.f32.mrf.mxu0 }
 0xabc   : > { %v18084_v6 = vld [vmem:[#allocation92_spill] sm:$0xff] }
 0xac9   : > { %v17208_v46 = vpop.f32.mrf.mxu1 }
 0xaca   : > { %18079 = vst [vmem:[#allocation99_spill] sm:$0xff] %v17208_v46  ;;  %v18099_v46 = vld [vmem:[#allocation48_spill] sm:$0xff] }
 0xacb   : > { %v13829_v18 = vpop.f32.mrf.mxu1 }
 0xacc   : > { %v17237_v18 = vadd.f32 %v18084_v6, %v10420_v7  ;;  %v18089_v6 = vld [vmem:[#allocation97_spill] sm:$0xff] }
 0xacd   : > { %v9874_v57 = vpop.f32.mrf.mxu1 }
 0xace   : > { %v17211_v49 = vadd.f32 %v16703_v1, %v9874_v57  ;;  %v18081_v1 = vld [vmem:[#allocation89_spill] sm:$0xff]  ;;  %v10988_v57 = vsel %vm1820_vm6, %v17227_v19, -inf }
 0xacf   : > { %v13839_v13 = vpop.f32.mrf.mxu1 }
 0xad0   : > { %v10973_v24 = vsel %vm1820_vm6, %v17211_v49, -inf }
 0xad1   : > { %10974 = vmax.xlane.f32.xlu1 %v10973_v24  ;;  %v10030_v34 = vpop.f32.mrf.mxu1  ;;  %v18085_v24 = vld [vmem:[#allocation93_spill] sm:$0xff] }
 0xad2   : > { %v17216_v10 = vadd.f32 %v16711_v3, %v10030_v34 }
 0xad3   : > { %v13849_v51 = vpop.f32.mrf.mxu1 }
 0xad4   : > { %v10979_v58 = vsel %vm1820_vm6, %v17216_v10, -inf }
 0xad5   : > { %v10186_v43 = vpop.f32.mrf.mxu1  ;;  %10980 = vmax.xlane.f32.xlu0 %v10979_v58  ;;  %v17247_v58 = vadd.f32 %v18086_v14, %v10576_v53 }
 0xad6   : > { %v17224_v62 = vadd.f32 %v18081_v1, %v10186_v43  ;;  %v10994_v43 = vsel %vm1820_vm6, %v17237_v18, -inf }
 0xad7   : > { %v13859_v9 = vpop.f32.mrf.mxu1 }
 0xad8   : > { %v10985_v3 = vsel %vm1820_vm6, %v17224_v62, -inf  ;;  %v18087_v9 = vld [vmem:[#allocation95_spill] sm:$0xff] }
 0xad9   : > { %10986 = vmax.xlane.f32.xlu1 %v10985_v3  ;;  %v10342_v63 = vpop.f32.mrf.mxu1  ;;  %10983 = vmax.xlane.f32.xlu0 %v10982_v27  ;;  %v18088_v27 = vld [vmem:[#allocation96_spill] sm:$0xff] }
 0xada   : > { %v17234_v22 = vadd.f32 %v18083_v31, %v10342_v63  ;;  %v17257_v63 = vadd.f32 %v18088_v27, %v10732_v12  ;;  %v11000_v31 = vsel %vm1820_vm6, %v17247_v58, -inf  ;;  %v18093_v27 = vld [vmem:[#allocation26_spill] sm:$0xff] }
 0xadb   : > { %v13869_v32 = vpop.f32.mrf.mxu1 }
 0xadc   : > { %v10991_v37 = vsel %vm1820_vm6, %v17234_v22, -inf }
 0xadd   : > { %10992 = vmax.xlane.f32.xlu1 %v10991_v37  ;;  %v10498_v13 = vpop.f32.mrf.mxu1  ;;  %10989 = vmax.xlane.f32.xlu0 %v10988_v57 }
 0xade   : > { %v17244_v34 = vadd.f32 %v18085_v24, %v10498_v13  ;;  %v18090_v13 = vld [vmem:[#allocation98_spill] sm:$0xff] }
 0xadf   : > { %v13879_v51 = vpop.f32.mrf.mxu1  ;;  %v17267_v24 = vadd.f32 %v18090_v13, %v10888_v45 }
 0xae0   : > { %v10997_v7 = vsel %vm1820_vm6, %v17244_v34, -inf  ;;  %v11006_v51 = vsel %vm1820_vm6, %v17257_v63, -inf }
 0xae1   : > { %10998 = vmax.xlane.f32.xlu1 %v10997_v7  ;;  %v10654_v1 = vpop.f32.mrf.mxu1  ;;  %10995 = vmax.xlane.f32.xlu0 %v10994_v43  ;;  %v18091_v7 = vld [vmem:[#allocation16_spill] sm:$0xff]  ;;  %v11012_v45 = vsel %vm1820_vm6, %v17267_v24, -inf }
 0xae2   : > { %v17254_v16 = vadd.f32 %v18087_v9, %v10654_v1 }
 0xae3   : > { %v13889_v3 = vpop.f32.mrf.mxu1 }
 0xae4   : > { %v11003_v53 = vsel %vm1820_vm6, %v17254_v16, -inf  ;;  %v18092_v3 = vld [vmem:[#allocation25_spill] sm:$0xff] }
 0xae5   : > { %11004 = vmax.xlane.f32.xlu1 %v11003_v53  ;;  %v10810_v32 = vpop.f32.mrf.mxu1  ;;  %11001 = vmax.xlane.f32.xlu0 %v11000_v31  ;;  %v11419_v53 = vpop.permute.xlu0 %11418 }
 0xae6   : > { %v17264_v37 = vadd.f32 %v18089_v6, %v10810_v32 }
 0xae7   : > { %v13899_v57 = vpop.f32.mrf.mxu1 }
 0xae8   : > { %v11009_v12 = vsel %vm1820_vm6, %v17264_v37, -inf  ;;  %v18094_v57 = vld [vmem:[#allocation46_spill] sm:$0xff] }
 0xae9   : > { %11010 = vmax.xlane.f32.xlu1 %v11009_v12  ;;  %v10966_v14 = vpop.f32.mrf.mxu1  ;;  %11007 = vmax.xlane.f32.xlu0 %v11006_v51  ;;  %v17284_v31 = vpop.permute.xlu0 %11570  ;;  %v3149_v13 = vsel %vm1820_vm6, %v18094_v57, 0.0  ;;  %v18095_v12 = vld [vmem:[#allocation45_spill] sm:$0xff]  ;;  %v3155_v57 = vsel %vm1820_vm6, %v18099_v46, 0.0  ;;  %v18102_v46 = vld [vmem:[#allocation55_spill] sm:$0xff] }
 0xaea   : > { %v17274_v43 = vadd.f32 %v18091_v7, %v10966_v14  ;;  %v3146_v51 = vsel %vm1820_vm6, %v18095_v12, 0.0  ;;  %v18096_v14 = vld [vmem:[#allocation49_spill] sm:$0xff] }
 0xaeb   : > { %v13909_v1 = vpop.f32.mrf.mxu1  ;;  %v3161_v7 = vsel %vm1820_vm6, %v18096_v14, 0.0 }
 0xaec   : > { %v11015_v9 = vsel %vm1820_vm6, %v17274_v43, -inf  ;;  %v18097_v1 = vld [vmem:[#allocation47_spill] sm:$0xff] }
 0xaed   : > { %11016 = vmax.xlane.f32.xlu1 %v11015_v9  ;;  %11013 = vmax.xlane.f32.xlu0 %v11012_v45  ;;  %v17286_v32 = vpop.permute.xlu0 %11722  ;;  %v3152_v9 = vsel %vm1820_vm6, %v18097_v1, 0.0  ;;  %v18101_v1 = vld [vmem:[#allocation50_spill] sm:$0xff] }
 0xaee   : > { %v3158_v54 = vsel %vm1820_vm6, %v18101_v1, 0.0  ;;  %v18105_v1 = vld [vmem:[#allocation54_spill] sm:$0xff] }
 0xaf1   : > { %v17288_v6 = vpop.permute.xlu0 %11874 }
 0xaf5   : > { %v17298_v45 = vpop.permute.xlu0 %12026 }
 0xafe   : > { %12254 = vrot.lane.b32.xlu1 %v18092_v3, %s14581_s21  ;;  %v18098_v3 = vld [vmem:[#allocation51_spill] sm:$0xff] }
 0xb03   : > { %12178 = vrot.lane.b32.xlu0 %v18093_v27, %s14581_s21  ;;  %v3167_v27 = vsel %vm1820_vm6, %v18098_v3, 0.0  ;;  %s17763_s21 = scalar_lea.hbm %s17817_s4, %s12849_s9 }
 0xb22   : > { %3150 = vadd.xlane.f32.xlu1 %v3149_v13  ;;  %3147 = vadd.xlane.f32.xlu0 %v3146_v51  ;;  %v18100_v51 = vld [vmem:[#allocation53_spill] sm:$0xff] }
 0xb23   : > { %v3173_v14 = vsel %vm1820_vm6, %v18100_v51, 0.0 }
 0xb26   : > { %3162 = vadd.xlane.f32.xlu1 %v3161_v7  ;;  %3153 = vadd.xlane.f32.xlu0 %v3152_v9 }
 0xb2a   : > { %v10972_v0 = vpop.xlane.xlu0 %10971  ;;  %3168 = vadd.xlane.f32.xlu1 %v3167_v27  ;;  %3156 = vadd.xlane.f32.xlu0 %v3155_v57  ;;  %v3179_v27 = vsel %vm1820_vm6, %v18102_v46, 0.0  ;;  %v18103_v57 = vld [vmem:[#allocation52_spill] sm:$0xff] }
 0xb2b   : > { %v11018_v13 = vsub.f32 %v17199_v21, %v10972_v0  ;;  %v3164_v0 = vsel %vm1820_vm6, %v18103_v57, 0.0  ;;  %v11267_v21 = vpop.permute.xlu1 %11266 }
 0xb2d   : > { %v11034_v12 = vmul.f32 1.442695, %v11018_v13  ;;  %v18104_v13 = vld [vmem:[#allocation57_spill] sm:$0xff] }
 0xb2e   : > { %v10978_v7 = vpop.xlane.xlu0 %10977  ;;  %3174 = vadd.xlane.f32.xlu1 %v3173_v14  ;;  %3159 = vadd.xlane.f32.xlu0 %v3158_v54  ;;  %v3185_v51 = vsel %vm1820_vm6, %v18104_v13, 0.0  ;;  %v3170_v54 = vsel %vm1820_vm6, %v18105_v1, 0.0  ;;  %v18110_v1 = vld [vmem:[#allocation35_spill] sm:$0xff] }
 0xb2f   : > { %14227 = vpow2.f32 %v11034_v12  ;;  %v11020_v9 = vsub.f32 %v17204_v59, %v10978_v7  ;;  %v17318_v59 = vpop.permute.xlu1 %11342  ;;  %v18106_v12 = vld [vmem:[#allocation60_spill] sm:$0xff] }
 0xb30   : > { %v3191_v14 = vsel %vm1820_vm6, %v18106_v12, 0.0  ;;  %v18107_v7 = vld [vmem:[#allocation56_spill] sm:$0xff] }
 0xb31   : > { %v11038_v3 = vmul.f32 1.442695, %v11020_v9  ;;  %v3176_v9 = vsel %vm1820_vm6, %v18107_v7, 0.0  ;;  %v18112_v7 = vld [vmem:[#allocation38_spill] sm:$0xff] }
 0xb32   : > { %3180 = vadd.xlane.f32.xlu1 %v3179_v27  ;;  %3165 = vadd.xlane.f32.xlu0 %v3164_v0  ;;  %v18109_v0 = vld [vmem:[#allocation58_spill] sm:$0xff] }
 0xb33   : > { %14229 = vpow2.f32 %v11038_v3  ;;  %v18108_v3 = vld [vmem:[#allocation36_spill] sm:$0xff]  ;;  %v17330_v57 = vpop.permute.xlu1 %11494  ;;  %v3182_v13 = vsel %vm1820_vm6, %v18109_v0, 0.0 }
 0xb34   : > { %v5741_v27 = vsel %vm1820_vm6, %v18108_v3, 0.0  ;;  %v18113_v3 = vld [vmem:[#allocation34_spill] sm:$0xff] }
 0xb36   : > { %3186 = vadd.xlane.f32.xlu1 %v3185_v51  ;;  %3171 = vadd.xlane.f32.xlu0 %v3170_v54  ;;  %v5747_v54 = vsel %vm1820_vm6, %v18110_v1, 0.0  ;;  %v18115_v1 = vld [vmem:[#allocation33_spill] sm:$0xff] }
 0xb3a   : > { %3192 = vadd.xlane.f32.xlu1 %v3191_v14  ;;  %3177 = vadd.xlane.f32.xlu0 %v3176_v9  ;;  %v17347_v14 = vpop.permute.xlu1 %11646  ;;  %v5753_v9 = vsel %vm1820_vm6, %v18112_v7, 0.0  ;;  %v18117_v7 = vld [vmem:[#allocation37_spill] sm:$0xff] }
 0xb3c   : > { %v17324_v46 = vpop.eup %14227 }
 0xb3d   : > { %13913 = vmatmul.mubr.msk.f32.vlgmr.msra.gmra.mxu0 %vm1820_vm6, %v17324_v46 }
 0xb3e   : > { %13921 = vmatpush3.msra.mxu0 %v11267_v21  ;;  %5742 = vadd.xlane.f32.xlu1 %v5741_v27  ;;  %v18111_v21 = vld [vmem:[#allocation59_spill] sm:$0xff]  ;;  %v5738_v27 = vsel %vm1820_vm6, %v18113_v3, 0.0 }
 0xb3f   : > { %3183 = vadd.xlane.f32.xlu0 %v3182_v13  ;;  %13922 = vmatprep.mubr.msk.f32.mxu0 %vm14584_vm5, %v17954_v47  ;;  %v3188_v12 = vsel %vm1820_vm6, %v18111_v21, 0.0  ;;  %v17356_v13 = vpop.permute.xlu1 %11798  ;;  %v18116_v21 = vld [vmem:[#allocation72_spill] sm:$0xff] }
 0xb40   : > { %v17336_v51 = vpop.eup %14229  ;;  %13930 = vmatprep.subr.mxu0 %v17954_v47 }
 0xb41   : > { %13923 = vmatmul.mubr.msk.f32.vlgmr.msra.gmra.mxu0 %vm1820_vm6, %v17336_v51 }
 0xb42   : > { %13931 = vmatpush3.msra.mxu0 %v11419_v53  ;;  %5748 = vadd.xlane.f32.xlu1 %v5747_v54  ;;  %v18114_v53 = vld [vmem:[#allocation39_spill] sm:$0xff]  ;;  %v5744_v54 = vsel %vm1820_vm6, %v18115_v1, 0.0  ;;  %v18120_v1 = vld [vmem:[#allocation76_spill] sm:$0xff] }
 0xb43   : > { %3189 = vadd.xlane.f32.xlu0 %v3188_v12  ;;  %13932 = vmatprep.mubr.msk.f32.mxu0 %vm14584_vm5, %v17954_v47  ;;  %v5759_v0 = vsel %vm1820_vm6, %v18114_v53, 0.0  ;;  %v5765_v12 = vsel %vm1820_vm6, %v18116_v21, 0.0  ;;  %v17364_v3 = vpop.permute.xlu1 %11950  ;;  %v18121_v21 = vld [vmem:[#allocation73_spill] sm:$0xff] }
 0xb44   : > { %13940 = vmatprep.subr.mxu0 %v17954_v47 }
 0xb46   : > { %5754 = vadd.xlane.f32.xlu1 %v5753_v9  ;;  %v5750_v9 = vsel %vm1820_vm6, %v18117_v7, 0.0  ;;  %v18122_v7 = vld [vmem:[#allocation15_spill] sm:$0xff] }
 0xb47   : > { %5739 = vadd.xlane.f32.xlu0 %v5738_v27  ;;  %v18118_v27 = vld [vmem:[#allocation74_spill] sm:$0xff]  ;;  %v17372_v38 = vpop.permute.xlu1 %12102 }
 0xb48   : > { %v5771_v53 = vsel %vm1820_vm6, %v18118_v27, 0.0  ;;  %v18123_v27 = vld [vmem:[#allocation75_spill] sm:$0xff] }
 0xb4a   : > { %5760 = vadd.xlane.f32.xlu1 %v5759_v0  ;;  %v5756_v0 = vsel %vm1820_vm6, %v18119_v60, 0.0 }
 0xb4b   : > { %5745 = vadd.xlane.f32.xlu0 %v5744_v54  ;;  %v5777_v54 = vsel %vm1820_vm6, %v18120_v1, 0.0  ;;  %v8413_v1 = vsel %vm1820_vm6, %v16958_v33, 0.0 }
 0xb4e   : > { %5766 = vadd.xlane.f32.xlu1 %v5765_v12  ;;  %v5762_v12 = vsel %vm1820_vm6, %v18121_v21, 0.0 }
 0xb4f   : > { %5751 = vadd.xlane.f32.xlu0 %v5750_v9  ;;  %v5783_v9 = vsel %vm1820_vm6, %v18122_v7, 0.0 }
 0xb52   : > { %5772 = vadd.xlane.f32.xlu1 %v5771_v53  ;;  %v5768_v53 = vsel %vm1820_vm6, %v18123_v27, 0.0  ;;  %v8419_v27 = vsel %vm1820_vm6, %v16968_v8, 0.0  ;;  %v8410_v8 = vsel %vm1820_vm6, %v16901_v26, 0.0 }
 0xb53   : > { %5757 = vadd.xlane.f32.xlu0 %v5756_v0 }
 0xb56   : > { %5778 = vadd.xlane.f32.xlu1 %v5777_v54  ;;  %v18124_v54 = vld [vmem:[#allocation77_spill] sm:$0xff] }
 0xb57   : > { %5763 = vadd.xlane.f32.xlu0 %v5762_v12  ;;  %v5774_v21 = vsel %vm1820_vm6, %v18124_v54, 0.0 }
 0xb5a   : > { %v10975_v23 = vpop.xlane.xlu1 %10974  ;;  %5784 = vadd.xlane.f32.xlu1 %v5783_v9 }
 0xb5b   : > { %v11019_v60 = vsub.f32 %v17211_v49, %v10975_v23  ;;  %5769 = vadd.xlane.f32.xlu0 %v5768_v53  ;;  %v18125_v23 = vld [vmem:[#allocation78_spill] sm:$0xff] }
 0xb5c   : > { %v5780_v49 = vsel %vm1820_vm6, %v18125_v23, 0.0 }
 0xb5d   : > { %v11036_v0 = vmul.f32 1.442695, %v11019_v60 }
 0xb5e   : > { %8414 = vadd.xlane.f32.xlu1 %v8413_v1  ;;  %v10981_v12 = vpop.xlane.xlu0 %10980 }
 0xb5f   : > { %14231 = vpow2.f32 %v11036_v0  ;;  %5775 = vadd.xlane.f32.xlu0 %v5774_v21  ;;  %v11021_v7 = vsub.f32 %v17216_v10, %v10981_v12  ;;  %v8425_v10 = vsel %vm1820_vm6, %v16978_v11, 0.0  ;;  %v8416_v11 = vsel %vm1820_vm6, %v16912_v20, 0.0 }
 0xb61   : > { %v11040_v9 = vmul.f32 1.442695, %v11021_v7  ;;  %v8431_v7 = vsel %vm1820_vm6, %v16991_v42, 0.0  ;;  %v8437_v42 = vsel %vm1820_vm6, %v17007_v41, 0.0 }
 0xb62   : > { %v10987_v28 = vpop.xlane.xlu1 %10986  ;;  %8420 = vadd.xlane.f32.xlu1 %v8419_v27  ;;  %v10984_v53 = vpop.xlane.xlu0 %10983 }
 0xb63   : > { %14233 = vpow2.f32 %v11040_v9  ;;  %v11023_v33 = vsub.f32 %v17224_v62, %v10987_v28  ;;  %5781 = vadd.xlane.f32.xlu0 %v5780_v49  ;;  %v11022_v60 = vsub.f32 %v17219_v30, %v10984_v53 }
 0xb65   : > { %v11044_v0 = vmul.f32 1.442695, %v11023_v33  ;;  %v11042_v1 = vmul.f32 1.442695, %v11022_v60 }
 0xb66   : > { %v10993_v54 = vpop.xlane.xlu1 %10992  ;;  %8426 = vadd.xlane.f32.xlu1 %v8425_v10  ;;  %v10990_v21 = vpop.xlane.xlu0 %10989 }
 0xb67   : > { %14235 = vpow2.f32 %v11044_v0  ;;  %v11025_v12 = vsub.f32 %v17234_v22, %v10993_v54  ;;  %8411 = vadd.xlane.f32.xlu0 %v8410_v8  ;;  %v11024_v28 = vsub.f32 %v17227_v19, %v10990_v21 }
 0xb68   : > { %14237 = vpow2.f32 %v11042_v1 }
 0xb69   : > { %v11048_v62 = vmul.f32 1.442695, %v11025_v12  ;;  %v11046_v30 = vmul.f32 1.442695, %v11024_v28  ;;  %v8434_v12 = vsel %vm1820_vm6, %v17012_v40, 0.0  ;;  %v8455_v40 = vsel %vm1820_vm6, %v17114_v4, 0.0 }
 0xb6a   : > { %v10999_v9 = vpop.xlane.xlu1 %10998  ;;  %8432 = vadd.xlane.f32.xlu1 %v8431_v7  ;;  %v10996_v27 = vpop.xlane.xlu0 %10995 }
 0xb6b   : > { %14239 = vpow2.f32 %v11048_v62  ;;  %v11027_v26 = vsub.f32 %v17244_v34, %v10999_v9  ;;  %8417 = vadd.xlane.f32.xlu0 %v8416_v11  ;;  %v11026_v22 = vsub.f32 %v17237_v18, %v10996_v27  ;;  %v8422_v34 = vsel %vm1820_vm6, %v16980_v35, 0.0 }
 0xb6c   : > { %v17404_v23 = vpop.eup %14231  ;;  %14241 = vpow2.f32 %v11046_v30  ;;  %v8443_v35 = vsel %vm1820_vm6, %v17023_v48, 0.0  ;;  %v11066_v9 = vsel %vm1820_vm6, %v17324_v46, 0.0  ;;  %v11072_v46 = vsel %vm1820_vm6, %v17336_v51, 0.0 }
 0xb6d   : > { %v11052_v19 = vmul.f32 1.442695, %v11027_v26  ;;  %v11050_v49 = vmul.f32 1.442695, %v11026_v22  ;;  %13918 = vmatmul.mubr.msk.f32.vlgmr.msra.gmra.mxu1 %vm1820_vm6, %v17404_v23 }
 0xb6e   : > { %13926 = vmatpush3.msra.mxu1 %v17318_v59  ;;  %v11005_v20 = vpop.xlane.xlu1 %11004  ;;  %8438 = vadd.xlane.f32.xlu1 %v8437_v42  ;;  %v11002_v53 = vpop.xlane.xlu0 %11001 }
 0xb6f   : > { %14243 = vpow2.f32 %v11052_v19  ;;  %v11029_v18 = vsub.f32 %v17254_v16, %v11005_v20  ;;  %8423 = vadd.xlane.f32.xlu0 %v8422_v34  ;;  %v11028_v33 = vsub.f32 %v17247_v58, %v11002_v53  ;;  %13927 = vmatprep.mubr.msk.f32.mxu1 %vm14584_vm5, %v17954_v47  ;;  %v8428_v58 = vsel %vm1820_vm6, %v16996_v17, 0.0 }
 0xb70   : > { %v17417_v60 = vpop.eup %14233  ;;  %14245 = vpow2.f32 %v11050_v49  ;;  %13935 = vmatprep.subr.mxu1 %v17954_v47 }
 0xb71   : > { %v11056_v41 = vmul.f32 1.442695, %v11029_v18  ;;  %v11054_v59 = vmul.f32 1.442695, %v11028_v33  ;;  %13928 = vmatmul.mubr.msk.f32.vlgmr.msra.gmra.mxu1 %vm1820_vm6, %v17417_v60 }
 0xb72   : > { %13936 = vmatpush3.msra.mxu1 %v17330_v57  ;;  %v11011_v16 = vpop.xlane.xlu1 %11010  ;;  %8444 = vadd.xlane.f32.xlu1 %v8443_v35  ;;  %v11008_v0 = vpop.xlane.xlu0 %11007 }
 0xb73   : > { %v11031_v1 = vsub.f32 %v17264_v37, %v11011_v16  ;;  %8429 = vadd.xlane.f32.xlu0 %v8428_v58  ;;  %v11030_v10 = vsub.f32 %v17257_v63, %v11008_v0  ;;  %13937 = vmatprep.mubr.msk.f32.mxu1 %vm14584_vm5, %v17954_v47  ;;  %14247 = vpow2.f32 %v11054_v59  ;;  %v8449_v37 = vsel %vm1820_vm6, %v17039_v29, 0.0 }
 0xb74   : > { %v17431_v54 = vpop.eup %14235  ;;  %13945 = vmatprep.subr.mxu1 %v17954_v47  ;;  %14249 = vpow2.f32 %v11056_v41 }
 0xb75   : > { %v17434_v48 = vpop.eup %14237  ;;  %v11058_v57 = vmul.f32 1.442695, %v11030_v10  ;;  %13938 = vmatmul.mubr.msk.f32.vlgmr.msra.gmra.mxu1 %vm1820_vm6, %v17431_v54  ;;  %v11060_v17 = vmul.f32 1.442695, %v11031_v1  ;;  %v11081_v27 = vsel %vm1820_vm6, %v17431_v54, 0.0 }
 0xb76   : > { %13933 = vmatmul.mubr.msk.f32.vlgmr.msra.gmra.mxu0 %vm1820_vm6, %v17434_v48  ;;  %13946 = vmatpush3.msra.mxu1 %v17347_v14  ;;  %v11017_v63 = vpop.xlane.xlu1 %11016  ;;  %v11014_v8 = vpop.xlane.xlu0 %11013  ;;  %v11078_v22 = vsel %vm1820_vm6, %v17434_v48, 0.0 }
 0xb77   : > { %13941 = vmatpush3.msra.mxu0 %v17284_v31  ;;  %v11033_v21 = vsub.f32 %v17274_v43, %v11017_v63  ;;  %8450 = vadd.xlane.f32.xlu1 %v8449_v37  ;;  %v11032_v28 = vsub.f32 %v17267_v24, %v11014_v8  ;;  %14251 = vpow2.f32 %v11058_v57  ;;  %v8440_v31 = vsel %vm1820_vm6, %v17028_v25, 0.0 }
 0xb78   : > { %v17448_v62 = vpop.eup %14239  ;;  %8435 = vadd.xlane.f32.xlu0 %v8434_v12  ;;  %13942 = vmatprep.mubr.msk.f32.mxu0 %vm14584_vm5, %v17954_v47  ;;  %14253 = vpow2.f32 %v11060_v17  ;;  %v11069_v25 = vsel %vm1820_vm6, %v17404_v23, 0.0 }
 0xb79   : > { %v17452_v14 = vpop.eup %14241  ;;  %v11062_v29 = vmul.f32 1.442695, %v11032_v28  ;;  %13947 = vmatprep.mubr.msk.f32.mxu1 %vm14584_vm5, %v17954_v47  ;;  %13950 = vmatprep.subr.mxu0 %v17954_v47  ;;  %v11064_v43 = vmul.f32 1.442695, %v11033_v21  ;;  %v11087_v26 = vsel %vm1820_vm6, %v17448_v62, 0.0 }
 0xb7a   : > { %13955 = vmatprep.subr.mxu1 %v17954_v47  ;;  %13943 = vmatmul.mubr.msk.f32.vlgmr.msra.gmra.mxu0 %vm1820_vm6, %v17452_v14 }
 0xb7b   : > { %13948 = vmatmul.mubr.msk.f32.vlgmr.msra.gmra.mxu1 %vm1820_vm6, %v17448_v62  ;;  %13951 = vmatpush3.msra.mxu0 %v17286_v32  ;;  %14255 = vpow2.f32 %v11062_v29  ;;  %v8446_v32 = vsel %vm1820_vm6, %v17044_v5, 0.0  ;;  %v8452_v5 = vsel %vm1820_vm6, %v17055_v52, 0.0 }
 0xb7c   : > { %v14244_v24 = vpop.eup %14243  ;;  %13956 = vmatpush3.msra.mxu1 %v17356_v13  ;;  %8456 = vadd.xlane.f32.xlu1 %v8455_v40  ;;  %14257 = vpow2.f32 %v11064_v43 }
 0xb7d   : > { %v17468_v30 = vpop.eup %14245  ;;  %8441 = vadd.xlane.f32.xlu0 %v8440_v31  ;;  %13952 = vmatprep.mubr.msk.f32.mxu0 %vm14584_vm5, %v17954_v47  ;;  %v11093_v23 = vsel %vm1820_vm6, %v14244_v24, 0.0 }
 0xb7e   : > { %13957 = vmatprep.mubr.msk.f32.mxu1 %vm14584_vm5, %v17954_v47  ;;  %13960 = vmatprep.subr.mxu0 %v17954_v47  ;;  %v11090_v51 = vsel %vm1820_vm6, %v17468_v30, 0.0 }
 0xb7f   : > { %13965 = vmatprep.subr.mxu1 %v17954_v47  ;;  %13953 = vmatmul.mubr.msk.f32.vlgmr.msra.gmra.mxu0 %vm1820_vm6, %v17468_v30 }
 0xb80   : > { %13958 = vmatmul.mubr.msk.f32.vlgmr.msra.gmra.mxu1 %vm1820_vm6, %v14244_v24  ;;  %13961 = vmatpush3.msra.mxu0 %v17288_v6  ;;  %v14248_v4 = vpop.eup %14247 }
 0xb81   : > { %13966 = vmatpush3.msra.mxu1 %v17364_v3  ;;  %11070 = vadd.xlane.f32.xlu1 %v11069_v25  ;;  %v14250_v13 = vpop.eup %14249  ;;  %v11075_v3 = vsel %vm1820_vm6, %v17417_v60, 0.0  ;;  %v11096_v42 = vsel %vm1820_vm6, %v14248_v4, 0.0 }
 0xb82   : > { %8447 = vadd.xlane.f32.xlu0 %v8446_v32  ;;  %13962 = vmatprep.mubr.msk.f32.mxu0 %vm14584_vm5, %v17954_v47  ;;  %v11099_v19 = vsel %vm1820_vm6, %v14250_v13, 0.0 }
 0xb83   : > { %13967 = vmatprep.mubr.msk.f32.mxu1 %vm14584_vm5, %v17954_v47  ;;  %13970 = vmatprep.subr.mxu0 %v17954_v47 }
 0xb84   : > { %13975 = vmatprep.subr.mxu1 %v17954_v47  ;;  %13963 = vmatmul.mubr.msk.f32.vlgmr.msra.gmra.mxu0 %vm1820_vm6, %v14248_v4  ;;  %v14252_v6 = vpop.eup %14251 }
 0xb85   : > { %13968 = vmatmul.mubr.msk.f32.vlgmr.msra.gmra.mxu1 %vm1820_vm6, %v14250_v13  ;;  %13971 = vmatpush3.msra.mxu0 %v17298_v45  ;;  %v14254_v7 = vpop.eup %14253  ;;  %v12179_v45 = vpop.permute.xlu0 %12178  ;;  %v11102_v34 = vsel %vm1820_vm6, %v14252_v6, 0.0 }
 0xb86   : > { %13976 = vmatpush3.msra.mxu1 %v17372_v38  ;;  %8453 = vadd.xlane.f32.xlu0 %v8452_v5  ;;  %v12255_v38 = vpop.permute.xlu1 %12254  ;;  %v11105_v49 = vsel %vm1820_vm6, %v14254_v7, 0.0 }
 0xb87   : > { %11076 = vadd.xlane.f32.xlu1 %v11075_v3  ;;  %13972 = vmatprep.mubr.msk.f32.mxu0 %vm14584_vm5, %v17954_v47 }
 0xb88   : > { %13977 = vmatprep.mubr.msk.f32.mxu1 %vm14584_vm5, %v17954_v47  ;;  %13980 = vmatprep.subr.mxu0 %v17954_v47  ;;  %v14256_v52 = vpop.eup %14255 }
 0xb89   : > { %13985 = vmatprep.subr.mxu1 %v17954_v47  ;;  %13973 = vmatmul.mubr.msk.f32.vlgmr.msra.gmra.mxu0 %vm1820_vm6, %v14252_v6  ;;  %v14258_v11 = vpop.eup %14257  ;;  %v11108_v53 = vsel %vm1820_vm6, %v14256_v52, 0.0  ;;  %v18126_v6 = vld [vmem:[#allocation44_spill] sm:$0xff] }
 0xb8a   : > { %13978 = vmatmul.mubr.msk.f32.vlgmr.msra.gmra.mxu1 %vm1820_vm6, %v14254_v7  ;;  %13981 = vmatpush3.msra.mxu0 %v12179_v45  ;;  %v11111_v20 = vsel %vm1820_vm6, %v14258_v11, 0.0  ;;  %v18127_v7 = vld [vmem:[#allocation31_spill] sm:$0xff] }
 0xb8b   : > { %13986 = vmatpush3.msra.mxu1 %v12255_v38  ;;  %11067 = vadd.xlane.f32.xlu0 %v11066_v9 }
 0xb8c   : > { %11082 = vadd.xlane.f32.xlu1 %v11081_v27  ;;  %13982 = vmatprep.mubr.msk.f32.mxu0 %vm14584_vm5, %v17954_v47 }
 0xb8d   : > { %13987 = vmatprep.mubr.msk.f32.mxu1 %vm14584_vm5, %v17954_v47  ;;  %13983 = vmatmul.mubr.msk.f32.vlgmr.msra.gmra.mxu0 %vm1820_vm6, %v14256_v52  ;;  %v11084_v47 = vsel %vm1820_vm6, %v17452_v14, 0.0 }
 0xb8e   : > { %13988 = vmatmul.mubr.msk.f32.vlgmr.msra.gmra.mxu1 %vm1820_vm6, %v14258_v11 }
 0xb8f   : > { %11073 = vadd.xlane.f32.xlu0 %v11072_v46  ;;  %v18128_v46 = vld [vmem:[#allocation66_spill] sm:$0xff] }
 0xb90   : > { %11088 = vadd.xlane.f32.xlu1 %v11087_v26 }
 0xb93   : > { %11079 = vadd.xlane.f32.xlu0 %v11078_v22  ;;  %v18129_v22 = vld [vmem:[#allocation83_spill] sm:$0xff] }
 0xb94   : > { %11094 = vadd.xlane.f32.xlu1 %v11093_v23 }
 0xb97   : > { %11085 = vadd.xlane.f32.xlu0 %v11084_v47 }
 0xb98   : > { %11100 = vadd.xlane.f32.xlu1 %v11099_v19 }
 0xb9b   : > { %11091 = vadd.xlane.f32.xlu0 %v11090_v51  ;;  %v18130_v51 = vld [vmem:[#allocation63_spill] sm:$0xff] }
 0xb9c   : > { %11106 = vadd.xlane.f32.xlu1 %v11105_v49 }
 0xb9f   : > { %11097 = vadd.xlane.f32.xlu0 %v11096_v42  ;;  %v18131_v42 = vld [vmem:[#allocation30_spill] sm:$0xff] }
 0xba0   : > { %11112 = vadd.xlane.f32.xlu1 %v11111_v20 }
 0xba3   : > { %11103 = vadd.xlane.f32.xlu0 %v11102_v34 }
 0xba7   : > { %11109 = vadd.xlane.f32.xlu0 %v11108_v53 }
 0xbab   : > { %v17534_v18 = vpop.xlane.xlu1 %3150  ;;  %v17536_v33 = vpop.xlane.xlu0 %3147 }
 0xbaf   : > { %v17538_v60 = vpop.xlane.xlu1 %3162  ;;  %v17540_v41 = vpop.xlane.xlu0 %3153 }
 0xbb3   : > { %v17542_v59 = vpop.xlane.xlu1 %3168  ;;  %v17544_v35 = vpop.xlane.xlu0 %3156 }
 0xbb7   : > { %v17546_v16 = vpop.xlane.xlu1 %3174  ;;  %v3160_v58 = vpop.xlane.xlu0 %3159 }
 0xbb8   : > { %14259 = vrcp.f32 %v3160_v58 }
 0xbbb   : > { %v3181_v0 = vpop.xlane.xlu1 %3180  ;;  %v3166_v1 = vpop.xlane.xlu0 %3165 }
 0xbbf   : > { %v3187_v10 = vpop.xlane.xlu1 %3186  ;;  %v3172_v54 = vpop.xlane.xlu0 %3171 }
 0xbc3   : > { %v3193_v48 = vpop.xlane.xlu1 %3192  ;;  %v3178_v57 = vpop.xlane.xlu0 %3177 }
 0xbc5   : > { %v14260_v25 = vpop.eup %14259 }
 0xbc6   : > { %v4382_v3 = vmul.f32 %v14260_v25, %v18126_v6 }
 0xbc7   : > { %v17548_v17 = vpop.xlane.xlu1 %5742 }
 0xbc8   : > { %v3184_v63 = vpop.xlane.xlu0 %3183 }
 0xbcb   : > { %v17550_v37 = vpop.xlane.xlu1 %5748 }
 0xbcc   : > { %v3190_v8 = vpop.xlane.xlu0 %3189 }
 0xbcf   : > { %v17552_v21 = vpop.xlane.xlu1 %5754 }
 0xbd0   : > { %v17554_v12 = vpop.xlane.xlu0 %5739 }
 0xbd3   : > { %v17556_v28 = vpop.xlane.xlu1 %5760 }
 0xbd4   : > { %v17558_v62 = vpop.xlane.xlu0 %5745 }
 0xbd7   : > { %v17560_v14 = vpop.xlane.xlu1 %5766 }
 0xbd8   : > { %v5752_v29 = vpop.xlane.xlu0 %5751 }
 0xbd9   : > { %14261 = vrcp.f32 %v5752_v29  ;;  %v18134_v29 = vld [vmem:[#allocation65_spill] sm:$0xff] }
 0xbda   : > { %14263 = vrcp.f32 %v3181_v0 }
 0xbdb   : > { %14265 = vrcp.f32 %v3166_v1  ;;  %v5773_v43 = vpop.xlane.xlu1 %5772 }
 0xbdc   : > { %14267 = vrcp.f32 %v5773_v43  ;;  %v5758_v40 = vpop.xlane.xlu0 %5757 }
 0xbdd   : > { %14269 = vrcp.f32 %v5758_v40  ;;  %v18135_v40 = vld [vmem:[#allocation80_spill] sm:$0xff] }
 0xbde   : > { %14271 = vrcp.f32 %v3187_v10 }
 0xbdf   : > { %14273 = vrcp.f32 %v3172_v54  ;;  %v5779_v24 = vpop.xlane.xlu1 %5778  ;;  %v18132_v54 = vld [vmem:[#allocation68_spill] sm:$0xff] }
 0xbe0   : > { %14275 = vrcp.f32 %v5779_v24  ;;  %v5764_v31 = vpop.xlane.xlu0 %5763 }
 0xbe1   : > { %14277 = vrcp.f32 %v5764_v31 }
 0xbe2   : > { %14279 = vrcp.f32 %v3193_v48 }
 0xbe3   : > { %14281 = vrcp.f32 %v3178_v57  ;;  %v5785_v30 = vpop.xlane.xlu1 %5784  ;;  %v18133_v57 = vld [vmem:[#allocation85_spill] sm:$0xff] }
 0xbe4   : > { %14283 = vrcp.f32 %v5785_v30  ;;  %v5770_v4 = vpop.xlane.xlu0 %5769 }
 0xbe5   : > { %14285 = vrcp.f32 %v5770_v4 }
 0xbe6   : > { %v14262_v32 = vpop.eup %14261  ;;  %14287 = vrcp.f32 %v3184_v63 }
 0xbe7   : > { %v14264_v13 = vpop.eup %14263  ;;  %v17562_v5 = vpop.xlane.xlu1 %8414  ;;  %v7038_v45 = vmul.f32 %v14262_v32, %v18127_v7 }
 0xbe8   : > { %v14266_v52 = vpop.eup %14265  ;;  %v5776_v38 = vpop.xlane.xlu0 %5775  ;;  %v4389_v26 = vmul.f32 %v14264_v13, %v18128_v46 }
 0xbe9   : > { %v14268_v9 = vpop.eup %14267  ;;  %14289 = vrcp.f32 %v5776_v38  ;;  %v17566_v11 = vadd.f32 %v7038_v45, %v4382_v3  ;;  %v4384_v49 = vmul.f32 %v14266_v52, %v18130_v51  ;;  %v18136_v3 = vld [vmem:[#allocation21_spill] sm:$0xff]  ;;  %v18137_v45 = vld [vmem:[#allocation87_spill] sm:$0xff] }
 0xbea   : > { %v14270_v27 = vpop.eup %14269  ;;  %v7045_v23 = vmul.f32 %v14268_v9, %v18129_v22  ;;  %14291 = vrcp.f32 %v3190_v8  ;;  %v18138_v38 = vld [vmem:[#allocation67_spill] sm:$0xff] }
 0xbeb   : > { %v14272_v47 = vpop.eup %14271  ;;  %v17570_v19 = vpop.xlane.xlu1 %8420  ;;  %v7040_v20 = vmul.f32 %v14270_v27, %v18131_v42  ;;  %v18139_v27 = vld [vmem:[#allocation82_spill] sm:$0xff]  ;;  %v18140_v42 = vld [vmem:[#allocation69_spill] sm:$0xff] }
 0xbec   : > { %v14274_v34 = vpop.eup %14273  ;;  %v5782_v53 = vpop.xlane.xlu0 %5781  ;;  %v17574_v58 = vadd.f32 %v7045_v23, %v4389_v26  ;;  %v4391_v48 = vmul.f32 %v14272_v47, %v18132_v54 }
 0xbed   : > { %v14276_v0 = vpop.eup %14275  ;;  %14293 = vrcp.f32 %v5782_v53  ;;  %v17576_v1 = vadd.f32 %v7040_v20, %v4384_v49  ;;  %v4386_v43 = vmul.f32 %v14274_v34, %v18134_v29  ;;  %v18141_v34 = vld [vmem:[#allocation84_spill] sm:$0xff] }
 0xbee   : > { %v14278_v10 = vpop.eup %14277  ;;  %v7047_v63 = vmul.f32 %v14276_v0, %v18133_v57  ;;  %v18142_v57 = vld [vmem:[#allocation70_spill] sm:$0xff]  ;;  %14295 = vrcp.f32 %v17554_v12 }
 0xbef   : > { %v14280_v8 = vpop.eup %14279  ;;  %v7042_v24 = vmul.f32 %v14278_v10, %v18135_v40  ;;  %v17582_v30 = vpop.xlane.xlu1 %8426  ;;  %14297 = vrcp.f32 %v17536_v33 }
 0xbf0   : > { %v14282_v31 = vpop.eup %14281  ;;  %v8412_v25 = vpop.xlane.xlu0 %8411  ;;  %v17584_v4 = vadd.f32 %v7047_v63, %v4391_v48  ;;  %v4393_v7 = vmul.f32 %v14280_v8, %v18136_v3  ;;  %v18143_v8 = vld [vmem:[#allocation86_spill] sm:$0xff] }
 0xbf1   : > { %v14284_v32 = vpop.eup %14283  ;;  %v17586_v13 = vadd.f32 %v7042_v24, %v4386_v43  ;;  %v4388_v9 = vmul.f32 %v14282_v31, %v18138_v38  ;;  %14299 = vrcp.f32 %v8412_v25 }
 0xbf2   : > { %v14286_v6 = vpop.eup %14285  ;;  %v7049_v52 = vmul.f32 %v14284_v32, %v18137_v45  ;;  %14301 = vrcp.f32 %v17558_v62  ;;  %v18144_v62 = vld [vmem:[#allocation27_spill] sm:$0xff] }
 0xbf3   : > { %v7044_v46 = vmul.f32 %v14286_v6, %v18139_v27  ;;  %v14288_v26 = vpop.eup %14287  ;;  %v17596_v49 = vpop.xlane.xlu1 %8432  ;;  %14303 = vrcp.f32 %v17540_v41 }
 0xbf4   : > { %v8418_v22 = vpop.xlane.xlu0 %8417  ;;  %v17592_v23 = vadd.f32 %v7049_v52, %v4393_v7  ;;  %v4390_v20 = vmul.f32 %v14288_v26, %v18140_v42 }
 0xbf5   : > { %v17594_v47 = vadd.f32 %v7044_v46, %v4388_v9  ;;  %14305 = vrcp.f32 %v8418_v22 }
 0xbf6   : > { %v14290_v51 = vpop.eup %14289 }
 0xbf7   : > { %v7046_v53 = vmul.f32 %v14290_v51, %v18141_v34  ;;  %v14292_v0 = vpop.eup %14291  ;;  %v17604_v43 = vpop.xlane.xlu1 %8438 }
 0xbf8   : > { %v8424_v10 = vpop.xlane.xlu0 %8423  ;;  %v4392_v63 = vmul.f32 %v14292_v0, %v18142_v57  ;;  %v18147_v57 = vld [vmem:[#allocation42_spill] sm:$0xff] }
 0xbf9   : > { %v17600_v54 = vadd.f32 %v7046_v53, %v4390_v20 }
 0xbfa   : > { %v14294_v48 = vpop.eup %14293 }
 0xbfb   : > { %v7048_v29 = vmul.f32 %v14294_v48, %v18143_v8  ;;  %v17614_v7 = vpop.xlane.xlu1 %8444  ;;  %v14296_v12 = vpop.eup %14295 }
 0xbfc   : > { %v17606_v40 = vpop.xlane.xlu0 %8429  ;;  %v14298_v42 = vpop.eup %14297 }
 0xbfd   : > { %v11186_v24 = vpop.f32.mrf.mxu0  ;;  %v17608_v31 = vadd.f32 %v7048_v29, %v4392_v63 }
 0xbfe   : > { %v14300_v41 = vpop.eup %14299 }
 0xbff   : > { %v13914_v32 = vpop.f32.mrf.mxu0  ;;  %v14302_v22 = vpop.eup %14301 }
 0xc00   : > { %v17618_v38 = vpop.xlane.xlu1 %8450 }
 0xc01   : > { %v17610_v6 = vpop.xlane.xlu0 %8435  ;;  %v17612_v3 = vpop.f32.mrf.mxu0 }
 0xc03   : > { %v13924_v45 = vpop.f32.mrf.mxu0 }
 0xc05   : > { %v17624_v27 = vpop.xlane.xlu1 %8456 }
 0xc06   : > { %v17616_v52 = vpop.xlane.xlu0 %8441 }
 0xc0a   : > { %v11071_v26 = vpop.xlane.xlu1 %11070 }
 0xc0b   : > { %v17620_v9 = vpop.xlane.xlu0 %8447 }
 0xc0f   : > { %v17626_v46 = vpop.xlane.xlu0 %8453 }
 0xc10   : > { %v11077_v25 = vpop.xlane.xlu1 %11076 }
 0xc14   : > { %v11068_v51 = vpop.xlane.xlu0 %11067 }
 0xc15   : > { %14307 = vrcp.f32 %v11068_v51 }
 0xc16   : > { %14309 = vrcp.f32 %v17534_v18  ;;  %v7034_v18 = vmul.f32 %v14296_v12, %v18144_v62  ;;  %v18149_v62 = vld [vmem:[#allocation14_spill] sm:$0xff] }
 0xc17   : > { %14311 = vrcp.f32 %v17538_v60  ;;  %v14304_v60 = vpop.eup %14303 }
 0xc18   : > { %14313 = vrcp.f32 %v17548_v17  ;;  %v11074_v33 = vpop.xlane.xlu0 %11073  ;;  %v18145_v17 = vld [vmem:[#allocation40_spill] sm:$0xff]  ;;  %v14306_v53 = vpop.eup %14305  ;;  %v4380_v63 = vmul.f32 %v14304_v60, %v18147_v57 }
 0xc19   : > { %14315 = vrcp.f32 %v11074_v33  ;;  %v4378_v20 = vmul.f32 %v14298_v42, %v18145_v17 }
 0xc1a   : > { %14317 = vrcp.f32 %v17562_v5  ;;  %v9690_v5 = vmul.f32 %v14300_v41, %v17168_v15 }
 0xc1b   : > { %14319 = vrcp.f32 %v17542_v59  ;;  %v11083_v59 = vpop.xlane.xlu1 %11082  ;;  %v7050_v0 = vadd.f32 %v7034_v18, %v4378_v20 }
 0xc1c   : > { %14321 = vrcp.f32 %v17550_v37  ;;  %v11080_v34 = vpop.xlane.xlu0 %11079  ;;  %v18146_v37 = vld [vmem:[#allocation22_spill] sm:$0xff] }
 0xc1d   : > { %14323 = vrcp.f32 %v17544_v35  ;;  %v7036_v48 = vmul.f32 %v14302_v22, %v18146_v37  ;;  %v9706_v8 = vadd.f32 %v9690_v5, %v7050_v0  ;;  %v18151_v0 = vld [vmem:[#allocation29_spill] sm:$0xff] }
 0xc1e   : > { %14325 = vrcp.f32 %v17570_v19 }
 0xc1f   : > { %14327 = vrcp.f32 %v17552_v21  ;;  %v9692_v21 = vmul.f32 %v14306_v53, %v17170_v39  ;;  %v7052_v45 = vadd.f32 %v7036_v48, %v4380_v63  ;;  %v11089_v33 = vpop.xlane.xlu1 %11088  ;;  %v14404_v39 = vld [vmem:[%s14792_s28] sm:$0xff] }
 0xc20   : > { %14329 = vrcp.f32 %v11071_v26 }
 0xc21   : > { %14331 = vrcp.f32 %v17582_v30  ;;  %v11086_v30 = vpop.xlane.xlu0 %11085  ;;  %v9708_v12 = vadd.f32 %v9692_v21, %v7052_v45 }
 0xc22   : > { %v14308_v35 = vpop.eup %14307  ;;  %14333 = vrcp.f32 %v17556_v28 }
 0xc23   : > { %v14310_v19 = vpop.eup %14309  ;;  %14335 = vrcp.f32 %v8424_v10  ;;  %v12346_v15 = vmul.f32 %v14308_v35, %v11186_v24  ;;  %v18152_v35 = vld [vmem:[#allocation43_spill] sm:$0xff] }
 0xc24   : > { %v14312_v29 = vpop.eup %14311  ;;  %14337 = vrcp.f32 %v11077_v25 }
 0xc25   : > { %v14314_v32 = vpop.eup %14313  ;;  %14339 = vrcp.f32 %v17560_v14  ;;  %v12362_v26 = vadd.f32 %v12346_v15, %v9706_v8  ;;  %v18148_v14 = vld [vmem:[#allocation28_spill] sm:$0xff]  ;;  %v11092_v53 = vpop.xlane.xlu0 %11091 }
 0xc26   : > { %v14316_v51 = vpop.eup %14315  ;;  %14341 = vrcp.f32 %v17596_v49  ;;  %v7035_v42 = vmul.f32 %v14314_v32, %v18148_v14  ;;  %v18153_v32 = vld [vmem:[#allocation32_spill] sm:$0xff] }
 0xc27   : > { %v14318_v28 = vpop.eup %14317  ;;  %14343 = vrcp.f32 %v17606_v40  ;;  %v12378_v10 = vadd.f32 %v14404_v39, %v12362_v26  ;;  %v12348_v24 = vmul.f32 %v14316_v51, %v17612_v3  ;;  %v18150_v40 = vld [vmem:[#allocation41_spill] sm:$0xff]  ;;  %v14405_v3 = vld [vmem:[%s14792_s28 + $0x10] sm:$0xff] }
 0xc28   : > { %v17652_v25 = vpop.eup %14319  ;;  %14345 = vrcp.f32 %v11083_v59  ;;  %v4379_v60 = vmul.f32 %v14310_v19, %v18150_v40  ;;  %v9691_v17 = vmul.f32 %v14318_v28, %v17172_v56  ;;  %v18154_v39 = vld [vmem:[#allocation61_spill] sm:$0xff] }
 0xc29   : > { %v14322_v41 = vpop.eup %14321  ;;  %v12394_v18 = vadd.f32 %v12378_v10, %v18149_v62  ;;  %v12364_v49 = vadd.f32 %v12348_v24, %v9708_v12  ;;  %14347 = vrcp.f32 %v11080_v34  ;;  %v4383_v10 = vmul.f32 %v14312_v29, %v18154_v39 }
 0xc2a   : > { %v14324_v22 = vpop.eup %14323  ;;  %14349 = vrcp.f32 %v17546_v16  ;;  %v11095_v16 = vpop.xlane.xlu1 %11094  ;;  %v7051_v34 = vadd.f32 %v7035_v42, %v4379_v60  ;;  %v7037_v37 = vmul.f32 %v14322_v41, %v18151_v0  ;;  %v14406_v42 = vld [vmem:[%s14792_s28 + $0x8] sm:$0xff] }
 0xc2b   : > { %v14326_v20 = vpop.eup %14325  ;;  %14351 = vrcp.f32 %v17604_v43  ;;  %12410 = vst.msk [vmem:[%s17661_s6] sm:$0xff] %vm865_vm1, %v12394_v18  ;;  %v12380_v5 = vadd.f32 %v14405_v3, %v12364_v49  ;;  %v4381_v57 = vmul.f32 %v14324_v22, %v18152_v35 }
 0xc2c   : > { %v14328_v59 = vpop.eup %14327  ;;  %14353 = vrcp.f32 %v17610_v6  ;;  %v9707_v19 = vadd.f32 %v9691_v17, %v7051_v34  ;;  %v9693_v21 = vmul.f32 %v14326_v20, %v17174_v36 }
 0xc2d   : > { %v14330_v56 = vpop.eup %14329  ;;  %v12396_v48 = vadd.f32 %v12380_v5, %v18149_v62  ;;  %14355 = vrcp.f32 %v11086_v30  ;;  %v11262_v43 = vpop.f32.mrf.mxu1  ;;  %v7039_v45 = vmul.f32 %v14328_v59, %v18153_v32  ;;  %v7053_v51 = vadd.f32 %v7037_v37, %v4381_v57  ;;  %v18156_v59 = vld [vmem:[#allocation62_spill] sm:$0xff] }
 0xc2e   : > { %v14332_v63 = vpop.eup %14331  ;;  %14357 = vrcp.f32 %v11089_v33  ;;  %v12347_v8 = vmul.f32 %v14330_v56, %v11262_v43  ;;  %v11098_v33 = vpop.xlane.xlu0 %11097  ;;  %v4385_v34 = vmul.f32 %v17652_v25, %v18156_v59 }
 0xc2f   : > { %v14334_v15 = vpop.eup %14333  ;;  %12412 = vst.msk [vmem:[%s17661_s6 + $0x10] sm:$0xff] %vm865_vm1, %v12396_v48  ;;  %v13919_v6 = vpop.f32.mrf.mxu1  ;;  %14359 = vrcp.f32 %v17614_v7  ;;  %v9695_v36 = vmul.f32 %v14332_v63, %v17176_v50  ;;  %v9709_v18 = vadd.f32 %v9693_v21, %v7053_v51  ;;  %v7055_v40 = vadd.f32 %v7039_v45, %v4383_v10  ;;  %v18155_v50 = vld [vmem:[#allocation79_spill] sm:$0xff]  ;;  %v14409_v10 = vld [vmem:[%s14792_s28 + $0x20] sm:$0xff] }
 0xc30   : > { %v14336_v26 = vpop.eup %14335  ;;  %v12363_v30 = vadd.f32 %v12347_v8, %v9707_v19  ;;  %14361 = vrcp.f32 %v17616_v52  ;;  %v11101_v14 = vpop.xlane.xlu1 %11100  ;;  %v7041_v20 = vmul.f32 %v14334_v15, %v18155_v50 }
 0xc31   : > { %v14338_v28 = vpop.eup %14337  ;;  %v11414_v12 = vpop.f32.mrf.mxu1  ;;  %14363 = vrcp.f32 %v11092_v53  ;;  %v9694_v52 = vmul.f32 %v14336_v26, %v17178_v2  ;;  %v9711_v5 = vadd.f32 %v9695_v36, %v7055_v40  ;;  %v14407_v2 = vld [vmem:[%s14792_s28 + $0x18] sm:$0xff] }
 0xc32   : > { %v14340_v24 = vpop.eup %14339  ;;  %v12379_v41 = vadd.f32 %v14406_v42, %v12363_v30  ;;  %v12349_v49 = vmul.f32 %v14338_v28, %v11414_v12  ;;  %14365 = vrcp.f32 %v11095_v16  ;;  %v11104_v35 = vpop.xlane.xlu0 %11103 }
 0xc33   : > { %v14342_v22 = vpop.eup %14341  ;;  %v13929_v7 = vpop.f32.mrf.mxu1  ;;  %14367 = vrcp.f32 %v17618_v38  ;;  %v9710_v38 = vadd.f32 %v9694_v52, %v17566_v11  ;;  %v18157_v11 = vld [vmem:[#allocation81_spill] sm:$0xff] }
 0xc34   : > { %v14344_v60 = vpop.eup %14343  ;;  %v12395_v29 = vadd.f32 %v12379_v41, %v18149_v62  ;;  %v12365_v17 = vadd.f32 %v12349_v49, %v9709_v18  ;;  %14369 = vrcp.f32 %v17620_v9  ;;  %v9697_v48 = vmul.f32 %v14342_v22, %v17180_v61  ;;  %v11107_v19 = vpop.xlane.xlu1 %11106  ;;  %v18159_v49 = vld [vmem:[#allocation17_spill] sm:$0xff] }
 0xc35   : > { %v14346_v3 = vpop.eup %14345  ;;  %v11566_v53 = vpop.f32.mrf.mxu1  ;;  %14371 = vrcp.f32 %v11098_v33  ;;  %v9696_v25 = vmul.f32 %v14344_v60, %v17182_v55  ;;  %v7057_v61 = vadd.f32 %v7041_v20, %v4385_v34  ;;  %v7043_v45 = vmul.f32 %v14340_v24, %v18157_v11  ;;  %v14408_v55 = vld [vmem:[%s14792_s28 + $0x28] sm:$0xff]  ;;  %v18158_v33 = vld [vmem:[#allocation64_spill] sm:$0xff] }
 0xc36   : > { %v14348_v16 = vpop.eup %14347  ;;  %12411 = vst.msk [vmem:[%s17661_s6 + $0x8] sm:$0xff] %vm865_vm1, %v12395_v29  ;;  %v12381_v0 = vadd.f32 %v14407_v2, %v12365_v17  ;;  %v11490_v37 = vpop.f32.mrf.mxu0  ;;  %v12351_v56 = vmul.f32 %v14346_v3, %v11566_v53  ;;  %14373 = vrcp.f32 %v11101_v14  ;;  %v14410_v3 = vld [vmem:[%s14792_s28 + $0x30] sm:$0xff] }
 0xc37   : > { %v14350_v43 = vpop.eup %14349  ;;  %v12350_v57 = vmul.f32 %v14348_v16, %v11490_v37  ;;  %v13939_v63 = vpop.f32.mrf.mxu1  ;;  %14375 = vrcp.f32 %v17624_v27  ;;  %v9713_v28 = vadd.f32 %v9697_v48, %v7057_v61  ;;  %v9712_v14 = vadd.f32 %v9696_v25, %v17576_v1  ;;  %v14411_v16 = vld [vmem:[%s14792_s28 + $0x38] sm:$0xff] }
 0xc38   : > { %v14352_v9 = vpop.eup %14351  ;;  %v12397_v8 = vadd.f32 %v12381_v0, %v18149_v62  ;;  %v12367_v21 = vadd.f32 %v12351_v56, %v9711_v5  ;;  %v13934_v15 = vpop.f32.mrf.mxu0  ;;  %14377 = vrcp.f32 %v17626_v46  ;;  %v4387_v12 = vmul.f32 %v14350_v43, %v18158_v33 }
 0xc39   : > { %v14354_v6 = vpop.eup %14353  ;;  %v12366_v32 = vadd.f32 %v12350_v57, %v9710_v38  ;;  %v9699_v24 = vmul.f32 %v14352_v9, %v17184_v44  ;;  %14379 = vrcp.f32 %v11104_v35  ;;  %v11110_v52 = vpop.xlane.xlu0 %11109  ;;  %v18160_v38 = vld [vmem:[#allocation19_spill] sm:$0xff] }
 0xc3a   : > { %v14356_v26 = vpop.eup %14355  ;;  %12413 = vst.msk [vmem:[%s17661_s6 + $0x18] sm:$0xff] %vm865_vm1, %v12397_v8  ;;  %v12383_v30 = vadd.f32 %v14408_v55, %v12367_v21  ;;  %v11642_v51 = vpop.f32.mrf.mxu0  ;;  %v9698_v22 = vmul.f32 %v14354_v6, %v18159_v49  ;;  %14381 = vrcp.f32 %v11107_v19  ;;  %v7059_v29 = vadd.f32 %v7043_v45, %v4387_v12  ;;  %v18161_v8 = vld [vmem:[#allocation18_spill] sm:$0xff]  ;;  %v14412_v6 = vld [vmem:[%s14792_s28 + $0x40] sm:$0xff] }
 0xc3b   : > { %v14358_v39 = vpop.eup %14357  ;;  %v12382_v36 = vadd.f32 %v14409_v10, %v12366_v32  ;;  %v12352_v27 = vmul.f32 %v14356_v26, %v11642_v51  ;;  %v11718_v42 = vpop.f32.mrf.mxu1  ;;  %14383 = vrcp.f32 %v11110_v52  ;;  %v14413_v26 = vld [vmem:[%s14792_s28 + $0x48] sm:$0xff] }
 0xc3c   : > { %v12399_v46 = vadd.f32 %v12383_v30, %v18149_v62  ;;  %v12353_v41 = vmul.f32 %v14358_v39, %v11718_v42  ;;  %v13944_v18 = vpop.f32.mrf.mxu0  ;;  %v14360_v7 = vpop.eup %14359  ;;  %v9715_v59 = vadd.f32 %v9699_v24, %v7059_v29  ;;  %v9714_v0 = vadd.f32 %v9698_v22, %v17586_v13 }
 0xc3d   : > { %v12398_v40 = vadd.f32 %v12382_v36, %v18149_v62  ;;  %v12368_v1 = vadd.f32 %v12352_v27, %v9712_v14  ;;  %v13949_v60 = vpop.f32.mrf.mxu1  ;;  %v14362_v17 = vpop.eup %14361  ;;  %v9701_v21 = vmul.f32 %v14360_v7, %v18161_v8  ;;  %v18162_v14 = vld [vmem:[#allocation23_spill] sm:$0xff] }
 0xc3e   : > { %v11113_v44 = vpop.xlane.xlu1 %11112  ;;  %12415 = vst.msk [vmem:[%s17661_s6 + $0x28] sm:$0xff] %vm865_vm1, %v12399_v46  ;;  %v12369_v50 = vadd.f32 %v12353_v41, %v9713_v28  ;;  %v14364_v20 = vpop.eup %14363  ;;  %v9700_v57 = vmul.f32 %v14362_v17, %v18160_v38  ;;  %v14414_v7 = vld [vmem:[%s14792_s28 + $0x50] sm:$0xff] }
 0xc3f   : > { %12414 = vst.msk [vmem:[%s17661_s6 + $0x20] sm:$0xff] %vm865_vm1, %v12398_v40  ;;  %v12384_v5 = vadd.f32 %v14410_v3, %v12368_v1  ;;  %v11794_v53 = vpop.f32.mrf.mxu0  ;;  %v14366_v34 = vpop.eup %14365  ;;  %14385 = vrcp.f32 %v11113_v44  ;;  %v9717_v39 = vadd.f32 %v9701_v21, %v17574_v58  ;;  %v14415_v1 = vld [vmem:[%s14792_s28 + $0x58] sm:$0xff] }
 0xc40   : > { %v12385_v2 = vadd.f32 %v14411_v16, %v12369_v50  ;;  %v12354_v37 = vmul.f32 %v14364_v20, %v11794_v53  ;;  %v11870_v56 = vpop.f32.mrf.mxu1  ;;  %v14368_v63 = vpop.eup %14367  ;;  %v9716_v30 = vadd.f32 %v9700_v57, %v17594_v47  ;;  %v18163_v47 = vld [vmem:[#allocation20_spill] sm:$0xff] }
 0xc41   : > { %v12400_v48 = vadd.f32 %v12384_v5, %v18149_v62  ;;  %v12355_v43 = vmul.f32 %v14366_v34, %v11870_v56  ;;  %v13954_v35 = vpop.f32.mrf.mxu0  ;;  %v14370_v13 = vpop.eup %14369  ;;  %v9703_v18 = vmul.f32 %v14368_v63, %v18163_v47  ;;  %v18164_v50 = vld [vmem:[#allocation24_spill] sm:$0xff]  ;;  %v18165_v34 = vld [vmem:[#allocation99_spill] sm:$0xff] }
 0xc42   : > { %v12401_v25 = vadd.f32 %v12385_v2, %v18149_v62  ;;  %v12370_v9 = vadd.f32 %v12354_v37, %v9714_v0  ;;  %v13959_v19 = vpop.f32.mrf.mxu1  ;;  %v14372_v61 = vpop.eup %14371  ;;  %v9702_v27 = vmul.f32 %v14370_v13, %v18162_v14  ;;  %v14416_v35 = vld [vmem:[%s14792_s28 + $0x60] sm:$0xff] }
 0xc43   : > { %12416 = vst.msk [vmem:[%s17661_s6 + $0x30] sm:$0xff] %vm865_vm1, %v12400_v48  ;;  %v12371_v15 = vadd.f32 %v12355_v43, %v9715_v59  ;;  %v14374_v45 = vpop.eup %14373  ;;  %v9719_v5 = vadd.f32 %v9703_v18, %v17584_v4 }
 0xc44   : > { %12417 = vst.msk [vmem:[%s17661_s6 + $0x38] sm:$0xff] %vm865_vm1, %v12401_v25  ;;  %v12386_v32 = vadd.f32 %v14412_v6, %v12370_v9  ;;  %v11946_v11 = vpop.f32.mrf.mxu0  ;;  %v14376_v33 = vpop.eup %14375  ;;  %v9718_v29 = vadd.f32 %v9702_v27, %v17600_v54  ;;  %v14417_v25 = vld [vmem:[%s14792_s28 + $0x68] sm:$0xff] }
 0xc45   : > { %v12387_v55 = vadd.f32 %v14413_v26, %v12371_v15  ;;  %v12356_v51 = vmul.f32 %v14372_v61, %v11946_v11  ;;  %v12022_v28 = vpop.f32.mrf.mxu1  ;;  %v14378_v42 = vpop.eup %14377  ;;  %v9705_v16 = vmul.f32 %v14376_v33, %v18165_v34 }
 0xc46   : > { %v12402_v12 = vadd.f32 %v12386_v32, %v18149_v62  ;;  %v12357_v10 = vmul.f32 %v14374_v45, %v12022_v28  ;;  %v13964_v36 = vpop.f32.mrf.mxu0  ;;  %v14380_v22 = vpop.eup %14379  ;;  %v9704_v20 = vmul.f32 %v14378_v42, %v18164_v50  ;;  %v14418_v32 = vld [vmem:[%s14792_s28 + $0x70] sm:$0xff] }
 0xc47   : > { %v12403_v24 = vadd.f32 %v12387_v55, %v18149_v62  ;;  %v12372_v46 = vadd.f32 %v12356_v51, %v9716_v30  ;;  %v13969_v41 = vpop.f32.mrf.mxu1  ;;  %v14382_v40 = vpop.eup %14381  ;;  %v9721_v19 = vadd.f32 %v9705_v16, %v17592_v23  ;;  %v14419_v23 = vld [vmem:[%s14792_s28 + $0x78] sm:$0xff]  ;;  %s14502_s28 = scalar_lea.vmem %s17765_s23, 2048 }
 0xc48   : > { %12418 = vst.msk [vmem:[%s17661_s6 + $0x40] sm:$0xff] %vm865_vm1, %v12402_v12  ;;  %v12373_v49 = vadd.f32 %v12357_v10, %v9717_v39  ;;  %v14384_v54 = vpop.eup %14383  ;;  %v9720_v38 = vadd.f32 %v9704_v20, %v17608_v31  ;;  %p14503_p9 = scmp.ne.s32.totalorder %s17765_s23, %s14502_s28  ;;  %p14510_p2 = scmp.lt.s32.totalorder %s14508_s20, %s14502_s28 }
 0xc49   : > { %12419 = vst.msk [vmem:[%s17661_s6 + $0x48] sm:$0xff] %vm865_vm1, %v12403_v24  ;;  %v12388_v58 = vadd.f32 %v14414_v7, %v12372_v46  ;;  %v12098_v52 = vpop.f32.mrf.mxu0 }
 0xc4a   : > { %v12389_v60 = vadd.f32 %v14415_v1, %v12373_v49  ;;  %v12358_v17 = vmul.f32 %v14380_v22, %v12098_v52  ;;  %v12174_v44 = vpop.f32.mrf.mxu1  ;;  %p14504_p13 = pnand %p14503_p9, %p18166_p12  ;;  %p14511_p10 = por %p14510_p2, %p14509_p5 }
 0xc4b   : > { %v12404_v3 = vadd.f32 %v12388_v58, %v18149_v62  ;;  %v12359_v53 = vmul.f32 %v14382_v40, %v12174_v44  ;;  %v13974_v59 = vpop.f32.mrf.mxu0 }
 0xc4c   : > { %v12405_v2 = vadd.f32 %v12389_v60, %v18149_v62  ;;  %v12374_v0 = vadd.f32 %v12358_v17, %v9718_v29  ;;  %v13979_v37 = vpop.f32.mrf.mxu1  ;;  %v14386_v43 = vpop.eup %14385  ;;  %p14505_p0 = pneg %p14504_p13 }
 0xc4d   : > { %12420 = vst.msk [vmem:[%s17661_s6 + $0x50] sm:$0xff] %vm865_vm1, %v12404_v3  ;;  %v12375_v56 = vadd.f32 %v12359_v53, %v9719_v5  ;;  %v12250_v48 = vpop.f32.mrf.mxu0 }
 0xc4e   : > { %12421 = vst.msk [vmem:[%s17661_s6 + $0x58] sm:$0xff] %vm865_vm1, %v12405_v2  ;;  %v12390_v4 = vadd.f32 %v14416_v35, %v12374_v0  ;;  %v12360_v57 = vmul.f32 %v14384_v54, %v12250_v48  ;;  %v12326_v63 = vpop.f32.mrf.mxu1  ;;  %p14512_p1 = pnand %p14511_p10, %p14505_p0 }
 0xc4f   : > { %v12391_v9 = vadd.f32 %v14417_v25, %v12375_v56  ;;  %v12361_v8 = vmul.f32 %v14386_v43, %v12326_v63  ;;  %v13984_v21 = vpop.f32.mrf.mxu0 }
 0xc50   : > { %v12406_v13 = vadd.f32 %v12390_v4, %v18149_v62  ;;  %v12376_v15 = vadd.f32 %v12360_v57, %v9720_v38  ;;  %v13989_v61 = vpop.f32.mrf.mxu1 }
 0xc51   : > { %v12407_v6 = vadd.f32 %v12391_v9, %v18149_v62  ;;  %v12377_v31 = vadd.f32 %v12361_v8, %v9721_v19 }
 0xc52   : > { %12422 = vst.msk [vmem:[%s17661_s6 + $0x60] sm:$0xff] %vm865_vm1, %v12406_v13  ;;  %v12392_v11 = vadd.f32 %v14418_v32, %v12376_v15 }
 0xc53   : > { %12423 = vst.msk [vmem:[%s17661_s6 + $0x68] sm:$0xff] %vm865_vm1, %v12407_v6  ;;  %v12393_v45 = vadd.f32 %v14419_v23, %v12377_v31 }
 0xc54   : > { %v12408_v26 = vadd.f32 %v12392_v11, %v18149_v62 }
 0xc55   : > { %v12409_v55 = vadd.f32 %v12393_v45, %v18149_v62 }
 0xc56   : > { %12424 = vst.msk [vmem:[%s17661_s6 + $0x70] sm:$0xff] %vm865_vm1, %v12408_v26 }
 0xc57   : > { %12425 = vst.msk [vmem:[%s17661_s6 + $0x78] sm:$0xff] %vm865_vm1, %v12409_v55 }
 0xc58   : > { %14515 = shalt.err (!%p14512_p1)
}
 0xc59   : > { %s14516_s25 = scalar_lea.hbm %s17763_s21, 2048  ;;  %s14520_s29 = scalar_lea.hbm %s17817_s4, 4096 }
 0xc5a   : > { %p14517_p4 = scmp.ne.s32.totalorder %s17763_s21, %s14516_s25  ;;  %p14521_p8 = scmp.lt.s32.totalorder %s17763_s21, %s17817_s4 }
 0xc5b   : > { %p14522_p11 = scmp.lt.s32.totalorder %s14520_s29, %s14516_s25 }
 0xc5c   : > { %p14518_p3 = pnand %p14517_p4, %p18166_p12 }
 0xc5d   : > { %p14523_p6 = por %p14522_p11, %p14521_p8 }
 0xc5e   : > { %p14519_p7 = pneg %p14518_p3 }
 0xc60   : > { %p14524_p9 = pnand %p14523_p6, %p14519_p7 }
 0xc62   : > { %14527 = shalt.err (!%p14524_p9)
}
 0xc63   : > { %s14593_s24 = smov 128   ;;  %s14594_s26 = smov 8  }
 0xc64   : > { %13998 = dma.vmem_to_hbm [thread:$0]  (%p18166_p12), %s17765_s23, 2048, %s17763_s21, %s12427_s19, %s14593_s24, %s14593_s24, %s14594_s26  }
 0xc65 PF: > { %s12455_s8 = sand.u32 1, %s14562_s15   ;;  %p18167_p13 = scmp.ne.s32.totalorder %s17908_s22, 0 }
 0xc66   : > { %p18168_p0 = scmp.ge.s32.totalorder %s14574_s18, 2  ;;  %s12456_s6 = scalar_lea.sflag [#allocation4], %s12455_s8 }
 0xc68   : > { %p14012_p5 = pnand %p18168_p0, %p18167_p13 }
 0xc6a   : > { %p14013_p2 = pneg %p14012_p5 }
 0xc6c   : > { %14557 = dma.done.wait (%p14013_p2), %s12456_s6, 2048  }
 0xc6d   : > { %14559 = vsyncadd (%p14013_p2), %s12456_s6, 4294965248  ;;  %s18169_s9 = sld [smem:[#allocation13_spill]]  ;;  %p20_p10 = scmp.ge.s32.totalorder %s14674_s27, 4  }
 0xc6e   : > { %s18170_s15 = smov %s14566_s16  ;;  %s18171_s16 = smov %s14570_s17 }
 0xc6f   : > { %s18173_s18 = smov %s14674_s27  ;;  %22 = sbr.rel (!%p20_p10) target bundleno = 10 (0xa), region = 101 }
 0xc73   : > { %s18172_s17 = smov %s18169_s9 }
 0xc74   :  { %12461 = vsyncpa [#allocation3], 1 }
 0xc75   :  { %12463 = vsyncpa [#allocation3 + $0x1], 1 }
 0xc76   :  { %12464 = vsyncpa [#allocation6], 1 }
 0xc77   :  { %12466 = vsyncpa [#allocation6 + $0x1], 1 }
 0xc78   :  { %12467 = vsyncpa [#allocation4], 1 }
 0xc79   :  { %12469 = vsyncpa [#allocation4 + $0x1], 1 }

</bundles_post_ra>
